<compile_context>
chip_gen: v6e
topology: v6e:2x2x1
jax: 0.10.0
libtpu: 0.0.40
codegen_flags: <defaults>
</compile_context>

<pallas_src>
import jax
import jax.numpy as jnp
from jax.experimental import pallas as pl
from jax.experimental.pallas import tpu as pltpu

_PREC = jax.lax.Precision.HIGHEST  # only used by the pure-JAX reference


# ----------------------------------------------------------------------------
# In-kernel helpers
# ----------------------------------------------------------------------------
def _pool2x2_from_ref(a_ref, B, H, W, C):
    """2x2 / stride-2 max pool of a (B*H*W, C) VMEM ref -> (B, H/2, W/2, C).

    Horizontal (W) pairs are adjacent rows of the flat (b,h,w) layout, so they
    are two sublane-stride-2 reads of the ref.  Vertical (H) pairs are handled
    on the value with a reshape + max of the two major-dim halves.  No
    intermediate scratch buffers / round trips.
    """
    H2, W2 = H // 2, W // 2
    hm = jnp.maximum(a_ref[pl.ds(0, B * H * W2, 2), :],
                     a_ref[pl.ds(1, B * H * W2, 2), :])          # (B*H*W2, C)
    t = hm.reshape(B * H2, 2, W2, C)                             # (.., h%2, w2, c)
    return jnp.maximum(t[:, 0, :, :], t[:, 1, :, :]).reshape(B, H2, W2, C)


def _ae_fused_kernel(x_ref, w1_ref, b1_ref, w2_ref, b2_ref,
                     tw1_ref, tb1_ref, tw2_ref, tb2_ref,
                     o_ref,
                     xpad1_ref, a1_ref, xpad2_ref, a2_ref):
    """Refs (per grid step = one batch block of B images):
      x_ref   : (B, H, W, Cin)        NHWC input (f32)
      w1_ref  : (9*Cin, C1)           conv1 taps, im2col row order (bf16)
      b1_ref  : (1, C1)
      w2_ref  : (9*C1, C2)            conv2 taps (bf16)
      b2_ref  : (1, C2)
      tw1_ref : (C2, 4*C1)            t_conv1, 4 taps concatenated (bf16)
      tb1_ref : (1, 4*C1)
      tw2_ref : (4*C1, NOUT)          t_conv2 block-diag, padded to 128 cols
      tb2_ref : (1, NOUT)
      o_ref   : (B, H/4*W/4, NOUT)    tap-blocked, lane-dense decoder output
      scratch : padded conv inputs + conv activations (all VMEM)
    """
    B, H, W, Cin = x_ref.shape
    C1 = b1_ref.shape[1]
    C2 = b2_ref.shape[1]
    H2, W2, H4, W4 = H // 2, W // 2, H // 4, W // 4
    NOUT = tb2_ref.shape[1]
    f32, bf16 = jnp.float32, jnp.bfloat16

    # Zero ONLY the 1-pixel padding borders (interiors are fully overwritten
    # below).  Done every step — a few thin slabs — so correctness does not
    # depend on which TensorCore ran program_id==0 when the parallel grid axis
    # is sharded across cores (v7x) and scratch is per-core.
    def zero_border(ref, h, w, c):
        ref[:, 0:1, :, :] = jnp.zeros((B, 1, w + 2, c), f32)
        ref[:, h + 1:h + 2, :, :] = jnp.zeros((B, 1, w + 2, c), f32)
        ref[:, :, 0:1, :] = jnp.zeros((B, h + 2, 1, c), f32)
        ref[:, :, w + 1:w + 2, :] = jnp.zeros((B, h + 2, 1, c), f32)

    zero_border(xpad1_ref, H, W, Cin)
    zero_border(xpad2_ref, H2, W2, C1)

    # ---------- stage 1: conv1 3x3 pad=1 (one K=9*Cin matmul) + ReLU + pool --
    xpad1_ref[:, 1:H + 1, 1:W + 1, :] = x_ref[...]
    im1 = jnp.concatenate(
        [xpad1_ref[:, dh:dh + H, dw:dw + W, :].reshape(B * H * W, Cin)
         for dh in range(3) for dw in range(3)], axis=-1)        # (B*H*W, 9*Cin)
    y1 = jnp.dot(im1.astype(bf16), w1_ref[...], preferred_element_type=f32)
    a1_ref[...] = jnp.maximum(y1 + b1_ref[...], 0.0)             # (B*H*W, C1)
    p1 = _pool2x2_from_ref(a1_ref, B, H, W, C1)                  # (B,H2,W2,C1)

    # ---------- stage 2: conv2 3x3 pad=1 (one K=9*C1 matmul) + ReLU + pool ---
    xpad2_ref[:, 1:H2 + 1, 1:W2 + 1, :] = p1
    im2 = jnp.concatenate(
        [xpad2_ref[:, dh:dh + H2, dw:dw + W2, :].reshape(B * H2 * W2, C1)
         for dh in range(3) for dw in range(3)], axis=-1)        # (B*H2*W2, 9*C1)
    y2 = jnp.dot(im2.astype(bf16), w2_ref[...], preferred_element_type=f32)
    a2_ref[...] = jnp.maximum(y2 + b2_ref[...], 0.0)             # (B*H2*W2, C2)
    p2 = _pool2x2_from_ref(a2_ref, B, H2, W2, C2)                # (B,H4,W4,C2)
    p2 = p2.reshape(B * H4 * W4, C2)

    # ---------- decoder: t_conv1 (ReLU) then t_conv2 (sigmoid) ---------------
    # kernel==stride==2 => the 4 taps never overlap; each layer is one matmul.
    z1 = jnp.dot(p2.astype(bf16), tw1_ref[...], preferred_element_type=f32)
    z1 = jnp.maximum(z1 + tb1_ref[...], 0.0)                     # (B*M4, 4*C1)
    z2 = jnp.dot(z1.astype(bf16), tw2_ref[...], preferred_element_type=f32)
    z2 = z2 + tb2_ref[...]                                       # (B*M4, NOUT)
    # sigmoid: exp on the EUP, approx reciprocal on the EUP (divide off VPU).
    sig = pl.reciprocal(1.0 + jnp.exp(-z2), approx=True)
    o_ref[...] = sig.reshape(B, H4 * W4, NOUT)


# ----------------------------------------------------------------------------
# Wrapper: weight re-layout, single pallas_call, final pixel-shuffle to NCHW
# ----------------------------------------------------------------------------
def _pick_batch_block(n, cap=8):
    """Largest divisor of n that is <= cap, keeping >=2 grid steps whenever
    n >= 2 (so the parallel grid axis can shard across v7x's 2 TensorCores)."""
    if n >= 2:
        cap = min(cap, n // 2)
    cap = max(cap, 1)
    best = 1
    for b in range(1, cap + 1):
        if n % b == 0:
            best = b
    return best


@jax.jit
def autoencoder_forward(x_nchw, p):
    """Pallas implementation of AutoEncoder.forward. Input/output are NCHW."""
    N, Cin, H, W = x_nchw.shape
    assert H % 4 == 0 and W % 4 == 0, "two 2x2 pools require H,W % 4 == 0"
    C1 = p["w1"].shape[0]                   # 16
    C2 = p["w2"].shape[0]                   # 8
    Cout = p["tw2"].shape[1]                # 3
    H2, W2, H4, W4 = H // 2, W // 2, H // 4, W // 4
    M4 = H4 * W4
    NOUT = max(128, -(-16 * Cout // 128) * 128)   # lane-dense output width

    B = _pick_batch_block(N)

    # Conv taps flattened to single-matmul operands (bf16 MXU, f32 acc).
    # Row order = (dh*3 + dw)*Cin + ci, matching the in-kernel im2col concat.
    w1 = jnp.transpose(p["w1"], (2, 3, 1, 0)).reshape(9 * Cin, C1).astype(jnp.bfloat16)
    w2 = jnp.transpose(p["w2"], (2, 3, 1, 0)).reshape(9 * C1, C2).astype(jnp.bfloat16)
    b1 = p["b1"].reshape(1, C1).astype(jnp.float32)
    b2 = p["b2"].reshape(1, C2).astype(jnp.float32)

    # t_conv1 taps concatenated: col = (2*dh1 + dw1)*C1 + co1.
    tw1 = jnp.transpose(p["tw1"], (0, 2, 3, 1)).reshape(C2, 4 * C1).astype(jnp.bfloat16)
    tb1 = jnp.tile(p["tb1"], 4).reshape(1, 4 * C1).astype(jnp.float32)

    # t_conv2 block-diagonal over the 4 t_conv1 taps, zero-padded to NOUT
    # columns so the final matmul / store / HBM writeback are lane-dense:
    # col = (2*dh1+dw1)*4*Cout + (2*dh2+dw2)*Cout + co2.
    tw2m = jnp.transpose(p["tw2"], (0, 2, 3, 1)).reshape(C1, 4 * Cout)
    tw2 = jnp.kron(jnp.eye(4, dtype=tw2m.dtype), tw2m)            # (4*C1, 16*Cout)
    tw2 = jnp.pad(tw2, ((0, 0), (0, NOUT - 16 * Cout))).astype(jnp.bfloat16)
    tb2 = jnp.pad(jnp.tile(p["tb2"], 16), (0, NOUT - 16 * Cout))
    tb2 = tb2.reshape(1, NOUT).astype(jnp.float32)

    xh = jnp.transpose(x_nchw, (0, 2, 3, 1)).astype(jnp.float32)  # NCHW->NHWC

    out = pl.pallas_call(
        _ae_fused_kernel,
        out_shape=jax.ShapeDtypeStruct((N, M4, NOUT), jnp.float32),
        grid=(N // B,),
        in_specs=[
            pl.BlockSpec((B, H, W, Cin), lambda n: (n, 0, 0, 0)),
            pl.BlockSpec((9 * Cin, C1), lambda n: (0, 0)),
            pl.BlockSpec((1, C1), lambda n: (0, 0)),
            pl.BlockSpec((9 * C1, C2), lambda n: (0, 0)),
            pl.BlockSpec((1, C2), lambda n: (0, 0)),
            pl.BlockSpec((C2, 4 * C1), lambda n: (0, 0)),
            pl.BlockSpec((1, 4 * C1), lambda n: (0, 0)),
            pl.BlockSpec((4 * C1, NOUT), lambda n: (0, 0)),
            pl.BlockSpec((1, NOUT), lambda n: (0, 0)),
        ],
        out_specs=pl.BlockSpec((B, M4, NOUT), lambda n: (n, 0, 0)),
        scratch_shapes=[
            pltpu.VMEM((B, H + 2, W + 2, Cin), jnp.float32),    # padded conv1 in
            pltpu.VMEM((B * H * W, C1), jnp.float32),           # conv1 act
            pltpu.VMEM((B, H2 + 2, W2 + 2, C1), jnp.float32),   # padded conv2 in
            pltpu.VMEM((B * H2 * W2, C2), jnp.float32),         # conv2 act
        ],
        compiler_params=pltpu.CompilerParams(
            dimension_semantics=("parallel",),
            vmem_limit_bytes=32 * 1024 * 1024),
    )(xh, w1, b1, w2, b2, tw1, tb1, tw2, tb2)

    # Tiny XLA glue on the small decoder output: drop the lane padding,
    # interleave the 16 (dh1,dw1,dh2,dw2) taps (pixel shuffle), back to NCHW.
    y = out[:, :, :16 * Cout].reshape(N, H4, W4, 2, 2, 2, 2, Cout)
    y = jnp.transpose(y, (0, 7, 1, 3, 5, 2, 4, 6))   # n,c,h4,dh1,dh2,w4,dw1,dw2
    return y.reshape(N, Cout, H, W)


# ----------------------------------------------------------------------------
# Deterministic parameter init (PyTorch weight layouts) + pure-JAX reference
# ----------------------------------------------------------------------------
def init_params(key):
    ks = jax.random.split(key, 8)
    n = jax.random.normal
    return {
        "w1": 0.10 * n(ks[0], (16, 3, 3, 3), jnp.float32),   # Conv2d OIHW
        "b1": 0.05 * n(ks[1], (16,), jnp.float32),
        "w2": 0.10 * n(ks[2], (8, 16, 3, 3), jnp.float32),
        "b2": 0.05 * n(ks[3], (8,), jnp.float32),
        "tw1": 0.10 * n(ks[4], (8, 16, 2, 2), jnp.float32),  # ConvT (in,out,kh,kw)
        "tb1": 0.05 * n(ks[5], (16,), jnp.float32),
        "tw2": 0.10 * n(ks[6], (16, 3, 2, 2), jnp.float32),
        "tb2": 0.05 * n(ks[7], (3,), jnp.float32),
    }


def reference_forward(x, p):
    """Pure-JAX (XLA) reference with PyTorch semantics, NCHW, f32 HIGHEST."""
    def conv(x, w, b):
        y = jax.lax.conv_general_dilated(
            x, w, (1, 1), ((1, 1), (1, 1)),
            dimension_numbers=("NCHW", "OIHW", "NCHW"), precision=_PREC)
        return y + b[None, :, None, None]

    def pool(x):
        return jax.lax.reduce_window(x, -jnp.inf, jax.lax.max,
                                     (1, 1, 2, 2), (1, 1, 2, 2), "VALID")

    def tconv(x, w, b):  # w: (Cin, Cout, 2, 2), stride 2, padding 0
        w2 = jnp.flip(jnp.transpose(w, (1, 0, 2, 3)), axis=(2, 3))
        y = jax.lax.conv_general_dilated(
            x, w2, (1, 1), ((1, 1), (1, 1)), lhs_dilation=(2, 2),
            dimension_numbers=("NCHW", "OIHW", "NCHW"), precision=_PREC)
        return y + b[None, :, None, None]

    h = pool(jax.nn.relu(conv(x, p["w1"], p["b1"])))
    h = pool(jax.nn.relu(conv(h, p["w2"], p["b2"])))
    h = jax.nn.relu(tconv(h, p["tw1"], p["tb1"]))
    return jax.nn.sigmoid(tconv(h, p["tw2"], p["tb2"]))


if __name__ == "__main__":
    key = jax.random.PRNGKey(0)
    pkey, xkey = jax.random.split(key)
    params = init_params(pkey)
    # cifar-style input (args.dataset_name == 'cifar'): NCHW, 3 channels.
    x = jax.random.normal(xkey, (2, 3, 16, 16), jnp.float32)

    y = jax.block_until_ready(autoencoder_forward(x, params))
    assert y.shape == (2, 3, 16, 16), y.shape

    # Kernel uses bf16 MXU inputs with f32 accumulation + approx reciprocal in
    # the sigmoid; reference is full-f32 HIGHEST, hence the loose tolerance.
    y_ref = reference_forward(x, params)
    err = float(jnp.max(jnp.abs(y - y_ref)))
    assert err < 2e-2, f"max abs error vs reference: {err}"

    print("KERNEL_OK")
</pallas_src>

<mosaic_0001>
module attributes {stable_mosaic.version = 11 : i64} {
  func.func @_ae_fused_kernel(%arg0: i32, %arg1: memref<1x16x16x3xf32, #tpu.memory_space<vmem>>, %arg2: memref<27x16xbf16, #tpu.memory_space<vmem>>, %arg3: memref<1x16xf32, #tpu.memory_space<vmem>>, %arg4: memref<144x8xbf16, #tpu.memory_space<vmem>>, %arg5: memref<1x8xf32, #tpu.memory_space<vmem>>, %arg6: memref<8x64xbf16, #tpu.memory_space<vmem>>, %arg7: memref<1x64xf32, #tpu.memory_space<vmem>>, %arg8: memref<64x128xbf16, #tpu.memory_space<vmem>>, %arg9: memref<1x128xf32, #tpu.memory_space<vmem>>, %arg10: memref<1x16x128xf32, #tpu.memory_space<vmem>>, %arg11: memref<1x18x18x3xf32, #tpu.memory_space<vmem>>, %arg12: memref<256x16xf32, #tpu.memory_space<vmem>>, %arg13: memref<1x10x10x16xf32, #tpu.memory_space<vmem>>, %arg14: memref<64x8xf32, #tpu.memory_space<vmem>>) attributes {dimension_semantics = [#tpu.dimension_semantics<parallel>], iteration_bounds = array<i64: 2>, scalar_prefetch = 0 : i64, scratch_operands = 4 : i64, tpu.core_type = #tpu.core_type<tc>, window_params = [{transform_indices = @transform_0, window_bounds = array<i64: 1, 16, 16, 3>}, {pipeline_mode = #tpu.pipeline_mode<synchronous>, transform_indices = @transform_1, window_bounds = array<i64: 27, 16>}, {pipeline_mode = #tpu.pipeline_mode<synchronous>, transform_indices = @transform_2, window_bounds = array<i64: 1, 16>}, {pipeline_mode = #tpu.pipeline_mode<synchronous>, transform_indices = @transform_3, window_bounds = array<i64: 144, 8>}, {pipeline_mode = #tpu.pipeline_mode<synchronous>, transform_indices = @transform_4, window_bounds = array<i64: 1, 8>}, {pipeline_mode = #tpu.pipeline_mode<synchronous>, transform_indices = @transform_5, window_bounds = array<i64: 8, 64>}, {pipeline_mode = #tpu.pipeline_mode<synchronous>, transform_indices = @transform_6, window_bounds = array<i64: 1, 64>}, {pipeline_mode = #tpu.pipeline_mode<synchronous>, transform_indices = @transform_7, window_bounds = array<i64: 64, 128>}, {pipeline_mode = #tpu.pipeline_mode<synchronous>, transform_indices = @transform_8, window_bounds = array<i64: 1, 128>}, {transform_indices = @transform_9, window_bounds = array<i64: 1, 16, 128>}]} {
    %cst = arith.constant 0.000000e+00 : f32
    %0 = vector.broadcast %cst : f32 to vector<1x1x18x3xf32>
    %c0 = arith.constant 0 : index
    %c0_0 = arith.constant 0 : index
    %c0_1 = arith.constant 0 : index
    %c0_2 = arith.constant 0 : index
    %1 = vector.load %arg11[%c0, %c0_0, %c0_1, %c0_2] : memref<1x18x18x3xf32, #tpu.memory_space<vmem>>, vector<1x1x18x3xf32>
    tpu.vector_store %arg11[%c0, %c0_0, %c0_1, %c0_2], %0 {strides = array<i32>} : memref<1x18x18x3xf32, #tpu.memory_space<vmem>>, vector<1x1x18x3xf32>,
    %cst_3 = arith.constant 0.000000e+00 : f32
    %2 = vector.broadcast %cst_3 : f32 to vector<1x1x18x3xf32>
    %c0_4 = arith.constant 0 : index
    %c17 = arith.constant 17 : index
    %c0_5 = arith.constant 0 : index
    %c0_6 = arith.constant 0 : index
    %3 = vector.load %arg11[%c0_4, %c17, %c0_5, %c0_6] : memref<1x18x18x3xf32, #tpu.memory_space<vmem>>, vector<1x1x18x3xf32>
    tpu.vector_store %arg11[%c0_4, %c17, %c0_5, %c0_6], %2 {strides = array<i32>} : memref<1x18x18x3xf32, #tpu.memory_space<vmem>>, vector<1x1x18x3xf32>,
    %cst_7 = arith.constant 0.000000e+00 : f32
    %4 = vector.broadcast %cst_7 : f32 to vector<1x18x1x3xf32>
    %c0_8 = arith.constant 0 : index
    %c0_9 = arith.constant 0 : index
    %c0_10 = arith.constant 0 : index
    %c0_11 = arith.constant 0 : index
    %5 = vector.load %arg11[%c0_8, %c0_9, %c0_10, %c0_11] : memref<1x18x18x3xf32, #tpu.memory_space<vmem>>, vector<1x18x1x3xf32>
    tpu.vector_store %arg11[%c0_8, %c0_9, %c0_10, %c0_11], %4 {strides = array<i32>} : memref<1x18x18x3xf32, #tpu.memory_space<vmem>>, vector<1x18x1x3xf32>,
    %cst_12 = arith.constant 0.000000e+00 : f32
    %6 = vector.broadcast %cst_12 : f32 to vector<1x18x1x3xf32>
    %c0_13 = arith.constant 0 : index
    %c0_14 = arith.constant 0 : index
    %c17_15 = arith.constant 17 : index
    %c0_16 = arith.constant 0 : index
    %7 = vector.load %arg11[%c0_13, %c0_14, %c17_15, %c0_16] : memref<1x18x18x3xf32, #tpu.memory_space<vmem>>, vector<1x18x1x3xf32>
    tpu.vector_store %arg11[%c0_13, %c0_14, %c17_15, %c0_16], %6 {strides = array<i32>} : memref<1x18x18x3xf32, #tpu.memory_space<vmem>>, vector<1x18x1x3xf32>,
    %cst_17 = arith.constant 0.000000e+00 : f32
    %8 = vector.broadcast %cst_17 : f32 to vector<1x1x10x16xf32>
    %c0_18 = arith.constant 0 : index
    %c0_19 = arith.constant 0 : index
    %c0_20 = arith.constant 0 : index
    %c0_21 = arith.constant 0 : index
    %9 = vector.load %arg13[%c0_18, %c0_19, %c0_20, %c0_21] : memref<1x10x10x16xf32, #tpu.memory_space<vmem>>, vector<1x1x10x16xf32>
    tpu.vector_store %arg13[%c0_18, %c0_19, %c0_20, %c0_21], %8 {strides = array<i32>} : memref<1x10x10x16xf32, #tpu.memory_space<vmem>>, vector<1x1x10x16xf32>,
    %cst_22 = arith.constant 0.000000e+00 : f32
    %10 = vector.broadcast %cst_22 : f32 to vector<1x1x10x16xf32>
    %c0_23 = arith.constant 0 : index
    %c9 = arith.constant 9 : index
    %c0_24 = arith.constant 0 : index
    %c0_25 = arith.constant 0 : index
    %11 = vector.load %arg13[%c0_23, %c9, %c0_24, %c0_25] : memref<1x10x10x16xf32, #tpu.memory_space<vmem>>, vector<1x1x10x16xf32>
    tpu.vector_store %arg13[%c0_23, %c9, %c0_24, %c0_25], %10 {strides = array<i32>} : memref<1x10x10x16xf32, #tpu.memory_space<vmem>>, vector<1x1x10x16xf32>,
    %cst_26 = arith.constant 0.000000e+00 : f32
    %12 = vector.broadcast %cst_26 : f32 to vector<1x10x1x16xf32>
    %c0_27 = arith.constant 0 : index
    %c0_28 = arith.constant 0 : index
    %c0_29 = arith.constant 0 : index
    %c0_30 = arith.constant 0 : index
    %13 = vector.load %arg13[%c0_27, %c0_28, %c0_29, %c0_30] : memref<1x10x10x16xf32, #tpu.memory_space<vmem>>, vector<1x10x1x16xf32>
    tpu.vector_store %arg13[%c0_27, %c0_28, %c0_29, %c0_30], %12 {strides = array<i32>} : memref<1x10x10x16xf32, #tpu.memory_space<vmem>>, vector<1x10x1x16xf32>,
    %cst_31 = arith.constant 0.000000e+00 : f32
    %14 = vector.broadcast %cst_31 : f32 to vector<1x10x1x16xf32>
    %c0_32 = arith.constant 0 : index
    %c0_33 = arith.constant 0 : index
    %c9_34 = arith.constant 9 : index
    %c0_35 = arith.constant 0 : index
    %15 = vector.load %arg13[%c0_32, %c0_33, %c9_34, %c0_35] : memref<1x10x10x16xf32, #tpu.memory_space<vmem>>, vector<1x10x1x16xf32>
    tpu.vector_store %arg13[%c0_32, %c0_33, %c9_34, %c0_35], %14 {strides = array<i32>} : memref<1x10x10x16xf32, #tpu.memory_space<vmem>>, vector<1x10x1x16xf32>,
    %c0_36 = arith.constant 0 : index
    %c0_37 = arith.constant 0 : index
    %c0_38 = arith.constant 0 : index
    %c0_39 = arith.constant 0 : index
    %16 = vector.load %arg1[%c0_36, %c0_37, %c0_38, %c0_39] : memref<1x16x16x3xf32, #tpu.memory_space<vmem>>, vector<1x16x16x3xf32>
    %c0_40 = arith.constant 0 : index
    %c1 = arith.constant 1 : index
    %c1_41 = arith.constant 1 : index
    %c0_42 = arith.constant 0 : index
    %17 = vector.load %arg11[%c0_40, %c1, %c1_41, %c0_42] : memref<1x18x18x3xf32, #tpu.memory_space<vmem>>, vector<1x16x16x3xf32>
    tpu.vector_store %arg11[%c0_40, %c1, %c1_41, %c0_42], %16 {strides = array<i32>} : memref<1x18x18x3xf32, #tpu.memory_space<vmem>>, vector<1x16x16x3xf32>,
    %c0_43 = arith.constant 0 : index
    %c0_44 = arith.constant 0 : index
    %c0_45 = arith.constant 0 : index
    %c0_46 = arith.constant 0 : index
    %18 = vector.load %arg11[%c0_43, %c0_44, %c0_45, %c0_46] : memref<1x18x18x3xf32, #tpu.memory_space<vmem>>, vector<1x16x16x3xf32>
    %19 = vector.shape_cast %18 : vector<1x16x16x3xf32> to vector<256x3xf32>
    %c0_47 = arith.constant 0 : index
    %c0_48 = arith.constant 0 : index
    %c1_49 = arith.constant 1 : index
    %c0_50 = arith.constant 0 : index
    %20 = vector.load %arg11[%c0_47, %c0_48, %c1_49, %c0_50] : memref<1x18x18x3xf32, #tpu.memory_space<vmem>>, vector<1x16x16x3xf32>
    %21 = vector.shape_cast %20 : vector<1x16x16x3xf32> to vector<256x3xf32>
    %c0_51 = arith.constant 0 : index
    %c0_52 = arith.constant 0 : index
    %c2 = arith.constant 2 : index
    %c0_53 = arith.constant 0 : index
    %22 = vector.load %arg11[%c0_51, %c0_52, %c2, %c0_53] : memref<1x18x18x3xf32, #tpu.memory_space<vmem>>, vector<1x16x16x3xf32>
    %23 = vector.shape_cast %22 : vector<1x16x16x3xf32> to vector<256x3xf32>
    %c0_54 = arith.constant 0 : index
    %c1_55 = arith.constant 1 : index
    %c0_56 = arith.constant 0 : index
    %c0_57 = arith.constant 0 : index
    %24 = vector.load %arg11[%c0_54, %c1_55, %c0_56, %c0_57] : memref<1x18x18x3xf32, #tpu.memory_space<vmem>>, vector<1x16x16x3xf32>
    %25 = vector.shape_cast %24 : vector<1x16x16x3xf32> to vector<256x3xf32>
    %c0_58 = arith.constant 0 : index
    %c1_59 = arith.constant 1 : index
    %c1_60 = arith.constant 1 : index
    %c0_61 = arith.constant 0 : index
    %26 = vector.load %arg11[%c0_58, %c1_59, %c1_60, %c0_61] : memref<1x18x18x3xf32, #tpu.memory_space<vmem>>, vector<1x16x16x3xf32>
    %27 = vector.shape_cast %26 : vector<1x16x16x3xf32> to vector<256x3xf32>
    %c0_62 = arith.constant 0 : index
    %c1_63 = arith.constant 1 : index
    %c2_64 = arith.constant 2 : index
    %c0_65 = arith.constant 0 : index
    %28 = vector.load %arg11[%c0_62, %c1_63, %c2_64, %c0_65] : memref<1x18x18x3xf32, #tpu.memory_space<vmem>>, vector<1x16x16x3xf32>
    %29 = vector.shape_cast %28 : vector<1x16x16x3xf32> to vector<256x3xf32>
    %c0_66 = arith.constant 0 : index
    %c2_67 = arith.constant 2 : index
    %c0_68 = arith.constant 0 : index
    %c0_69 = arith.constant 0 : index
    %30 = vector.load %arg11[%c0_66, %c2_67, %c0_68, %c0_69] : memref<1x18x18x3xf32, #tpu.memory_space<vmem>>, vector<1x16x16x3xf32>
    %31 = vector.shape_cast %30 : vector<1x16x16x3xf32> to vector<256x3xf32>
    %c0_70 = arith.constant 0 : index
    %c2_71 = arith.constant 2 : index
    %c1_72 = arith.constant 1 : index
    %c0_73 = arith.constant 0 : index
    %32 = vector.load %arg11[%c0_70, %c2_71, %c1_72, %c0_73] : memref<1x18x18x3xf32, #tpu.memory_space<vmem>>, vector<1x16x16x3xf32>
    %33 = vector.shape_cast %32 : vector<1x16x16x3xf32> to vector<256x3xf32>
    %c0_74 = arith.constant 0 : index
    %c2_75 = arith.constant 2 : index
    %c2_76 = arith.constant 2 : index
    %c0_77 = arith.constant 0 : index
    %34 = vector.load %arg11[%c0_74, %c2_75, %c2_76, %c0_77] : memref<1x18x18x3xf32, #tpu.memory_space<vmem>>, vector<1x16x16x3xf32>
    %35 = vector.shape_cast %34 : vector<1x16x16x3xf32> to vector<256x3xf32>
    %36 = tpu.concatenate %19, %21, %23, %25, %27, %29, %31, %33, %35 in 1 : vector<256x3xf32>, vector<256x3xf32>, vector<256x3xf32>, vector<256x3xf32>, vector<256x3xf32>, vector<256x3xf32>, vector<256x3xf32>, vector<256x3xf32>, vector<256x3xf32> -> vector<256x27xf32>
    %37 = arith.truncf %36 : vector<256x27xf32> to vector<256x27xbf16>
    %c0_78 = arith.constant 0 : index
    %c0_79 = arith.constant 0 : index
    %38 = vector.load %arg2[%c0_78, %c0_79] : memref<27x16xbf16, #tpu.memory_space<vmem>>, vector<27x16xbf16>
    %cst_80 = arith.constant dense<0.000000e+00> : vector<256x16xf32>
    %39 = tpu.matmul %37, %38, %cst_80 {dimension_numbers = #tpu.dot_dimension_numbers<[1], [0], [0], [1], [0, 0, 1, 1], [], []>} : vector<256x27xbf16>, vector<27x16xbf16>, vector<256x16xf32> -> vector<256x16xf32>
    %c0_81 = arith.constant 0 : index
    %c0_82 = arith.constant 0 : index
    %40 = vector.load %arg3[%c0_81, %c0_82] : memref<1x16xf32, #tpu.memory_space<vmem>>, vector<1x16xf32>
    %41 = vector.broadcast %40 : vector<1x16xf32> to vector<256x16xf32>
    %42 = arith.addf %39, %41 : vector<256x16xf32>
    %cst_83 = arith.constant 0.000000e+00 : f32
    %43 = vector.broadcast %cst_83 : f32 to vector<256x16xf32>
    %44 = arith.maximumf %42, %43 : vector<256x16xf32>
    %c0_84 = arith.constant 0 : index
    %c0_85 = arith.constant 0 : index
    %45 = vector.load %arg12[%c0_84, %c0_85] : memref<256x16xf32, #tpu.memory_space<vmem>>, vector<256x16xf32>
    tpu.vector_store %arg12[%c0_84, %c0_85], %44 {strides = array<i32>} : memref<256x16xf32, #tpu.memory_space<vmem>>, vector<256x16xf32>,
    %c0_86 = arith.constant 0 : index
    %c0_87 = arith.constant 0 : index
    %46 = tpu.strided_load %arg12[%c0_86, %c0_87] {strides = array<i32: 2, 1>} : memref<256x16xf32, #tpu.memory_space<vmem>>, vector<128x16xf32>
    %c1_88 = arith.constant 1 : index
    %c0_89 = arith.constant 0 : index
    %47 = tpu.strided_load %arg12[%c1_88, %c0_89] {strides = array<i32: 2, 1>} : memref<256x16xf32, #tpu.memory_space<vmem>>, vector<128x16xf32>
    %48 = arith.maximumf %46, %47 : vector<128x16xf32>
    %49 = vector.shape_cast %48 : vector<128x16xf32> to vector<8x2x8x16xf32>
    %50 = vector.extract_strided_slice %49 {offsets = [0, 0, 0, 0], sizes = [8, 1, 8, 16], strides = [1, 1, 1, 1]} : vector<8x2x8x16xf32> to vector<8x1x8x16xf32>
    %51 = vector.shape_cast %50 : vector<8x1x8x16xf32> to vector<8x8x16xf32>
    %52 = vector.extract_strided_slice %49 {offsets = [0, 1, 0, 0], sizes = [8, 1, 8, 16], strides = [1, 1, 1, 1]} : vector<8x2x8x16xf32> to vector<8x1x8x16xf32>
    %53 = vector.shape_cast %52 : vector<8x1x8x16xf32> to vector<8x8x16xf32>
    %54 = arith.maximumf %51, %53 : vector<8x8x16xf32>
    %55 = vector.shape_cast %54 : vector<8x8x16xf32> to vector<1x8x8x16xf32>
    %c0_90 = arith.constant 0 : index
    %c1_91 = arith.constant 1 : index
    %c1_92 = arith.constant 1 : index
    %c0_93 = arith.constant 0 : index
    %56 = vector.load %arg13[%c0_90, %c1_91, %c1_92, %c0_93] : memref<1x10x10x16xf32, #tpu.memory_space<vmem>>, vector<1x8x8x16xf32>
    tpu.vector_store %arg13[%c0_90, %c1_91, %c1_92, %c0_93], %55 {strides = array<i32>} : memref<1x10x10x16xf32, #tpu.memory_space<vmem>>, vector<1x8x8x16xf32>,
    %c0_94 = arith.constant 0 : index
    %c0_95 = arith.constant 0 : index
    %c0_96 = arith.constant 0 : index
    %c0_97 = arith.constant 0 : index
    %57 = vector.load %arg13[%c0_94, %c0_95, %c0_96, %c0_97] : memref<1x10x10x16xf32, #tpu.memory_space<vmem>>, vector<1x8x8x16xf32>
    %58 = vector.shape_cast %57 : vector<1x8x8x16xf32> to vector<64x16xf32>
    %c0_98 = arith.constant 0 : index
    %c0_99 = arith.constant 0 : index
    %c1_100 = arith.constant 1 : index
    %c0_101 = arith.constant 0 : index
    %59 = vector.load %arg13[%c0_98, %c0_99, %c1_100, %c0_101] : memref<1x10x10x16xf32, #tpu.memory_space<vmem>>, vector<1x8x8x16xf32>
    %60 = vector.shape_cast %59 : vector<1x8x8x16xf32> to vector<64x16xf32>
    %c0_102 = arith.constant 0 : index
    %c0_103 = arith.constant 0 : index
    %c2_104 = arith.constant 2 : index
    %c0_105 = arith.constant 0 : index
    %61 = vector.load %arg13[%c0_102, %c0_103, %c2_104, %c0_105] : memref<1x10x10x16xf32, #tpu.memory_space<vmem>>, vector<1x8x8x16xf32>
    %62 = vector.shape_cast %61 : vector<1x8x8x16xf32> to vector<64x16xf32>
    %c0_106 = arith.constant 0 : index
    %c1_107 = arith.constant 1 : index
    %c0_108 = arith.constant 0 : index
    %c0_109 = arith.constant 0 : index
    %63 = vector.load %arg13[%c0_106, %c1_107, %c0_108, %c0_109] : memref<1x10x10x16xf32, #tpu.memory_space<vmem>>, vector<1x8x8x16xf32>
    %64 = vector.shape_cast %63 : vector<1x8x8x16xf32> to vector<64x16xf32>
    %c0_110 = arith.constant 0 : index
    %c1_111 = arith.constant 1 : index
    %c1_112 = arith.constant 1 : index
    %c0_113 = arith.constant 0 : index
    %65 = vector.load %arg13[%c0_110, %c1_111, %c1_112, %c0_113] : memref<1x10x10x16xf32, #tpu.memory_space<vmem>>, vector<1x8x8x16xf32>
    %66 = vector.shape_cast %65 : vector<1x8x8x16xf32> to vector<64x16xf32>
    %c0_114 = arith.constant 0 : index
    %c1_115 = arith.constant 1 : index
    %c2_116 = arith.constant 2 : index
    %c0_117 = arith.constant 0 : index
    %67 = vector.load %arg13[%c0_114, %c1_115, %c2_116, %c0_117] : memref<1x10x10x16xf32, #tpu.memory_space<vmem>>, vector<1x8x8x16xf32>
    %68 = vector.shape_cast %67 : vector<1x8x8x16xf32> to vector<64x16xf32>
    %c0_118 = arith.constant 0 : index
    %c2_119 = arith.constant 2 : index
    %c0_120 = arith.constant 0 : index
    %c0_121 = arith.constant 0 : index
    %69 = vector.load %arg13[%c0_118, %c2_119, %c0_120, %c0_121] : memref<1x10x10x16xf32, #tpu.memory_space<vmem>>, vector<1x8x8x16xf32>
    %70 = vector.shape_cast %69 : vector<1x8x8x16xf32> to vector<64x16xf32>
    %c0_122 = arith.constant 0 : index
    %c2_123 = arith.constant 2 : index
    %c1_124 = arith.constant 1 : index
    %c0_125 = arith.constant 0 : index
    %71 = vector.load %arg13[%c0_122, %c2_123, %c1_124, %c0_125] : memref<1x10x10x16xf32, #tpu.memory_space<vmem>>, vector<1x8x8x16xf32>
    %72 = vector.shape_cast %71 : vector<1x8x8x16xf32> to vector<64x16xf32>
    %c0_126 = arith.constant 0 : index
    %c2_127 = arith.constant 2 : index
    %c2_128 = arith.constant 2 : index
    %c0_129 = arith.constant 0 : index
    %73 = vector.load %arg13[%c0_126, %c2_127, %c2_128, %c0_129] : memref<1x10x10x16xf32, #tpu.memory_space<vmem>>, vector<1x8x8x16xf32>
    %74 = vector.shape_cast %73 : vector<1x8x8x16xf32> to vector<64x16xf32>
    %75 = tpu.concatenate %58, %60, %62, %64, %66, %68, %70, %72, %74 in 1 : vector<64x16xf32>, vector<64x16xf32>, vector<64x16xf32>, vector<64x16xf32>, vector<64x16xf32>, vector<64x16xf32>, vector<64x16xf32>, vector<64x16xf32>, vector<64x16xf32> -> vector<64x144xf32>
    %76 = arith.truncf %75 : vector<64x144xf32> to vector<64x144xbf16>
    %c0_130 = arith.constant 0 : index
    %c0_131 = arith.constant 0 : index
    %77 = vector.load %arg4[%c0_130, %c0_131] : memref<144x8xbf16, #tpu.memory_space<vmem>>, vector<144x8xbf16>
    %cst_132 = arith.constant dense<0.000000e+00> : vector<64x8xf32>
    %78 = tpu.matmul %76, %77, %cst_132 {dimension_numbers = #tpu.dot_dimension_numbers<[1], [0], [0], [1], [0, 0, 1, 1], [], []>} : vector<64x144xbf16>, vector<144x8xbf16>, vector<64x8xf32> -> vector<64x8xf32>
    %c0_133 = arith.constant 0 : index
    %c0_134 = arith.constant 0 : index
    %79 = vector.load %arg5[%c0_133, %c0_134] : memref<1x8xf32, #tpu.memory_space<vmem>>, vector<1x8xf32>
    %80 = vector.broadcast %79 : vector<1x8xf32> to vector<64x8xf32>
    %81 = arith.addf %78, %80 : vector<64x8xf32>
    %cst_135 = arith.constant 0.000000e+00 : f32
    %82 = vector.broadcast %cst_135 : f32 to vector<64x8xf32>
    %83 = arith.maximumf %81, %82 : vector<64x8xf32>
    %c0_136 = arith.constant 0 : index
    %c0_137 = arith.constant 0 : index
    %84 = vector.load %arg14[%c0_136, %c0_137] : memref<64x8xf32, #tpu.memory_space<vmem>>, vector<64x8xf32>
    tpu.vector_store %arg14[%c0_136, %c0_137], %83 {strides = array<i32>} : memref<64x8xf32, #tpu.memory_space<vmem>>, vector<64x8xf32>,
    %c0_138 = arith.constant 0 : index
    %c0_139 = arith.constant 0 : index
    %85 = tpu.strided_load %arg14[%c0_138, %c0_139] {strides = array<i32: 2, 1>} : memref<64x8xf32, #tpu.memory_space<vmem>>, vector<32x8xf32>
    %c1_140 = arith.constant 1 : index
    %c0_141 = arith.constant 0 : index
    %86 = tpu.strided_load %arg14[%c1_140, %c0_141] {strides = array<i32: 2, 1>} : memref<64x8xf32, #tpu.memory_space<vmem>>, vector<32x8xf32>
    %87 = arith.maximumf %85, %86 : vector<32x8xf32>
    %88 = vector.shape_cast %87 : vector<32x8xf32> to vector<4x2x4x8xf32>
    %89 = vector.extract_strided_slice %88 {offsets = [0, 0, 0, 0], sizes = [4, 1, 4, 8], strides = [1, 1, 1, 1]} : vector<4x2x4x8xf32> to vector<4x1x4x8xf32>
    %90 = vector.shape_cast %89 : vector<4x1x4x8xf32> to vector<4x4x8xf32>
    %91 = vector.extract_strided_slice %88 {offsets = [0, 1, 0, 0], sizes = [4, 1, 4, 8], strides = [1, 1, 1, 1]} : vector<4x2x4x8xf32> to vector<4x1x4x8xf32>
    %92 = vector.shape_cast %91 : vector<4x1x4x8xf32> to vector<4x4x8xf32>
    %93 = arith.maximumf %90, %92 : vector<4x4x8xf32>
    %94 = vector.shape_cast %93 : vector<4x4x8xf32> to vector<1x4x4x8xf32>
    %95 = vector.shape_cast %94 : vector<1x4x4x8xf32> to vector<16x8xf32>
    %96 = arith.truncf %95 : vector<16x8xf32> to vector<16x8xbf16>
    %c0_142 = arith.constant 0 : index
    %c0_143 = arith.constant 0 : index
    %97 = vector.load %arg6[%c0_142, %c0_143] : memref<8x64xbf16, #tpu.memory_space<vmem>>, vector<8x64xbf16>
    %cst_144 = arith.constant dense<0.000000e+00> : vector<16x64xf32>
    %98 = tpu.matmul %96, %97, %cst_144 {dimension_numbers = #tpu.dot_dimension_numbers<[1], [0], [0], [1], [0, 0, 1, 1], [], []>} : vector<16x8xbf16>, vector<8x64xbf16>, vector<16x64xf32> -> vector<16x64xf32>
    %c0_145 = arith.constant 0 : index
    %c0_146 = arith.constant 0 : index
    %99 = vector.load %arg7[%c0_145, %c0_146] : memref<1x64xf32, #tpu.memory_space<vmem>>, vector<1x64xf32>
    %100 = vector.broadcast %99 : vector<1x64xf32> to vector<16x64xf32>
    %101 = arith.addf %98, %100 : vector<16x64xf32>
    %cst_147 = arith.constant 0.000000e+00 : f32
    %102 = vector.broadcast %cst_147 : f32 to vector<16x64xf32>
    %103 = arith.maximumf %101, %102 : vector<16x64xf32>
    %104 = arith.truncf %103 : vector<16x64xf32> to vector<16x64xbf16>
    %c0_148 = arith.constant 0 : index
    %c0_149 = arith.constant 0 : index
    %105 = vector.load %arg8[%c0_148, %c0_149] : memref<64x128xbf16, #tpu.memory_space<vmem>>, vector<64x128xbf16>
    %cst_150 = arith.constant dense<0.000000e+00> : vector<16x128xf32>
    %106 = tpu.matmul %104, %105, %cst_150 {dimension_numbers = #tpu.dot_dimension_numbers<[1], [0], [0], [1], [0, 0, 1, 1], [], []>} : vector<16x64xbf16>, vector<64x128xbf16>, vector<16x128xf32> -> vector<16x128xf32>
    %c0_151 = arith.constant 0 : index
    %c0_152 = arith.constant 0 : index
    %107 = vector.load %arg9[%c0_151, %c0_152] : memref<1x128xf32, #tpu.memory_space<vmem>>, vector<1x128xf32>
    %108 = vector.broadcast %107 : vector<1x128xf32> to vector<16x128xf32>
    %109 = arith.addf %106, %108 : vector<16x128xf32>
    %cst_153 = arith.constant 0.000000e+00 : f32
    %110 = vector.broadcast %cst_153 : f32 to vector<16x128xf32>
    %111 = arith.subf %110, %109 : vector<16x128xf32>
    %112 = math.exp %111 : vector<16x128xf32>
    %cst_154 = arith.constant 1.000000e+00 : f32
    %113 = vector.broadcast %cst_154 : f32 to vector<16x128xf32>
    %114 = arith.addf %113, %112 : vector<16x128xf32>
    %115 = tpu.reciprocal %114 {approx = true} : vector<16x128xf32> -> vector<16x128xf32>
    %116 = vector.shape_cast %115 : vector<16x128xf32> to vector<1x16x128xf32>
    %c0_155 = arith.constant 0 : index
    %c0_156 = arith.constant 0 : index
    %c0_157 = arith.constant 0 : index
    %117 = vector.load %arg10[%c0_155, %c0_156, %c0_157] : memref<1x16x128xf32, #tpu.memory_space<vmem>>, vector<1x16x128xf32>
    tpu.vector_store %arg10[%c0_155, %c0_156, %c0_157], %116 {strides = array<i32>} : memref<1x16x128xf32, #tpu.memory_space<vmem>>, vector<1x16x128xf32>,
    return
  }
  func.func @transform_0(%arg0: i32) -> (i32, i32, i32, i32) {
    %c0_i32 = arith.constant 0 : i32
    %c0_i32_0 = arith.constant 0 : i32
    %c0_i32_1 = arith.constant 0 : i32
    %c0_i32_2 = arith.constant 0 : i32
    return %arg0, %c0_i32, %c0_i32_0, %c0_i32_1 : i32, i32, i32, i32
  }
  func.func @transform_1(%arg0: i32) -> (i32, i32) {
    %c0_i32 = arith.constant 0 : i32
    %c0_i32_0 = arith.constant 0 : i32
    %c0_i32_1 = arith.constant 0 : i32
    return %c0_i32, %c0_i32_0 : i32, i32
  }
  func.func @transform_2(%arg0: i32) -> (i32, i32) {
    %c0_i32 = arith.constant 0 : i32
    %c0_i32_0 = arith.constant 0 : i32
    %c0_i32_1 = arith.constant 0 : i32
    return %c0_i32, %c0_i32_0 : i32, i32
  }
  func.func @transform_3(%arg0: i32) -> (i32, i32) {
    %c0_i32 = arith.constant 0 : i32
    %c0_i32_0 = arith.constant 0 : i32
    %c0_i32_1 = arith.constant 0 : i32
    return %c0_i32, %c0_i32_0 : i32, i32
  }
  func.func @transform_4(%arg0: i32) -> (i32, i32) {
    %c0_i32 = arith.constant 0 : i32
    %c0_i32_0 = arith.constant 0 : i32
    %c0_i32_1 = arith.constant 0 : i32
    return %c0_i32, %c0_i32_0 : i32, i32
  }
  func.func @transform_5(%arg0: i32) -> (i32, i32) {
    %c0_i32 = arith.constant 0 : i32
    %c0_i32_0 = arith.constant 0 : i32
    %c0_i32_1 = arith.constant 0 : i32
    return %c0_i32, %c0_i32_0 : i32, i32
  }
  func.func @transform_6(%arg0: i32) -> (i32, i32) {
    %c0_i32 = arith.constant 0 : i32
    %c0_i32_0 = arith.constant 0 : i32
    %c0_i32_1 = arith.constant 0 : i32
    return %c0_i32, %c0_i32_0 : i32, i32
  }
  func.func @transform_7(%arg0: i32) -> (i32, i32) {
    %c0_i32 = arith.constant 0 : i32
    %c0_i32_0 = arith.constant 0 : i32
    %c0_i32_1 = arith.constant 0 : i32
    return %c0_i32, %c0_i32_0 : i32, i32
  }
  func.func @transform_8(%arg0: i32) -> (i32, i32) {
    %c0_i32 = arith.constant 0 : i32
    %c0_i32_0 = arith.constant 0 : i32
    %c0_i32_1 = arith.constant 0 : i32
    return %c0_i32, %c0_i32_0 : i32, i32
  }
  func.func @transform_9(%arg0: i32) -> (i32, i32, i32) {
    %c0_i32 = arith.constant 0 : i32
    %c0_i32_0 = arith.constant 0 : i32
    %c0_i32_1 = arith.constant 0 : i32
    return %arg0, %c0_i32, %c0_i32_0 : i32, i32, i32
  }
}

</mosaic_0001>

<bundles_post_ra>
// kernel: tile.14
= control target key start
LH: loop header
LB: loop body
LE: loop exit
PB: predicated region body
PF: predicated region fallthrough
CT: control target
= control target key end

     0   :  { %vm8_vm0 = vcmask 130048   ;;  %s40_s8 = smov 16   ;;  %s41_s9 = smov 32   ;;  %vm14_vm1 = vcmask 523648   ;;  %vm20_vm2 = vcmask 392448   ;;  %vm26_vm3 = vcmask 261248   ;;  %s58_s0 = inlined_call_operand.vmem [shape: f32[4,16], index: 0, kind: input, shape index: {}]   ;;  %s59_s1 = inlined_call_operand.vmem [shape: f32[1,64], index: 1, kind: output, shape index: {}]  }
   0x1   :  { %v5_v0 = vld [vmem:[%s58_s0] sm:$0xf]  ;;  %s39_s0 = smov 48  }
   0x2   :  { %6 = vst [vmem:[#allocation1] sm:$0xf] %v5_v0 }
   0x9   :  { %v11_v1 = vld [vmem:[#allocation1 + $0x3] sm:$0x1]   ;;  %v23_v2 = vld [vmem:[#allocation1 + $0x1] sm:$0x1]   ;;  %v7_v3 = vld [vmem:[#allocation1] sm:$0x1]  }
   0xa   :  { %12 = vrot.lane.b32.xlu0 %v11_v1, %s39_s0  ;;  %24 = vrot.lane.b32.xlu1 %v23_v2, %s40_s8  ;;  %v17_v4 = vld [vmem:[#allocation1 + $0x2] sm:$0x1]   ;;  %9 = vst.msk [vmem:[#allocation0] sm:$0x1] %vm8_vm0, %v7_v3  }
   0xe   :  { %18 = vrot.lane.b32.xlu0 %v17_v4, %s41_s9 }
  0x7c   :  { %v13_v5 = vpop.permute.xlu0 %12   ;;  %v25_v6 = vpop.permute.xlu1 %24  }
  0x7d   :  { %15 = vst.msk [vmem:[#allocation0] sm:$0x1] %vm14_vm1, %v13_v5  }
  0x80   :  { %v19_v7 = vpop.permute.xlu0 %18  }
  0x81   :  { %21 = vst.msk [vmem:[#allocation0] sm:$0x1] %vm20_vm2, %v19_v7  }
  0x82   :  { %27 = vst.msk [vmem:[#allocation0] sm:$0x1] %vm26_vm3, %v25_v6  }
  0x89   :  { %v32_v8 = vld [vmem:[#allocation0] sm:$0x1] }
  0x8a   :  { %35 = vst [vmem:[%s59_s1] sm:$0x1] %v32_v8 }

// kernel: tile.13
= control target key start
LH: loop header
LB: loop body
LE: loop exit
PB: predicated region body
PF: predicated region fallthrough
CT: control target
= control target key end

     0   :  { %2 = vsyncpa [#allocation1], 0  ;;  %s42_s6 = smov [#allocation0]   ;;  %s59_s0 = inlined_call_operand.hbm [shape: f32[16], index: 0, kind: input, shape index: {}]   ;;  %s60_s1 = inlined_call_operand.vmem [shape: f32[4,16], index: 1, kind: output, shape index: {}]  }
   0x1   :  { %s9_s7 = sshll.u32 %s42_s6, 4  ;;  %s10_s7 = int_to_ptr.vmem [resolvable:$true] %s9_s7 }
   0x2   :  { %s28_s8 = scalar_lea.vmem %s10_s7, 16  ;;  %s32_s9 = scalar_lea.vmem %s10_s7, 32 }
   0x3   :  { %p29_p0 = scmp.ne.s32.totalorder %s10_s7, %s28_s8  ;;  %p33_p1 = scmp.lt.s32.totalorder %s10_s7, %s10_s7 }
   0x4   :  { %p34_p2 = scmp.lt.s32.totalorder %s32_s9, %s28_s8 }
   0x6   :  { %p35_p3 = por %p34_p2, %p33_p1 }
   0x8   :  { %p36_p4 = pnand %p35_p3, %p29_p0 }
   0xa   :  { %39 = shalt.err (!%p36_p4)
}
   0xb   :  { %12 = dma.hbm_to_vmem [thread:$0]  %s59_s0, 16, %s10_s7, [#allocation1]  }
   0xc   :  { %40 = dma.done.wait [#allocation1], 16  }
   0xd   :  { %41 = vsyncadd [#allocation1], 4294967280  ;;  %v16_v0 = vld [vmem:[#allocation0] ss:$0 sm:$0xff] }
   0xe   :  { %17 = vst [vmem:[%s60_s1] sm:$0xf] %v16_v0 }
   0xf   :  { %18 = vsyncpa [#allocation1], 1 }

// kernel: tile.18
= control target key start
LH: loop header
LB: loop body
LE: loop exit
PB: predicated region body
PF: predicated region fallthrough
CT: control target
= control target key end

     0   :  { %2 = vsyncpa [#allocation1], 0  ;;  %s45_s6 = smov [#allocation0]   ;;  %s65_s0 = inlined_call_operand.hbm [shape: f32[3], index: 0, kind: input, shape index: {}]   ;;  %s66_s1 = inlined_call_operand.vmem [shape: f32[16,3], index: 1, kind: output, shape index: {}]  }
   0x1   :  { %s9_s7 = sshll.u32 %s45_s6, 4  ;;  %s10_s7 = int_to_ptr.vmem [resolvable:$true] %s9_s7 }
   0x2   :  { %s31_s8 = scalar_lea.vmem %s10_s7, 16  ;;  %s35_s9 = scalar_lea.vmem %s10_s7, 32 }
   0x3   :  { %p32_p0 = scmp.ne.s32.totalorder %s10_s7, %s31_s8  ;;  %p36_p1 = scmp.lt.s32.totalorder %s10_s7, %s10_s7 }
   0x4   :  { %p37_p2 = scmp.lt.s32.totalorder %s35_s9, %s31_s8 }
   0x6   :  { %p38_p3 = por %p37_p2, %p36_p1 }
   0x8   :  { %p39_p4 = pnand %p38_p3, %p32_p0 }
   0xa   :  { %42 = shalt.err (!%p39_p4)
}
   0xb   :  { %12 = dma.hbm_to_vmem [thread:$0]  %s65_s0, 16, %s10_s7, [#allocation1]  }
   0xc   :  { %43 = dma.done.wait [#allocation1], 16  }
   0xd   :  { %44 = vsyncadd [#allocation1], 4294967280  ;;  %v16_v0 = vld [vmem:[#allocation0] ss:$0 sm:$0xff] }
   0xe   :  { %17 = vst [vmem:[%s66_s1] sm:$0xff] %v16_v0  ;;  %21 = vst [vmem:[%s66_s1 + $0x8] sm:$0xff] %v16_v0 }
   0xf   :  { %20 = vsyncpa [#allocation1], 1 }

// kernel: tile.19
= control target key start
LH: loop header
LB: loop body
LE: loop exit
PB: predicated region body
PF: predicated region fallthrough
CT: control target
= control target key end

     0   :  { %s133_s10 = smov 45   ;;  %s134_s11 = smov 39   ;;  %vm3_vm0 = vcmask 23552   ;;  %vm9_vm1 = vcmask 392552   ;;  %vm15_vm2 = vcmask 367952   ;;  %vm21_vm3 = vcmask 343352   ;;  %s209_s0 = inlined_call_operand.vmem [shape: f32[16,3], index: 0, kind: input, shape index: {}]   ;;  %s210_s1 = inlined_call_operand.vmem [shape: f32[48], index: 1, kind: output, shape index: {}]  }
   0x1   :  { %v103_v0 = vld [vmem:[%s209_s0 + $0xf] sm:$0x1]   ;;  %v105_v1 = vld [vmem:[%s209_s0 + $0xd] sm:$0x1]   ;;  %v104_v2 = vld [vmem:[%s209_s0 + $0xe] sm:$0x1]  }
   0x2   :  { %7 = vrot.lane.b32.xlu0 %v103_v0, %s133_s10  ;;  %19 = vrot.lane.b32.xlu1 %v105_v1, %s134_s11  ;;  %v106_v3 = vld [vmem:[%s209_s0 + $0xc] sm:$0x1]   ;;  %s135_s16 = smov 42   ;;  %s136_s17 = smov 36   ;;  %v107_v4 = vld [vmem:[%s209_s0 + $0xb] sm:$0x1]  }
   0x3   :  { %v108_v5 = vld [vmem:[%s209_s0 + $0xa] sm:$0x1]   ;;  %v2_v6 = vld [vmem:[%s209_s0] sm:$0x1]   ;;  %s137_s24 = smov 33   ;;  %s138_s25 = smov 30  }
   0x4   :  { %4 = vst.msk [vmem:[#allocation0] sm:$0x1] %vm3_vm0, %v2_v6   ;;  %v109_v7 = vld [vmem:[%s209_s0 + $0x9] sm:$0x1]   ;;  %v110_v8 = vld [vmem:[%s209_s0 + $0x8] sm:$0x1]  }
   0x5   :  { %s139_s30 = smov 27   ;;  %s140_s2 = smov 24   ;;  %v111_v9 = vld [vmem:[%s209_s0 + $0x7] sm:$0x1]   ;;  %v112_v10 = vld [vmem:[%s209_s0 + $0x6] sm:$0x1]  }
   0x6   :  { %13 = vrot.lane.b32.xlu0 %v104_v2, %s135_s16  ;;  %25 = vrot.lane.b32.xlu1 %v106_v3, %s136_s17  ;;  %s141_s7 = smov 21   ;;  %s142_s8 = smov 18   ;;  %v113_v11 = vld [vmem:[%s209_s0 + $0x5] sm:$0x1]   ;;  %v114_v12 = vld [vmem:[%s209_s0 + $0x4] sm:$0x1]  }
   0x7   :  { %s143_s13 = smov 15   ;;  %s144_s14 = smov 12   ;;  %v115_v13 = vld [vmem:[%s209_s0 + $0x3] sm:$0x1]   ;;  %v116_v14 = vld [vmem:[%s209_s0 + $0x2] sm:$0x1]  }
   0x8   :  { %s145_s19 = smov 9   ;;  %s146_s20 = smov 6   ;;  %v117_v15 = vld [vmem:[%s209_s0 + $0x1] sm:$0x1]   ;;  %vm27_vm4 = vcmask 318752   ;;  %vm33_vm5 = vcmask 294152  }
   0x9   :  { %s147_s0 = smov 3   ;;  %vm39_vm6 = vcmask 269552   ;;  %vm45_vm7 = vcmask 244952   ;;  %vm51_vm8 = vcmask 220352   ;;  %vm57_vm9 = vcmask 195752  }
   0xa   :  { %31 = vrot.lane.b32.xlu0 %v107_v4, %s137_s24  ;;  %37 = vrot.lane.b32.xlu1 %v108_v5, %s138_s25  ;;  %vm63_vm10 = vcmask 171152   ;;  %vm69_vm11 = vcmask 146552   ;;  %vm75_vm12 = vcmask 121952   ;;  %vm81_vm13 = vcmask 97352  }
   0xb   :  { %vm87_vm14 = vcmask 72752   ;;  %vm93_vm15 = vcmask 48152  }
   0xe   :  { %43 = vrot.lane.b32.xlu0 %v109_v7, %s139_s30  ;;  %49 = vrot.lane.b32.xlu1 %v110_v8, %s140_s2 }
  0x12   :  { %55 = vrot.lane.b32.xlu0 %v111_v9, %s141_s7  ;;  %61 = vrot.lane.b32.xlu1 %v112_v10, %s142_s8 }
  0x16   :  { %67 = vrot.lane.b32.xlu0 %v113_v11, %s143_s13  ;;  %73 = vrot.lane.b32.xlu1 %v114_v12, %s144_s14 }
  0x1a   :  { %79 = vrot.lane.b32.xlu0 %v115_v13, %s145_s19  ;;  %85 = vrot.lane.b32.xlu1 %v116_v14, %s146_s20 }
  0x1e   :  { %91 = vrot.lane.b32.xlu0 %v117_v15, %s147_s0 }
  0x74   :  { %v8_v16 = vpop.permute.xlu0 %7   ;;  %v20_v17 = vpop.permute.xlu1 %19  }
  0x75   :  { %10 = vst.msk [vmem:[#allocation0] sm:$0x1] %vm9_vm1, %v8_v16  }
  0x78   :  { %v14_v18 = vpop.permute.xlu0 %13   ;;  %v26_v19 = vpop.permute.xlu1 %25  }
  0x79   :  { %16 = vst.msk [vmem:[#allocation0] sm:$0x1] %vm15_vm2, %v14_v18  }
  0x7a   :  { %22 = vst.msk [vmem:[#allocation0] sm:$0x1] %vm21_vm3, %v20_v17  }
  0x7b   :  { %28 = vst.msk [vmem:[#allocation0] sm:$0x1] %vm27_vm4, %v26_v19  }
  0x7c   :  { %v32_v20 = vpop.permute.xlu0 %31   ;;  %v38_v21 = vpop.permute.xlu1 %37  }
  0x7d   :  { %34 = vst.msk [vmem:[#allocation0] sm:$0x1] %vm33_vm5, %v32_v20  }
  0x7e   :  { %40 = vst.msk [vmem:[#allocation0] sm:$0x1] %vm39_vm6, %v38_v21  }
  0x80   :  { %v44_v22 = vpop.permute.xlu0 %43   ;;  %v50_v23 = vpop.permute.xlu1 %49  }
  0x81   :  { %46 = vst.msk [vmem:[#allocation0] sm:$0x1] %vm45_vm7, %v44_v22  }
  0x82   :  { %52 = vst.msk [vmem:[#allocation0] sm:$0x1] %vm51_vm8, %v50_v23  }
  0x84   :  { %v56_v24 = vpop.permute.xlu0 %55   ;;  %v62_v25 = vpop.permute.xlu1 %61  }
  0x85   :  { %58 = vst.msk [vmem:[#allocation0] sm:$0x1] %vm57_vm9, %v56_v24  }
  0x86   :  { %64 = vst.msk [vmem:[#allocation0] sm:$0x1] %vm63_vm10, %v62_v25  }
  0x88   :  { %v68_v26 = vpop.permute.xlu0 %67   ;;  %v74_v27 = vpop.permute.xlu1 %73  }
  0x89   :  { %70 = vst.msk [vmem:[#allocation0] sm:$0x1] %vm69_vm11, %v68_v26  }
  0x8a   :  { %76 = vst.msk [vmem:[#allocation0] sm:$0x1] %vm75_vm12, %v74_v27  }
  0x8c   :  { %v80_v28 = vpop.permute.xlu0 %79   ;;  %v86_v29 = vpop.permute.xlu1 %85  }
  0x8d   :  { %82 = vst.msk [vmem:[#allocation0] sm:$0x1] %vm81_vm13, %v80_v28  }
  0x8e   :  { %88 = vst.msk [vmem:[#allocation0] sm:$0x1] %vm87_vm14, %v86_v29  }
  0x90   :  { %v92_v30 = vpop.permute.xlu0 %91  }
  0x91   :  { %94 = vst.msk [vmem:[#allocation0] sm:$0x1] %vm93_vm15, %v92_v30  }
  0x98   :  { %v99_v31 = vld [vmem:[#allocation0] sm:$0x1] }
  0x99   :  { %102 = vst [vmem:[%s210_s1] sm:$0x1] %v99_v31 }

// kernel: mul.4
= control target key start
LH: loop header
LB: loop body
LE: loop exit
PB: predicated region body
PF: predicated region fallthrough
CT: control target
= control target key end

     0   :  { %vm22_vm0 = vcmask 130048   ;;  %s81_s0 = inlined_call_operand.vmem [shape: f32[16,2,2,3], index: 0, kind: input, shape index: {}]   ;;  %s82_s1 = inlined_call_operand.vmem [shape: f32[16,12], index: 1, kind: output, shape index: {}]  }
   0x1   :  { %v41_v0 = vld [vmem:[%s81_s0 + $0xc] sm:$0xf]  ;;  %v42_v1 = vld [vmem:[%s81_s0 + $0x8] sm:$0xf]  ;;  %v43_v2 = vld [vmem:[%s81_s0 + $0x4] sm:$0xf] }
   0x2   :  { %9 = vst [vmem:[#allocation0 + $0x8] sm:$0xf] %v41_v0  ;;  %14 = vst [vmem:[#allocation0 + $0x18] sm:$0xf] %v42_v1  ;;  %v19_v3 = vld [vmem:[%s81_s0] sm:$0xf] }
   0x3   :  { %18 = vst [vmem:[#allocation0] sm:$0xf] %v43_v2  ;;  %20 = vst [vmem:[#allocation0 + $0x10] sm:$0xf] %v19_v3 }
   0x9   :  { %v30_v5 = vld [vmem:[#allocation0 + $0x18] sm:$0x7]   ;;  %v35_v6 = vld [vmem:[#allocation0 + $0x8] sm:$0x7]  }
   0xa   :  { %v25_v4 = vld [vmem:[#allocation0] sm:$0x7]   ;;  %v21_v7 = vld [vmem:[#allocation0 + $0x10] sm:$0x7]   ;;  %45 = vst.msk [vmem:[%s82_s1 + $0x6] sm:$0x7] %vm22_vm0, %v30_v5  }
   0xb   :  { %44 = vst.msk [vmem:[%s82_s1 + $0x3] sm:$0x7] %vm22_vm0, %v25_v4   ;;  %46 = vst.msk [vmem:[%s82_s1 + $0x9] sm:$0x7] %vm22_vm0, %v35_v6  }
   0xc   :  { %23 = vst.msk [vmem:[%s82_s1] sm:$0x7] %vm22_vm0, %v21_v7  }

// kernel: autoencoder_forward.1
= control target key start
LH: loop header
LB: loop body
LE: loop exit
PB: predicated region body
PF: predicated region fallthrough
CT: control target
= control target key end

     0   :  { %s4303_s30 = smov 0   ;;  %s5570_s0 = inlined_call_operand.vmem [shape: f32[2,16,16,3], index: 0, kind: input, shape index: {}]   ;;  %s5571_s1 = inlined_call_operand.vmem [shape: bf16[27,16], index: 1, kind: input, shape index: {}]   ;;  %s5572_s2 = inlined_call_operand.vmem [shape: f32[1,16], index: 2, kind: input, shape index: {}]   ;;  %s5573_s3 = inlined_call_operand.vmem [shape: bf16[144,8], index: 3, kind: input, shape index: {}]   ;;  %s5574_s4 = inlined_call_operand.vmem [shape: f32[1,8], index: 4, kind: input, shape index: {}]   ;;  %s5575_s5 = inlined_call_operand.vmem [shape: bf16[8,64], index: 5, kind: input, shape index: {}]   ;;  %s5576_s6 = inlined_call_operand.vmem [shape: f32[1,64], index: 6, kind: input, shape index: {}]   ;;  %s5577_s7 = inlined_call_operand.vmem [shape: bf16[64,128], index: 7, kind: input, shape index: {}]   ;;  %s5578_s8 = inlined_call_operand.vmem [shape: f32[1,128], index: 8, kind: input, shape index: {}]   ;;  %s5579_s9 = inlined_call_operand.vmem [shape: f32[2,16,128], index: 9, kind: output, shape index: {}]  }
   0x1 LB: > { %s3257_s10 = sadd.s32 4294967295, %s4232_s30   ;;  %p3261_p0 = scmp.ge.s32.totalorder %s4232_s30, 1  ;;  %s4232_s30 = sphi %s4303_s30, %s19_s30  }
   0x2   : > { %p287_p1 = scmp.lt.s32.totalorder %s4232_s30, 3 }
   0x4   : > { %p288_p2 = pnand %p3261_p0, %p287_p1 }
   0x5   : > { %p323_p3 = scmp.lt.s32.totalorder (!%p288_p2), %s3257_s10, 1  ;;  %s4235_s15 = smov (!%p288_p2), 3  }
   0x6   : > { %291 = sbr.rel (%p288_p2) target bundleno = 1422 (0x58e), region = 56  ;;  %s4236_s16 = smov (!%p288_p2), 6  }
   0x7   : > { %s4237_s17 = smov (!%p288_p2), 9   ;;  %s4238_s18 = smov (!%p288_p2), 12  }
   0x8   : > { %s4240_s19 = smov (!%p288_p2), 15   ;;  %s4241_s22 = smov (!%p288_p2), 18  }
   0x9   : > { %s4242_s25 = smov (!%p288_p2), 21   ;;  %s4243_s26 = smov (!%p288_p2), 24  }
   0xa   : > { %s4244_s29 = smov (!%p288_p2), 32  }
   0xb   : > { %vm334_vm0 = vcmask 23552   ;;  %vm337_vm1 = vcmask 17408   ;;  %vm343_vm2 = vcmask 16384   ;;  %v4234_v0 = vmov 0.0   ;;  %s5581_s10 = smov (!%p323_p3, %s3257_s10), 1  ;;  %v4198_v55 = vld [vmem:[%s5571_s1] sm:$0xff]  }
   0xc   : > { %335 = vst.msk [vmem:[#allocation2] sm:$0xff] %vm334_vm0, %v4234_v0  ;;  %336 = vst.msk [vmem:[#allocation2 + $0x8] sm:$0xff] %vm334_vm0, %v4234_v0  ;;  %s3309_s11 = sshll.u32 %s5581_s10, 8  ;;  %vm2136_vm3 = vcmask 1044480   ;;  %vm2137_vm4 = vcmask 1045504   ;;  %v4239_v45 = vmov 65535  }
   0xd   : > { %338 = vst.msk [vmem:[#allocation2 + $0x10] sm:$0x3] %vm337_vm1, %v4234_v0  ;;  %342 = vst.msk [vmem:[#allocation2 + $0x1a8] sm:$0x3] %vm337_vm1, %v4234_v0  ;;  %s4403_s14 = scalar_lea.vmem %s5570_s0, %s3309_s11  ;;  %v2138_v46 = vsel %vm2136_vm3, 4294967295, %v4239_v45  ;;  %vm1818_vm5 = vcmask 48128  }
   0xe   : > { %340 = vst.msk [vmem:[#allocation2 + $0x198] sm:$0xff] %vm334_vm0, %v4234_v0  ;;  %341 = vst.msk [vmem:[#allocation2 + $0x1a0] sm:$0xff] %vm334_vm0, %v4234_v0  ;;  %v408_v1 = vld [vmem:[%s4403_s14] sm:$0xff]  ;;  %v409_v2 = vld [vmem:[%s4403_s14 + $0x8] sm:$0xff]  ;;  %v2139_v50 = vsel %vm2137_vm4, %v2138_v46, 0  ;;  %vm1851_vm6 = vcmask 72704  }
   0xf   : > { %345 = vst.msk [vmem:[#allocation2 + $0x18] sm:$0x1] %vm343_vm2, %v4234_v0  ;;  %346 = vst.msk [vmem:[#allocation2 + $0x30] sm:$0x1] %vm343_vm2, %v4234_v0  ;;  %v410_v3 = vld [vmem:[%s4403_s14 + $0x10] sm:$0xff]  ;;  %v411_v9 = vld [vmem:[%s4403_s14 + $0x18] sm:$0xff] }
  0x10   : > { %347 = vst.msk [vmem:[#allocation2 + $0x48] sm:$0x1] %vm343_vm2, %v4234_v0  ;;  %348 = vst.msk [vmem:[#allocation2 + $0x60] sm:$0x1] %vm343_vm2, %v4234_v0  ;;  %v412_v10 = vld [vmem:[%s4403_s14 + $0x20] sm:$0xff]  ;;  %v413_v12 = vld [vmem:[%s4403_s14 + $0x28] sm:$0xff] }
  0x11   : > { %349 = vst.msk [vmem:[#allocation2 + $0x78] sm:$0x1] %vm343_vm2, %v4234_v0  ;;  %350 = vst.msk [vmem:[#allocation2 + $0x90] sm:$0x1] %vm343_vm2, %v4234_v0  ;;  %v414_v13 = vld [vmem:[%s4403_s14 + $0x30] sm:$0xff]  ;;  %v415_v14 = vld [vmem:[%s4403_s14 + $0x38] sm:$0xff] }
  0x12   : > { %351 = vst.msk [vmem:[#allocation2 + $0xa8] sm:$0x1] %vm343_vm2, %v4234_v0  ;;  %352 = vst.msk [vmem:[#allocation2 + $0xc0] sm:$0x1] %vm343_vm2, %v4234_v0  ;;  %v416_v15 = vld [vmem:[%s4403_s14 + $0x40] sm:$0xff]  ;;  %v417_v16 = vld [vmem:[%s4403_s14 + $0x48] sm:$0xff] }
  0x13   : > { %353 = vst.msk [vmem:[#allocation2 + $0xd8] sm:$0x1] %vm343_vm2, %v4234_v0  ;;  %354 = vst.msk [vmem:[#allocation2 + $0xf0] sm:$0x1] %vm343_vm2, %v4234_v0  ;;  %v537_v4 = vld [vmem:[#allocation2 + $0x2] sm:$0xff]  ;;  %v418_v17 = vld [vmem:[%s4403_s14 + $0x50] sm:$0xff] }
  0x14   : > { %355 = vst.msk [vmem:[#allocation2 + $0x108] sm:$0x1] %vm343_vm2, %v4234_v0  ;;  %356 = vst.msk [vmem:[#allocation2 + $0x120] sm:$0x1] %vm343_vm2, %v4234_v0  ;;  %v505_v5 = vld [vmem:[#allocation2 + $0x1] sm:$0xff]  ;;  %v506_v6 = vld [vmem:[#allocation2 + $0x9] sm:$0xff] }
  0x15   : > { %357 = vst.msk [vmem:[#allocation2 + $0x138] sm:$0x1] %vm343_vm2, %v4234_v0  ;;  %358 = vst.msk [vmem:[#allocation2 + $0x150] sm:$0x1] %vm343_vm2, %v4234_v0  ;;  %v3417_v8 = vpack.i.bf16 %v506_v6, %v505_v5  ;;  %v419_v18 = vld [vmem:[%s4403_s14 + $0x58] sm:$0xff]  ;;  %v420_v19 = vld [vmem:[%s4403_s14 + $0x60] sm:$0xff] }
  0x16   : > { %359 = vst.msk [vmem:[#allocation2 + $0x168] sm:$0x1] %vm343_vm2, %v4234_v0  ;;  %360 = vst.msk [vmem:[#allocation2 + $0x180] sm:$0x1] %vm343_vm2, %v4234_v0  ;;  %v421_v20 = vld [vmem:[%s4403_s14 + $0x68] sm:$0xff]  ;;  %v422_v21 = vld [vmem:[%s4403_s14 + $0x70] sm:$0xff] }
  0x17   : > { %363 = vst.msk [vmem:[#allocation2 + $0x29] sm:$0x1] %vm343_vm2, %v4234_v0  ;;  %364 = vst.msk [vmem:[#allocation2 + $0x41] sm:$0x1] %vm343_vm2, %v4234_v0  ;;  %3418 = vrot.lane.b32.xlu0 %v3417_v8, %s4235_s15  ;;  %v423_v22 = vld [vmem:[%s4403_s14 + $0x78] sm:$0xff]  ;;  %v424_v23 = vld [vmem:[%s4403_s14 + $0x80] sm:$0xff] }
  0x18   : > { %365 = vst.msk [vmem:[#allocation2 + $0x59] sm:$0x1] %vm343_vm2, %v4234_v0  ;;  %366 = vst.msk [vmem:[#allocation2 + $0x71] sm:$0x1] %vm343_vm2, %v4234_v0  ;;  %v425_v24 = vld [vmem:[%s4403_s14 + $0x88] sm:$0xff]  ;;  %v426_v51 = vld [vmem:[%s4403_s14 + $0x90] sm:$0xff] }
  0x19   : > { %367 = vst.msk [vmem:[#allocation2 + $0x89] sm:$0x1] %vm343_vm2, %v4234_v0  ;;  %368 = vst.msk [vmem:[#allocation2 + $0xa1] sm:$0x1] %vm343_vm2, %v4234_v0  ;;  %v427_v52 = vld [vmem:[%s4403_s14 + $0x98] sm:$0xff]  ;;  %v428_v56 = vld [vmem:[%s4403_s14 + $0xa0] sm:$0xff] }
  0x1a   : > { %369 = vst.msk [vmem:[#allocation2 + $0xb9] sm:$0x1] %vm343_vm2, %v4234_v0  ;;  %370 = vst.msk [vmem:[#allocation2 + $0xd1] sm:$0x1] %vm343_vm2, %v4234_v0  ;;  %v4197_v53 = vld [vmem:[%s5571_s1 + $0x8] sm:$0x3f]  }
  0x1b   : > { %371 = vst.msk [vmem:[#allocation2 + $0xe9] sm:$0x1] %vm343_vm2, %v4234_v0  ;;  %372 = vst.msk [vmem:[#allocation2 + $0x101] sm:$0x1] %vm343_vm2, %v4234_v0  ;;  %v429_v57 = vld [vmem:[%s4403_s14 + $0xa8] sm:$0xff]  ;;  %v2141_v58 = vand.u32 %v4197_v53, %v2139_v50  ;;  %v430_v62 = vld [vmem:[%s4403_s14 + $0xb0] sm:$0xff] }
  0x1c   : > { %373 = vst.msk [vmem:[#allocation2 + $0x119] sm:$0x1] %vm343_vm2, %v4234_v0  ;;  %374 = vst.msk [vmem:[#allocation2 + $0x131] sm:$0x1] %vm343_vm2, %v4234_v0  ;;  %v431_v63 = vld [vmem:[%s4403_s14 + $0xb8] sm:$0xff]  ;;  %vm1884_vm7 = vcmask 97280  }
  0x1d   : > { %375 = vst.msk [vmem:[#allocation2 + $0x149] sm:$0x1] %vm343_vm2, %v4234_v0  ;;  %376 = vst.msk [vmem:[#allocation2 + $0x161] sm:$0x1] %vm343_vm2, %v4234_v0  ;;  %3336 = vmatprep.subr.bf16.mxu0 %v2141_v58  ;;  %v439_v50 = vld [vmem:[%s4403_s14 + $0xf8] sm:$0xff]  ;;  %vm1917_vm8 = vcmask 121856  }
  0x1e   : > { %377 = vst.msk [vmem:[#allocation2 + $0x179] sm:$0x1] %vm343_vm2, %v4234_v0  ;;  %378 = vst.msk [vmem:[#allocation2 + $0x191] sm:$0x1] %vm343_vm2, %v4234_v0  ;;  %3337 = vmatpush3.bf16.msra.mxu0 %v2141_v58  ;;  %vm1950_vm9 = vcmask 146432   ;;  %vm1983_vm10 = vcmask 171008  }
  0x1f   : > { %362 = vst.msk [vmem:[#allocation2 + $0x11] sm:$0x1] %vm343_vm2, %v4234_v0  ;;  %379 = vst.msk [vmem:[#allocation2 + $0x1a9] sm:$0x1] %vm343_vm2, %v4234_v0  ;;  %3338 = vmatprep.subr.bf16.mxu0 %v4198_v55  ;;  %vm2016_vm11 = vcmask 195584   ;;  %vm2087_vm12 = vcmask 220160  }
  0x20   : > { %344 = vst.msk [vmem:[#allocation2] sm:$0x1] %vm343_vm2, %v4234_v0  ;;  %361 = vst.msk [vmem:[#allocation2 + $0x198] sm:$0x1] %vm343_vm2, %v4234_v0  ;;  %vm380_vm13 = vcmask 130048   ;;  %vm382_vm14 = vcmask 123904  }
  0x21   : > { %441 = vst.msk [vmem:[#allocation2 + $0x19] sm:$0xff] %vm334_vm0, %v408_v1  ;;  %442 = vst.msk [vmem:[#allocation2 + $0x21] sm:$0xff] %vm334_vm0, %v409_v2  ;;  %vm387_vm15 = vcmask 122880   ;;  %s4245_s11 = smov 16   ;;  %vm2778_vm1 = vcmask 392192   ;;  %vm2787_vm2 = vcmask 523264  }
  0x22   : > { %443 = vst.msk [vmem:[#allocation2 + $0x31] sm:$0xff] %vm334_vm0, %v410_v3  ;;  %444 = vst.msk [vmem:[#allocation2 + $0x39] sm:$0xff] %vm334_vm0, %v411_v9  ;;  %3339 = vmatpush3.bf16.msra.mxu0 %v4198_v55  ;;  %v432_v9 = vld [vmem:[%s4403_s14 + $0xc0] sm:$0xff]  ;;  %vm2796_vm3 = vcmask 654336   ;;  %vm2805_vm4 = vcmask 785408  }
  0x23   : > { %445 = vst.msk [vmem:[#allocation2 + $0x49] sm:$0xff] %vm334_vm0, %v412_v10  ;;  %446 = vst.msk [vmem:[#allocation2 + $0x51] sm:$0xff] %vm334_vm0, %v413_v12  ;;  %3378 = vmatprep.subr.bf16.mxu0 %v4234_v0  ;;  %v433_v10 = vld [vmem:[%s4403_s14 + $0xc8] sm:$0xff] }
  0x24   : > { %447 = vst.msk [vmem:[#allocation2 + $0x61] sm:$0xff] %vm334_vm0, %v414_v13  ;;  %448 = vst.msk [vmem:[#allocation2 + $0x69] sm:$0xff] %vm334_vm0, %v415_v14 }
  0x25   : > { %449 = vst.msk [vmem:[#allocation2 + $0x79] sm:$0xff] %vm334_vm0, %v416_v15  ;;  %450 = vst.msk [vmem:[#allocation2 + $0x81] sm:$0xff] %vm334_vm0, %v417_v16 }
  0x26   : > { %v538_v7 = vld [vmem:[#allocation2 + $0xa] sm:$0xff]  ;;  %451 = vst.msk [vmem:[#allocation2 + $0x91] sm:$0xff] %vm334_vm0, %v418_v17  ;;  %452 = vst.msk [vmem:[#allocation2 + $0x99] sm:$0xff] %vm334_vm0, %v419_v18 }
  0x27   : > { %v3422_v11 = vpack.i.bf16 %v538_v7, %v537_v4  ;;  %453 = vst.msk [vmem:[#allocation2 + $0xa9] sm:$0xff] %vm334_vm0, %v420_v19  ;;  %454 = vst.msk [vmem:[#allocation2 + $0xb1] sm:$0xff] %vm334_vm0, %v421_v20 }
  0x28   : > { %455 = vst.msk [vmem:[#allocation2 + $0xc1] sm:$0xff] %vm334_vm0, %v422_v21  ;;  %456 = vst.msk [vmem:[#allocation2 + $0xc9] sm:$0xff] %vm334_vm0, %v423_v22  ;;  %v539_v25 = vld [vmem:[#allocation2 + $0x1a] sm:$0xff]  ;;  %v540_v26 = vld [vmem:[#allocation2 + $0x22] sm:$0xff] }
  0x29   : > { %3423 = vrot.lane.b32.xlu1 %v3422_v11, %s4236_s16  ;;  %v507_v27 = vld [vmem:[#allocation2 + $0x19] sm:$0xff]  ;;  %457 = vst.msk [vmem:[#allocation2 + $0xd9] sm:$0xff] %vm334_vm0, %v424_v23  ;;  %458 = vst.msk [vmem:[#allocation2 + $0xe1] sm:$0xff] %vm334_vm0, %v425_v24  ;;  %v3432_v28 = vpack.i.bf16 %v540_v26, %v539_v25  ;;  %v508_v29 = vld [vmem:[#allocation2 + $0x21] sm:$0xff] }
  0x2a   : > { %v4443_v30 = vld [vmem:[#allocation2 + $0x30] sm:$0xff]  ;;  %v4445_v31 = vld [vmem:[#allocation2 + $0x18] sm:$0xff]  ;;  %v3427_v32 = vpack.i.bf16 %v508_v29, %v507_v27  ;;  %v4449_v34 = vld [vmem:[#allocation2 + $0x20] sm:$0xff]  ;;  %459 = vst.msk [vmem:[#allocation2 + $0xf1] sm:$0xff] %vm334_vm0, %v426_v51 }
  0x2b   : > { %v4447_v33 = vld [vmem:[#allocation2 + $0x38] sm:$0xff]  ;;  %v3437_v36 = vpack.i.bf16 %v4449_v34, %v4445_v31  ;;  %v4461_v43 = vld [vmem:[#allocation2 + $0x48] sm:$0xff]  ;;  %v4463_v44 = vld [vmem:[#allocation2 + $0x50] sm:$0xff]  ;;  %460 = vst.msk [vmem:[#allocation2 + $0xf9] sm:$0xff] %vm334_vm0, %v427_v52 }
  0x2c   : > { %v3442_v35 = vpack.i.bf16 %v4447_v33, %v4443_v30  ;;  %3428 = vrot.lane.b32.xlu0 %v3427_v32, %s4235_s15  ;;  %v603_v37 = vld [vmem:[#allocation2 + $0x31] sm:$0xff]  ;;  %v604_v38 = vld [vmem:[#allocation2 + $0x39] sm:$0xff]  ;;  %v3472_v47 = vpack.i.bf16 %v4463_v44, %v4461_v43  ;;  %v700_v48 = vld [vmem:[#allocation2 + $0x49] sm:$0xff]  ;;  %461 = vst.msk [vmem:[#allocation2 + $0x109] sm:$0xff] %vm334_vm0, %v428_v56 }
  0x2d   : > { %3433 = vrot.lane.b32.xlu1 %v3432_v28, %s4236_s16  ;;  %v3452_v39 = vpack.i.bf16 %v604_v38, %v603_v37  ;;  %v635_v40 = vld [vmem:[#allocation2 + $0x32] sm:$0xff]  ;;  %v636_v41 = vld [vmem:[#allocation2 + $0x3a] sm:$0xff]  ;;  %462 = vst.msk [vmem:[#allocation2 + $0x111] sm:$0xff] %vm334_vm0, %v429_v57  ;;  %v732_v59 = vld [vmem:[#allocation2 + $0x4a] sm:$0xff] }
  0x2e   : > { %v3462_v42 = vpack.i.bf16 %v636_v41, %v635_v40  ;;  %v701_v49 = vld [vmem:[#allocation2 + $0x51] sm:$0xff]  ;;  %463 = vst.msk [vmem:[#allocation2 + $0x121] sm:$0xff] %vm334_vm0, %v430_v62  ;;  %464 = vst.msk [vmem:[#allocation2 + $0x129] sm:$0xff] %vm334_vm0, %v431_v63  ;;  %v4496_v1 = vld [vmem:[#allocation2 + $0x60] sm:$0xff] }
  0x2f   : > { %v3482_v54 = vpack.i.bf16 %v701_v49, %v700_v48  ;;  %v733_v60 = vld [vmem:[#allocation2 + $0x52] sm:$0xff]  ;;  %v4498_v2 = vld [vmem:[#allocation2 + $0x68] sm:$0xff]  ;;  %465 = vst.msk [vmem:[#allocation2 + $0x139] sm:$0xff] %vm334_vm0, %v432_v9  ;;  %466 = vst.msk [vmem:[#allocation2 + $0x141] sm:$0xff] %vm334_vm0, %v433_v10 }
  0x30   : > { %3438 = vrot.lane.b32.xlu0 %v3437_v36, %s4237_s17  ;;  %v3497_v61 = vpack.i.bf16 %v733_v60, %v732_v59  ;;  %v3522_v3 = vpack.i.bf16 %v4498_v2, %v4496_v1  ;;  %v607_v4 = vld [vmem:[#allocation2 + $0x61] sm:$0xff]  ;;  %v608_v5 = vld [vmem:[#allocation2 + $0x69] sm:$0xff]  ;;  %v4512_v12 = vld [vmem:[#allocation2 + $0x78] sm:$0xff]  ;;  %472 = vst.msk [vmem:[#allocation2 + $0x189] sm:$0xff] %vm334_vm0, %v439_v50 }
  0x31   : > { %3443 = vrot.lane.b32.xlu1 %v3442_v35, %s4237_s17  ;;  %v3532_v6 = vpack.i.bf16 %v608_v5, %v607_v4  ;;  %v639_v7 = vld [vmem:[#allocation2 + $0x62] sm:$0xff]  ;;  %v640_v8 = vld [vmem:[#allocation2 + $0x6a] sm:$0xff]  ;;  %v704_v15 = vld [vmem:[#allocation2 + $0x79] sm:$0xff]  ;;  %381 = vst.msk [vmem:[#allocation4] sm:$0xff] %vm380_vm13, %v4234_v0 }
  0x32   : > { %v3542_v11 = vpack.i.bf16 %v640_v8, %v639_v7  ;;  %v4514_v13 = vld [vmem:[#allocation2 + $0x80] sm:$0xff]  ;;  %v434_v21 = vld [vmem:[%s4403_s14 + $0xd0] sm:$0xff]  ;;  %v435_v22 = vld [vmem:[%s4403_s14 + $0xd8] sm:$0xff]  ;;  %385 = vst.msk [vmem:[#allocation4 + $0x90] sm:$0xff] %vm380_vm13, %v4234_v0 }
  0x33   : > { %v3552_v14 = vpack.i.bf16 %v4514_v13, %v4512_v12  ;;  %v705_v16 = vld [vmem:[#allocation2 + $0x81] sm:$0xff]  ;;  %467 = vst.msk [vmem:[#allocation2 + $0x151] sm:$0xff] %vm334_vm0, %v434_v21  ;;  %468 = vst.msk [vmem:[#allocation2 + $0x159] sm:$0xff] %vm334_vm0, %v435_v22  ;;  %v579_v23 = vld [vmem:[#allocation2 + $0x90] sm:$0xff] }
  0x34   : > { %3448 = vrot.lane.b32.xlu0 %v3427_v32, %s4238_s18  ;;  %v3562_v17 = vpack.i.bf16 %v705_v16, %v704_v15  ;;  %v736_v18 = vld [vmem:[#allocation2 + $0x7a] sm:$0xff]  ;;  %v737_v19 = vld [vmem:[#allocation2 + $0x82] sm:$0xff]  ;;  %v611_v26 = vld [vmem:[#allocation2 + $0x91] sm:$0xff]  ;;  %383 = vst.msk [vmem:[#allocation4 + $0x8] sm:$0x3] %vm382_vm14, %v4234_v0 }
  0x35   : > { %3453 = vrot.lane.b32.xlu1 %v3452_v39, %s4238_s18  ;;  %v3577_v20 = vpack.i.bf16 %v737_v19, %v736_v18  ;;  %v580_v24 = vld [vmem:[#allocation2 + $0x98] sm:$0xff]  ;;  %v437_v36 = vld [vmem:[%s4403_s14 + $0xe8] sm:$0xff]  ;;  %v438_v49 = vld [vmem:[%s4403_s14 + $0xf0] sm:$0xff]  ;;  %386 = vst.msk [vmem:[#allocation4 + $0x98] sm:$0x3] %vm382_vm14, %v4234_v0 }
  0x36   : > { %v3602_v25 = vpack.i.bf16 %v580_v24, %v579_v23  ;;  %v612_v27 = vld [vmem:[#allocation2 + $0x99] sm:$0xff]  ;;  %470 = vst.msk [vmem:[#allocation2 + $0x171] sm:$0xff] %vm334_vm0, %v437_v36  ;;  %v676_v38 = vld [vmem:[#allocation2 + $0xa8] sm:$0xff]  ;;  %471 = vst.msk [vmem:[#allocation2 + $0x181] sm:$0xff] %vm334_vm0, %v438_v49 }
  0x37   : > { %v643_v29 = vld [vmem:[#allocation2 + $0x92] sm:$0xff]  ;;  %v644_v32 = vld [vmem:[#allocation2 + $0x9a] sm:$0xff]  ;;  %v708_v41 = vld [vmem:[#allocation2 + $0xa9] sm:$0xff]  ;;  %398 = vst.msk [vmem:[#allocation4 + $0x9] sm:$0x1] %vm387_vm15, %v4234_v0 }
  0x38   : > { %3458 = vrot.lane.b32.xlu0 %v3432_v28, %s4240_s19  ;;  %v3612_v28 = vpack.i.bf16 %v612_v27, %v611_v26  ;;  %v3622_v37 = vpack.i.bf16 %v644_v32, %v643_v29  ;;  %v740_v46 = vld [vmem:[#allocation2 + $0xaa] sm:$0xff]  ;;  %v583_v51 = vld [vmem:[#allocation2 + $0xc0] sm:$0xff]  ;;  %v680_v60 = vld [vmem:[#allocation2 + $0xd8] sm:$0xff]  ;;  %399 = vst.msk [vmem:[#allocation4 + $0x19] sm:$0x1] %vm387_vm15, %v4234_v0 }
  0x39   : > { %3463 = vrot.lane.b32.xlu1 %v3462_v42, %s4240_s19  ;;  %v584_v52 = vld [vmem:[#allocation2 + $0xc8] sm:$0xff]  ;;  %v712_v4 = vld [vmem:[#allocation2 + $0xd9] sm:$0xff]  ;;  %v587_v18 = vld [vmem:[#allocation2 + $0xf0] sm:$0xff]  ;;  %388 = vst.msk [vmem:[#allocation4] sm:$0x1] %vm387_vm15, %v4234_v0 }
  0x3a   : > { %v3682_v53 = vpack.i.bf16 %v584_v52, %v583_v51  ;;  %v616_v55 = vld [vmem:[#allocation2 + $0xc9] sm:$0xff]  ;;  %v713_v5 = vld [vmem:[#allocation2 + $0xe1] sm:$0xff]  ;;  %v588_v19 = vld [vmem:[#allocation2 + $0xf8] sm:$0xff]  ;;  %389 = vst.msk [vmem:[#allocation4 + $0x10] sm:$0x1] %vm387_vm15, %v4234_v0 }
  0x3b   : > { %v647_v57 = vld [vmem:[#allocation2 + $0xc2] sm:$0xff]  ;;  %v648_v58 = vld [vmem:[#allocation2 + $0xca] sm:$0xff]  ;;  %v744_v10 = vld [vmem:[#allocation2 + $0xda] sm:$0xff]  ;;  %390 = vst.msk [vmem:[#allocation4 + $0x20] sm:$0x1] %vm387_vm15, %v4234_v0 }
  0x3c   : > { %3468 = vrot.lane.b32.xlu0 %v3442_v35, %s4241_s22  ;;  %v436_v35 = vld [vmem:[%s4403_s14 + $0xe0] sm:$0xff]  ;;  %v3702_v59 = vpack.i.bf16 %v648_v58, %v647_v57  ;;  %v474_v23 = vld [vmem:[#allocation2 + $0x8] sm:$0xff]  ;;  %391 = vst.msk [vmem:[#allocation4 + $0x30] sm:$0x1] %vm387_vm15, %v4234_v0  ;;  %392 = vst.msk [vmem:[#allocation4 + $0x40] sm:$0x1] %vm387_vm15, %v4234_v0 }
  0x3d   : > { %3473 = vrot.lane.b32.xlu1 %v3472_v47, %s4241_s22  ;;  %469 = vst.msk [vmem:[#allocation2 + $0x169] sm:$0xff] %vm334_vm0, %v436_v35  ;;  %v473_v24 = vld [vmem:[#allocation2] sm:$0xff]  ;;  %v619_v35 = vld [vmem:[#allocation2 + $0xf1] sm:$0xff] }
  0x3e   : > { %v620_v36 = vld [vmem:[#allocation2 + $0xf9] sm:$0xff]  ;;  %393 = vst.msk [vmem:[#allocation4 + $0x50] sm:$0x1] %vm387_vm15, %v4234_v0  ;;  %394 = vst.msk [vmem:[#allocation4 + $0x60] sm:$0x1] %vm387_vm15, %v4234_v0 }
  0x3f   : > { %395 = vst.msk [vmem:[#allocation4 + $0x70] sm:$0x1] %vm387_vm15, %v4234_v0  ;;  %396 = vst.msk [vmem:[#allocation4 + $0x80] sm:$0x1] %vm387_vm15, %v4234_v0 }
  0x40   : > { %3478 = vrot.lane.b32.xlu0 %v3452_v39, %s4242_s25  ;;  %397 = vst.msk [vmem:[#allocation4 + $0x90] sm:$0x1] %vm387_vm15, %v4234_v0  ;;  %400 = vst.msk [vmem:[#allocation4 + $0x29] sm:$0x1] %vm387_vm15, %v4234_v0 }
  0x41   : > { %3483 = vrot.lane.b32.xlu1 %v3482_v54, %s4242_s25  ;;  %401 = vst.msk [vmem:[#allocation4 + $0x39] sm:$0x1] %vm387_vm15, %v4234_v0  ;;  %402 = vst.msk [vmem:[#allocation4 + $0x49] sm:$0x1] %vm387_vm15, %v4234_v0 }
  0x42   : > { %403 = vst.msk [vmem:[#allocation4 + $0x59] sm:$0x1] %vm387_vm15, %v4234_v0  ;;  %404 = vst.msk [vmem:[#allocation4 + $0x69] sm:$0x1] %vm387_vm15, %v4234_v0 }
  0x43   : > { %405 = vst.msk [vmem:[#allocation4 + $0x79] sm:$0x1] %vm387_vm15, %v4234_v0  ;;  %406 = vst.msk [vmem:[#allocation4 + $0x89] sm:$0x1] %vm387_vm15, %v4234_v0 }
  0x44   : > { %3488 = vrot.lane.b32.xlu0 %v3462_v42, %s4243_s26  ;;  %407 = vst.msk [vmem:[#allocation4 + $0x99] sm:$0x1] %vm387_vm15, %v4234_v0 }
  0x45   : > { %3493 = vrot.lane.b32.xlu1 %v3452_v39, %s4235_s15  ;;  %v677_v39 = vld [vmem:[#allocation2 + $0xb0] sm:$0xff] }
  0x46   : > { %v3632_v40 = vpack.i.bf16 %v677_v39, %v676_v38 }
  0x48   : > { %3498 = vrot.lane.b32.xlu0 %v3497_v61, %s4243_s26 }
  0x49   : > { %3503 = vrot.lane.b32.xlu1 %v3482_v54, %s4235_s15 }
  0x4c   : > { %3508 = vrot.lane.b32.xlu0 %v3462_v42, %s4236_s16  ;;  %v709_v42 = vld [vmem:[#allocation2 + $0xb1] sm:$0xff] }
  0x4d   : > { %3513 = vrot.lane.b32.xlu1 %v3497_v61, %s4236_s16  ;;  %v3642_v45 = vpack.i.bf16 %v709_v42, %v708_v41 }
  0x50   : > { %3518 = vrot.lane.b32.xlu0 %v3472_v47, %s4237_s17  ;;  %v741_v47 = vld [vmem:[#allocation2 + $0xb2] sm:$0xff] }
  0x51   : > { %3523 = vrot.lane.b32.xlu1 %v3522_v3, %s4237_s17  ;;  %v3657_v48 = vpack.i.bf16 %v741_v47, %v740_v46  ;;  %v684_v46 = vld [vmem:[#allocation2 + $0x108] sm:$0xff]  ;;  %v685_v47 = vld [vmem:[#allocation2 + $0x110] sm:$0xff] }
  0x52   : > { %v4629_v57 = vpack.i.bf16 %v685_v47, %v684_v46 }
  0x54   : > { %3528 = vrot.lane.b32.xlu0 %v3482_v54, %s4238_s18  ;;  %v615_v54 = vld [vmem:[#allocation2 + $0xc1] sm:$0xff] }
  0x55   : > { %3533 = vrot.lane.b32.xlu1 %v3532_v6, %s4238_s18  ;;  %v3692_v56 = vpack.i.bf16 %v616_v55, %v615_v54  ;;  %v4621_v55 = vpack.i.bf16 %v620_v36, %v619_v35 }
  0x58   : > { %3538 = vrot.lane.b32.xlu0 %v3497_v61, %s4240_s19  ;;  %v681_v61 = vld [vmem:[#allocation2 + $0xe0] sm:$0xff] }
  0x59   : > { %3543 = vrot.lane.b32.xlu1 %v3542_v11, %s4240_s19  ;;  %v4565_v63 = vpack.i.bf16 %v681_v61, %v680_v60 }
  0x5c   : > { %3548 = vrot.lane.b32.xlu0 %v3522_v3, %s4241_s22 }
  0x5d   : > { %3553 = vrot.lane.b32.xlu1 %v3552_v14, %s4241_s22 }
  0x60   : > { %3558 = vrot.lane.b32.xlu0 %v3532_v6, %s4242_s25 }
  0x61   : > { %3563 = vrot.lane.b32.xlu1 %v3562_v17, %s4242_s25 }
  0x64   : > { %3568 = vrot.lane.b32.xlu0 %v3542_v11, %s4243_s26 }
  0x65   : > { %3573 = vrot.lane.b32.xlu1 %v3532_v6, %s4235_s15  ;;  %v4570_v6 = vpack.i.bf16 %v713_v5, %v712_v4 }
  0x68   : > { %3578 = vrot.lane.b32.xlu0 %v3577_v20, %s4243_s26 }
  0x69   : > { %3583 = vrot.lane.b32.xlu1 %v3562_v17, %s4235_s15 }
  0x6c   : > { %3588 = vrot.lane.b32.xlu0 %v3542_v11, %s4236_s16  ;;  %v745_v11 = vld [vmem:[#allocation2 + $0xe2] sm:$0xff] }
  0x6d   : > { %3593 = vrot.lane.b32.xlu1 %v3577_v20, %s4236_s16  ;;  %v4584_v15 = vpack.i.bf16 %v745_v11, %v744_v10 }
  0x70   : > { %3598 = vrot.lane.b32.xlu0 %v3552_v14, %s4237_s17 }
  0x71   : > { %3603 = vrot.lane.b32.xlu1 %v3602_v25, %s4237_s17 }
  0x74   : > { %3608 = vrot.lane.b32.xlu0 %v3562_v17, %s4238_s18 }
  0x75   : > { %3613 = vrot.lane.b32.xlu1 %v3612_v28, %s4238_s18 }
  0x78   : > { %3618 = vrot.lane.b32.xlu0 %v3577_v20, %s4240_s19 }
  0x79   : > { %3623 = vrot.lane.b32.xlu1 %v3622_v37, %s4240_s19 }
  0x7c   : > { %3628 = vrot.lane.b32.xlu0 %v3602_v25, %s4241_s22 }
  0x7d   : > { %3633 = vrot.lane.b32.xlu1 %v3632_v40, %s4241_s22 }
  0x80   : > { %3638 = vrot.lane.b32.xlu0 %v3612_v28, %s4242_s25 }
  0x81   : > { %3643 = vrot.lane.b32.xlu1 %v3642_v45, %s4242_s25 }
  0x84   : > { %3648 = vrot.lane.b32.xlu0 %v3622_v37, %s4243_s26 }
  0x85   : > { %3653 = vrot.lane.b32.xlu1 %v3612_v28, %s4235_s15  ;;  %v4600_v28 = vpack.i.bf16 %v588_v19, %v587_v18 }
  0x88   : > { %3658 = vrot.lane.b32.xlu0 %v3657_v48, %s4243_s26 }
  0x89   : > { %3663 = vrot.lane.b32.xlu1 %v3642_v45, %s4235_s15  ;;  %v3419_v3 = vpop.permute.xlu0 %3418 }
  0x8a   : > { %v3421_v20 = vunpack.i.h.bf16 %v3419_v3  ;;  %v3420_v21 = vunpack.i.l.bf16 %v3419_v3 }
  0x8c   : > { %3668 = vrot.lane.b32.xlu0 %v3622_v37, %s4236_s16  ;;  %v651_v37 = vld [vmem:[#allocation2 + $0xf2] sm:$0xff]  ;;  %v1787_v38 = vsel %vm334_vm0, %v474_v23, %v3421_v20  ;;  %v1786_v39 = vsel %vm334_vm0, %v473_v24, %v3420_v21 }
  0x8d   : > { %3673 = vrot.lane.b32.xlu1 %v3657_v48, %s4236_s16 }
  0x90   : > { %3678 = vrot.lane.b32.xlu0 %v3632_v40, %s4237_s17 }
  0x91   : > { %3683 = vrot.lane.b32.xlu1 %v3682_v53, %s4237_s17 }
  0x94   : > { %3688 = vrot.lane.b32.xlu0 %v3642_v45, %s4238_s18  ;;  %v652_v45 = vld [vmem:[#allocation2 + $0xfa] sm:$0xff] }
  0x95   : > { %3693 = vrot.lane.b32.xlu1 %v3692_v56, %s4238_s18 }
  0x98   : > { %3698 = vrot.lane.b32.xlu0 %v3657_v48, %s4240_s19 }
  0x99   : > { %3703 = vrot.lane.b32.xlu1 %v3702_v59, %s4240_s19 }
  0x9b   : > { %v4563_v62 = vpop.permute.xlu1 %3423 }
  0x9c   : > { %3708 = vrot.lane.b32.xlu0 %v3682_v53, %s4241_s22  ;;  %v3426_v29 = vunpack.i.h.bf16 %v4563_v62  ;;  %v3425_v32 = vunpack.i.l.bf16 %v4563_v62 }
  0x9d   : > { %3713 = vrot.lane.b32.xlu1 %v4565_v63, %s4241_s22 }
  0x9e   : > { %v3429_v8 = vpop.permute.xlu0 %3428 }
  0x9f   : > { %v4573_v7 = vpop.permute.xlu1 %3433  ;;  %v3431_v25 = vunpack.i.h.bf16 %v3429_v8  ;;  %v3430_v26 = vunpack.i.l.bf16 %v3429_v8 }
  0xa0   : > { %3718 = vrot.lane.b32.xlu0 %v3692_v56, %s4242_s25  ;;  %v3436_v40 = vunpack.i.h.bf16 %v4573_v7  ;;  %v3435_v41 = vunpack.i.l.bf16 %v4573_v7 }
  0xa1   : > { %3723 = vrot.lane.b32.xlu1 %v4570_v6, %s4242_s25  ;;  %v1788_v48 = vsel %vm334_vm0, %v4445_v31, %v3430_v26  ;;  %v1789_v49 = vsel %vm334_vm0, %v4449_v34, %v3431_v25  ;;  %v1819_v31 = vsel %vm1818_vm5, %v1786_v39, %v3425_v32  ;;  %v4627_v34 = vpack.i.bf16 %v652_v45, %v651_v37  ;;  %v716_v37 = vld [vmem:[#allocation2 + $0x109] sm:$0xff] }
  0xa2   : > { %v4580_v14 = vpop.permute.xlu0 %3438  ;;  %v1821_v58 = vsel %vm1818_vm5, %v1788_v48, %v3435_v41 }
  0xa3   : > { %v4578_v9 = vpop.permute.xlu1 %3443  ;;  %v3441_v53 = vunpack.i.h.bf16 %v4580_v14  ;;  %v3440_v54 = vunpack.i.l.bf16 %v4580_v14 }
  0xa4   : > { %3728 = vrot.lane.b32.xlu0 %v3702_v59, %s4243_s26  ;;  %v3446_v50 = vunpack.i.h.bf16 %v4578_v9  ;;  %v3445_v51 = vunpack.i.l.bf16 %v4578_v9 }
  0xa5   : > { %3733 = vrot.lane.b32.xlu1 %v3692_v56, %s4235_s15  ;;  %v1820_v56 = vsel %vm1818_vm5, %v1787_v38, %v3426_v29  ;;  %v1852_v9 = vsel %vm1851_vm6, %v1819_v31, %v3440_v54  ;;  %v717_v38 = vld [vmem:[#allocation2 + $0x111] sm:$0xff] }
  0xa6   : > { %v4588_v17 = vpop.permute.xlu0 %3448  ;;  %v1854_v3 = vsel %vm1851_vm6, %v1821_v58, %v3445_v51  ;;  %v1853_v8 = vsel %vm1851_vm6, %v1820_v56, %v3441_v53  ;;  %v4673_v53 = vpack.i.bf16 %v717_v38, %v716_v37 }
  0xa7   : > { %v4586_v16 = vpop.permute.xlu1 %3453  ;;  %v3451_v60 = vunpack.i.h.bf16 %v4588_v17  ;;  %v3450_v61 = vunpack.i.l.bf16 %v4588_v17 }
  0xa8   : > { %3738 = vrot.lane.b32.xlu0 %v4584_v15, %s4243_s26  ;;  %v3456_v14 = vunpack.i.h.bf16 %v4586_v16  ;;  %v3455_v17 = vunpack.i.l.bf16 %v4586_v16 }
  0xa9   : > { %3743 = vrot.lane.b32.xlu1 %v4570_v6, %s4235_s15  ;;  %v1885_v20 = vsel %vm1884_vm7, %v1852_v9, %v3450_v61  ;;  %v1886_v21 = vsel %vm1884_vm7, %v1853_v8, %v3451_v60 }
  0xaa   : > { %v4596_v27 = vpop.permute.xlu0 %3458  ;;  %v1887_v45 = vsel %vm1884_vm7, %v1854_v3, %v3455_v17  ;;  %v592_v17 = vld [vmem:[#allocation2 + $0x128] sm:$0xff] }
  0xab   : > { %v4594_v22 = vpop.permute.xlu1 %3463  ;;  %v3460_v5 = vunpack.i.l.bf16 %v4596_v27 }
  0xac   : > { %3748 = vrot.lane.b32.xlu0 %v3702_v59, %s4236_s16  ;;  %v1822_v59 = vsel %vm1818_vm5, %v1789_v49, %v3436_v40  ;;  %v3466_v23 = vunpack.i.h.bf16 %v4594_v22  ;;  %v3465_v24 = vunpack.i.l.bf16 %v4594_v22 }
  0xad   : > { %3753 = vrot.lane.b32.xlu1 %v4584_v15, %s4236_s16  ;;  %v1855_v4 = vsel %vm1851_vm6, %v1822_v59, %v3446_v50  ;;  %v1918_v26 = vsel %vm1917_vm8, %v1885_v20, %v3460_v5  ;;  %v624_v20 = vld [vmem:[#allocation2 + $0x129] sm:$0xff] }
  0xae   : > { %v3469_v52 = vpop.permute.xlu0 %3468  ;;  %v1888_v46 = vsel %vm1884_vm7, %v1855_v4, %v3456_v14  ;;  %v1920_v50 = vsel %vm1917_vm8, %v1887_v45, %v3465_v24  ;;  %v591_v14 = vld [vmem:[#allocation2 + $0x120] sm:$0xff] }
  0xaf   : > { %v4609_v42 = vpop.permute.xlu1 %3473  ;;  %v3471_v10 = vunpack.i.h.bf16 %v3469_v52  ;;  %v3470_v11 = vunpack.i.l.bf16 %v3469_v52  ;;  %v1921_v51 = vsel %vm1917_vm8, %v1888_v46, %v3466_v23 }
  0xb0   : > { %3758 = vrot.lane.b32.xlu0 %v4565_v63, %s4237_s17  ;;  %v3461_v63 = vunpack.i.h.bf16 %v4596_v27  ;;  %v3476_v16 = vunpack.i.h.bf16 %v4609_v42  ;;  %v3475_v29 = vunpack.i.l.bf16 %v4609_v42 }
  0xb1   : > { %3763 = vrot.lane.b32.xlu1 %v4600_v28, %s4237_s17  ;;  %v1951_v36 = vsel %vm1950_vm9, %v1918_v26, %v3470_v11  ;;  %v4713_v26 = vpack.i.bf16 %v592_v17, %v591_v14 }
  0xb2   : > { %v3479_v7 = vpop.permute.xlu0 %3478  ;;  %v1919_v27 = vsel %vm1917_vm8, %v1886_v21, %v3461_v63  ;;  %v1953_v54 = vsel %vm1950_vm9, %v1920_v50, %v3475_v29  ;;  %v1954_v31 = vsel %vm1950_vm9, %v1921_v51, %v3476_v16  ;;  %v655_v21 = vld [vmem:[#allocation2 + $0x122] sm:$0xff]  ;;  %v688_v16 = vld [vmem:[#allocation2 + $0x138] sm:$0xff] }
  0xb3   : > { %v3484_v62 = vpop.permute.xlu1 %3483  ;;  %v3481_v18 = vunpack.i.h.bf16 %v3479_v7  ;;  %v3480_v19 = vunpack.i.l.bf16 %v3479_v7  ;;  %v1952_v22 = vsel %vm1950_vm9, %v1919_v27, %v3471_v10  ;;  %v748_v7 = vld [vmem:[#allocation2 + $0x10a] sm:$0xff]  ;;  %v689_v29 = vld [vmem:[#allocation2 + $0x140] sm:$0xff] }
  0xb4   : > { %3768 = vrot.lane.b32.xlu0 %v4570_v6, %s4238_s18  ;;  %v3486_v39 = vunpack.i.h.bf16 %v3484_v62  ;;  %v3485_v40 = vunpack.i.l.bf16 %v3484_v62  ;;  %v656_v27 = vld [vmem:[#allocation2 + $0x12a] sm:$0xff]  ;;  %v4725_v46 = vpack.i.bf16 %v689_v29, %v688_v16 }
  0xb5   : > { %3773 = vrot.lane.b32.xlu1 %v4621_v55, %s4238_s18  ;;  %v1984_v41 = vsel %vm1983_vm10, %v1951_v36, %v3480_v19  ;;  %v1985_v42 = vsel %vm1983_vm10, %v1952_v22, %v3481_v18  ;;  %v623_v19 = vld [vmem:[#allocation2 + $0x121] sm:$0xff]  ;;  %v4723_v45 = vpack.i.bf16 %v656_v27, %v655_v21 }
  0xb6   : > { %v3489_v32 = vpop.permute.xlu0 %3488  ;;  %v1986_v59 = vsel %vm1983_vm10, %v1953_v54, %v3485_v40  ;;  %v1987_v60 = vsel %vm1983_vm10, %v1954_v31, %v3486_v39  ;;  %v4721_v39 = vpack.i.bf16 %v624_v20, %v623_v19  ;;  %v721_v27 = vld [vmem:[#allocation2 + $0x141] sm:$0xff] }
  0xb7   : > { %v4651_v25 = vpop.permute.xlu1 %3493  ;;  %v3491_v6 = vunpack.i.h.bf16 %v3489_v32  ;;  %v3490_v35 = vunpack.i.l.bf16 %v3489_v32 }
  0xb8   : > { %3778 = vrot.lane.b32.xlu0 %v4584_v15, %s4240_s19  ;;  %v3496_v32 = vunpack.i.h.bf16 %v4651_v25 }
  0xb9   : > { %3783 = vrot.lane.b32.xlu1 %v4627_v34, %s4240_s19  ;;  %v2017_v48 = vsel %vm2016_vm11, %v1984_v41, %v3490_v35  ;;  %v2018_v49 = vsel %vm2016_vm11, %v1985_v42, %v3491_v6  ;;  %v3495_v6 = vunpack.i.l.bf16 %v4651_v25 }
  0xba   : > { %v3499_v52 = vpop.permute.xlu0 %3498  ;;  %v2049_v15 = vpack.c.bf16 %v2018_v49, %v2017_v48  ;;  %v1791_v49 = vsel %vm334_vm0, %v4447_v33, %v3496_v32 }
  0xbb   : > { %v4667_v47 = vpop.permute.xlu1 %3503  ;;  %v3501_v56 = vunpack.i.h.bf16 %v3499_v52  ;;  %v3500_v58 = vunpack.i.l.bf16 %v3499_v52  ;;  %v1790_v50 = vsel %vm334_vm0, %v4443_v30, %v3495_v6 }
  0xbc   : > { %3788 = vrot.lane.b32.xlu0 %v4600_v28, %s4241_s22  ;;  %3340 = vmatprep.mubr.msk.bf16.mxu0 %vm2087_vm12, %v2049_v15  ;;  %v749_v28 = vld [vmem:[#allocation2 + $0x112] sm:$0xff]  ;;  %v3506_v23 = vunpack.i.h.bf16 %v4667_v47  ;;  %v3505_v24 = vunpack.i.l.bf16 %v4667_v47 }
  0xbd   : > { %3793 = vrot.lane.b32.xlu1 %v4629_v57, %s4241_s22  ;;  %v2019_v61 = vsel %vm2016_vm11, %v1986_v59, %v3500_v58  ;;  %v2020_v62 = vsel %vm2016_vm11, %v1987_v60, %v3501_v56  ;;  %v4695_v9 = vpack.i.bf16 %v749_v28, %v748_v7 }
  0xbe   : > { %v3509_v4 = vpop.permute.xlu0 %3508  ;;  %v2050_v63 = vpack.c.bf16 %v2020_v62, %v2019_v61  ;;  %v1793_v25 = vsel %vm334_vm0, %v4463_v44, %v3506_v23  ;;  %v1792_v47 = vsel %vm334_vm0, %v4461_v43, %v3505_v24 }
  0xbf   : > { %v3514_v3 = vpop.permute.xlu1 %3513  ;;  %v3511_v22 = vunpack.i.h.bf16 %v3509_v4  ;;  %v3510_v37 = vunpack.i.l.bf16 %v3509_v4 }
  0xc0   : > { %3798 = vrot.lane.b32.xlu0 %v4621_v55, %s4242_s25  ;;  %3341 = vmatmul.mubr.msk.bf16.vlgmr.msra.gmra.mxu0 %vm2087_vm12, %v2050_v63  ;;  %v3516_v35 = vunpack.i.h.bf16 %v3514_v3  ;;  %v3515_v36 = vunpack.i.l.bf16 %v3514_v3 }
  0xc1   : > { %3803 = vrot.lane.b32.xlu1 %v4673_v53, %s4242_s25  ;;  %v1824_v43 = vsel %vm1818_vm5, %v1791_v49, %v3511_v22  ;;  %v1823_v44 = vsel %vm1818_vm5, %v1790_v50, %v3510_v37 }
  0xc2   : > { %v3519_v8 = vpop.permute.xlu0 %3518  ;;  %v1825_v51 = vsel %vm1818_vm5, %v1792_v47, %v3515_v36  ;;  %v1826_v52 = vsel %vm1818_vm5, %v1793_v25, %v3516_v35 }
  0xc3   : > { %v3524_v5 = vpop.permute.xlu1 %3523  ;;  %v3520_v48 = vunpack.i.l.bf16 %v3519_v8 }
  0xc4   : > { %3808 = vrot.lane.b32.xlu0 %v4627_v34, %s4243_s26  ;;  %v3526_v40 = vunpack.i.h.bf16 %v3524_v5  ;;  %v3525_v41 = vunpack.i.l.bf16 %v3524_v5 }
  0xc5   : > { %3813 = vrot.lane.b32.xlu1 %v4621_v55, %s4235_s15 }
  0xc6   : > { %v4699_v11 = vpop.permute.xlu0 %3528  ;;  %v1858_v33 = vsel %vm1851_vm6, %v1825_v51, %v3525_v41  ;;  %v1859_v30 = vsel %vm1851_vm6, %v1826_v52, %v3526_v40 }
  0xc7   : > { %v4697_v10 = vpop.permute.xlu1 %3533  ;;  %v3531_v15 = vunpack.i.h.bf16 %v4699_v11  ;;  %v3530_v54 = vunpack.i.l.bf16 %v4699_v11 }
  0xc8   : > { %3818 = vrot.lane.b32.xlu0 %v4695_v9, %s4243_s26  ;;  %v3536_v3 = vunpack.i.h.bf16 %v4697_v10  ;;  %v3535_v4 = vunpack.i.l.bf16 %v4697_v10 }
  0xc9   : > { %3823 = vrot.lane.b32.xlu1 %v4673_v53, %s4235_s15 }
  0xca   : > { %v4707_v55 = vpop.permute.xlu0 %3538  ;;  %v1891_v35 = vsel %vm1884_vm7, %v1858_v33, %v3535_v4  ;;  %v1892_v36 = vsel %vm1884_vm7, %v1859_v30, %v3536_v3  ;;  %v752_v33 = vld [vmem:[#allocation2 + $0x13a] sm:$0xff]  ;;  %v659_v4 = vld [vmem:[#allocation2 + $0x152] sm:$0xff] }
  0xcb   : > { %v4705_v18 = vpop.permute.xlu1 %3543  ;;  %v3541_v56 = vunpack.i.h.bf16 %v4707_v55  ;;  %v3540_v58 = vunpack.i.l.bf16 %v4707_v55  ;;  %v628_v3 = vld [vmem:[#allocation2 + $0x159] sm:$0xff] }
  0xcc   : > { %3828 = vrot.lane.b32.xlu0 %v4627_v34, %s4236_s16  ;;  %v3521_v34 = vunpack.i.h.bf16 %v3519_v8  ;;  %v3546_v8 = vunpack.i.h.bf16 %v4705_v18  ;;  %v3545_v11 = vunpack.i.l.bf16 %v4705_v18  ;;  %v720_v18 = vld [vmem:[#allocation2 + $0x139] sm:$0xff] }
  0xcd   : > { %3833 = vrot.lane.b32.xlu1 %v4695_v9, %s4236_s16  ;;  %v4783_v47 = vpack.i.bf16 %v721_v27, %v720_v18 }
  0xce   : > { %v3549_v42 = vpop.permute.xlu0 %3548  ;;  %v1857_v60 = vsel %vm1851_vm6, %v1824_v43, %v3521_v34  ;;  %v1924_v40 = vsel %vm1917_vm8, %v1891_v35, %v3545_v11  ;;  %v1925_v41 = vsel %vm1917_vm8, %v1892_v36, %v3546_v8  ;;  %v692_v8 = vld [vmem:[#allocation2 + $0x168] sm:$0xff]  ;;  %v693_v11 = vld [vmem:[#allocation2 + $0x170] sm:$0xff] }
  0xcf   : > { %v4719_v38 = vpop.permute.xlu1 %3553  ;;  %v3551_v61 = vunpack.i.h.bf16 %v3549_v42  ;;  %v3550_v62 = vunpack.i.l.bf16 %v3549_v42  ;;  %v1890_v28 = vsel %vm1884_vm7, %v1857_v60, %v3531_v15  ;;  %v596_v60 = vld [vmem:[#allocation2 + $0x158] sm:$0xff] }
  0xd0   : > { %3838 = vrot.lane.b32.xlu0 %v4629_v57, %s4237_s17  ;;  %v1856_v57 = vsel %vm1851_vm6, %v1823_v44, %v3520_v48  ;;  %v1923_v55 = vsel %vm1917_vm8, %v1890_v28, %v3541_v56  ;;  %v3556_v10 = vunpack.i.h.bf16 %v4719_v38  ;;  %v3555_v19 = vunpack.i.l.bf16 %v4719_v38  ;;  %v660_v28 = vld [vmem:[#allocation2 + $0x15a] sm:$0xff] }
  0xd1   : > { %3843 = vrot.lane.b32.xlu1 %v4713_v26, %s4237_s17  ;;  %v1889_v7 = vsel %vm1884_vm7, %v1856_v57, %v3530_v54  ;;  %v1956_v21 = vsel %vm1950_vm9, %v1923_v55, %v3551_v61  ;;  %v595_v57 = vld [vmem:[#allocation2 + $0x150] sm:$0xff] }
  0xd2   : > { %v3559_v59 = vpop.permute.xlu0 %3558  ;;  %v1922_v17 = vsel %vm1917_vm8, %v1889_v7, %v3540_v58  ;;  %v1958_v34 = vsel %vm1950_vm9, %v1925_v41, %v3556_v10  ;;  %v4823_v7 = vpack.i.bf16 %v596_v60, %v595_v57 }
  0xd3   : > { %v3564_v31 = vpop.permute.xlu1 %3563  ;;  %v3561_v63 = vunpack.i.h.bf16 %v3559_v59  ;;  %v3560_v5 = vunpack.i.l.bf16 %v3559_v59 }
  0xd4   : > { %3848 = vrot.lane.b32.xlu0 %v4673_v53, %s4238_s18  ;;  %v1955_v53 = vsel %vm1950_vm9, %v1922_v17, %v3550_v62  ;;  %v3566_v16 = vunpack.i.h.bf16 %v3564_v31  ;;  %v3565_v29 = vunpack.i.l.bf16 %v3564_v31  ;;  %v627_v62 = vld [vmem:[#allocation2 + $0x151] sm:$0xff] }
  0xd5   : > { %3853 = vrot.lane.b32.xlu1 %v4721_v39, %s4238_s18  ;;  %v1988_v32 = vsel %vm1983_vm10, %v1955_v53, %v3560_v5  ;;  %v1989_v6 = vsel %vm1983_vm10, %v1956_v21, %v3561_v63 }
  0xd6   : > { %v3569_v20 = vpop.permute.xlu0 %3568  ;;  %v1991_v51 = vsel %vm1983_vm10, %v1958_v34, %v3566_v16  ;;  %v4833_v16 = vpack.i.bf16 %v660_v28, %v659_v4 }
  0xd7   : > { %v4761_v14 = vpop.permute.xlu1 %3573  ;;  %v3571_v23 = vunpack.i.h.bf16 %v3569_v20  ;;  %v3570_v24 = vunpack.i.l.bf16 %v3569_v20 }
  0xd8   : > { %3858 = vrot.lane.b32.xlu0 %v4695_v9, %s4240_s19  ;;  %v1957_v9 = vsel %vm1950_vm9, %v1924_v40, %v3555_v19  ;;  %v3576_v17 = vunpack.i.h.bf16 %v4761_v14  ;;  %v3575_v55 = vunpack.i.l.bf16 %v4761_v14 }
  0xd9   : > { %3863 = vrot.lane.b32.xlu1 %v4723_v45, %s4240_s19  ;;  %v2021_v22 = vsel %vm2016_vm11, %v1988_v32, %v3570_v24  ;;  %v2022_v37 = vsel %vm2016_vm11, %v1989_v6, %v3571_v23  ;;  %v1990_v50 = vsel %vm1983_vm10, %v1957_v9, %v3565_v29  ;;  %v4831_v23 = vpack.i.bf16 %v628_v3, %v627_v62  ;;  %v725_v3 = vld [vmem:[#allocation2 + $0x171] sm:$0xff] }
  0xda   : > { %v3579_v42 = vpop.permute.xlu0 %3578  ;;  %v2051_v25 = vpack.c.bf16 %v2022_v37, %v2021_v22  ;;  %v4835_v29 = vpack.i.bf16 %v693_v11, %v692_v8  ;;  %v1795_v35 = vsel %vm334_vm0, %v4498_v2, %v3576_v17  ;;  %v1794_v36 = vsel %vm334_vm0, %v4496_v1, %v3575_v55 }
  0xdb   : > { %v4779_v38 = vpop.permute.xlu1 %3583  ;;  %v3581_v48 = vunpack.i.h.bf16 %v3579_v42  ;;  %v3580_v49 = vunpack.i.l.bf16 %v3579_v42 }
  0xdc   : > { %3868 = vrot.lane.b32.xlu0 %v4713_v26, %s4241_s22  ;;  %3344 = vmatprep.mubr.msk.bf16.mxu0 %vm2087_vm12, %v2051_v25  ;;  %v753_v26 = vld [vmem:[#allocation2 + $0x142] sm:$0xff]  ;;  %v3586_v63 = vunpack.i.h.bf16 %v4779_v38  ;;  %v3585_v5 = vunpack.i.l.bf16 %v4779_v38 }
  0xdd   : > { %3873 = vrot.lane.b32.xlu1 %v4725_v46, %s4241_s22  ;;  %v2024_v52 = vsel %vm2016_vm11, %v1991_v51, %v3581_v48  ;;  %v2023_v43 = vsel %vm2016_vm11, %v1990_v50, %v3580_v49  ;;  %v4805_v56 = vpack.i.bf16 %v753_v26, %v752_v33 }
  0xde   : > { %v3589_v15 = vpop.permute.xlu0 %3588  ;;  %v2052_v54 = vpack.c.bf16 %v2024_v52, %v2023_v43  ;;  %v1797_v14 = vsel %vm334_vm0, %v4514_v13, %v3586_v63  ;;  %v1796_v32 = vsel %vm334_vm0, %v4512_v12, %v3585_v5 }
  0xdf   : > { %v3594_v44 = vpop.permute.xlu1 %3593  ;;  %v3591_v20 = vunpack.i.h.bf16 %v3589_v15  ;;  %v3590_v53 = vunpack.i.l.bf16 %v3589_v15 }
  0xe0   : > { %3878 = vrot.lane.b32.xlu0 %v4721_v39, %s4242_s25  ;;  %3345 = vmatmul.mubr.msk.bf16.gmra.mxu0 %vm2087_vm12, %v2052_v54  ;;  %v3596_v10 = vunpack.i.h.bf16 %v3594_v44  ;;  %v3595_v19 = vunpack.i.l.bf16 %v3594_v44 }
  0xe1   : > { %3883 = vrot.lane.b32.xlu1 %v4783_v47, %s4242_s25  ;;  %v1828_v12 = vsel %vm1818_vm5, %v1795_v35, %v3591_v20  ;;  %v1827_v13 = vsel %vm1818_vm5, %v1794_v36, %v3590_v53 }
  0xe2   : > { %v3599_v30 = vpop.permute.xlu0 %3598  ;;  %v1829_v22 = vsel %vm1818_vm5, %v1796_v32, %v3595_v19  ;;  %v1830_v37 = vsel %vm1818_vm5, %v1797_v14, %v3596_v10 }
  0xe3   : > { %v3604_v31 = vpop.permute.xlu1 %3603  ;;  %v3600_v6 = vunpack.i.l.bf16 %v3599_v30 }
  0xe4   : > { %3888 = vrot.lane.b32.xlu0 %v4723_v45, %s4243_s26  ;;  %v3606_v24 = vunpack.i.h.bf16 %v3604_v31  ;;  %v3605_v18 = vunpack.i.l.bf16 %v3604_v31 }
  0xe5   : > { %3893 = vrot.lane.b32.xlu1 %v4721_v39, %s4235_s15 }
  0xe6   : > { %v4809_v59 = vpop.permute.xlu0 %3608  ;;  %v1862_v2 = vsel %vm1851_vm6, %v1829_v22, %v3605_v18  ;;  %v1863_v1 = vsel %vm1851_vm6, %v1830_v37, %v3606_v24 }
  0xe7   : > { %v4807_v58 = vpop.permute.xlu1 %3613  ;;  %v3611_v38 = vunpack.i.h.bf16 %v4809_v59  ;;  %v3610_v40 = vunpack.i.l.bf16 %v4809_v59 }
  0xe8   : > { %3898 = vrot.lane.b32.xlu0 %v4805_v56, %s4243_s26  ;;  %v3616_v50 = vunpack.i.h.bf16 %v4807_v58  ;;  %v3615_v51 = vunpack.i.l.bf16 %v4807_v58 }
  0xe9   : > { %3903 = vrot.lane.b32.xlu1 %v4783_v47, %s4235_s15 }
  0xea   : > { %v4817_v39 = vpop.permute.xlu0 %3618  ;;  %v1895_v8 = vsel %vm1884_vm7, %v1862_v2, %v3615_v51  ;;  %v1896_v11 = vsel %vm1884_vm7, %v1863_v1, %v3616_v50  ;;  %v599_v1 = vld [vmem:[#allocation2 + $0x180] sm:$0xff]  ;;  %v485_v50 = vld [vmem:[#allocation2 + $0x90] sm:$0xff] }
  0xeb   : > { %v4815_v61 = vpop.permute.xlu1 %3623  ;;  %v3621_v42 = vunpack.i.h.bf16 %v4817_v39  ;;  %v3620_v25 = vunpack.i.l.bf16 %v4817_v39 }
  0xec   : > { %3908 = vrot.lane.b32.xlu0 %v4723_v45, %s4236_s16  ;;  %v3601_v45 = vunpack.i.h.bf16 %v3599_v30  ;;  %v3626_v54 = vunpack.i.h.bf16 %v4815_v61  ;;  %v3625_v31 = vunpack.i.l.bf16 %v4815_v61  ;;  %v724_v61 = vld [vmem:[#allocation2 + $0x169] sm:$0xff] }
  0xed   : > { %3913 = vrot.lane.b32.xlu1 %v4805_v56, %s4236_s16  ;;  %v4893_v24 = vpack.i.bf16 %v725_v3, %v724_v61 }
  0xee   : > { %v3629_v27 = vpop.permute.xlu0 %3628  ;;  %v1861_v34 = vsel %vm1851_vm6, %v1828_v12, %v3601_v45  ;;  %v1928_v19 = vsel %vm1917_vm8, %v1895_v8, %v3625_v31  ;;  %v1929_v20 = vsel %vm1917_vm8, %v1896_v11, %v3626_v54  ;;  %v4949_v54 = vld [vmem:[#allocation2 + $0x1a0] sm:$0xff]  ;;  %v486_v31 = vld [vmem:[#allocation2 + $0x98] sm:$0xff] }
  0xef   : > { %v4829_v21 = vpop.permute.xlu1 %3633  ;;  %v3631_v48 = vunpack.i.h.bf16 %v3629_v27  ;;  %v3630_v49 = vunpack.i.l.bf16 %v3629_v27  ;;  %v1894_v15 = vsel %vm1884_vm7, %v1861_v34, %v3611_v38 }
  0xf0   : > { %3918 = vrot.lane.b32.xlu0 %v4725_v46, %s4237_s17  ;;  %v1860_v46 = vsel %vm1851_vm6, %v1827_v13, %v3600_v6  ;;  %v1927_v30 = vsel %vm1917_vm8, %v1894_v15, %v3621_v42  ;;  %v3636_v58 = vunpack.i.h.bf16 %v4829_v21  ;;  %v3635_v59 = vunpack.i.l.bf16 %v4829_v21  ;;  %v757_v13 = vld [vmem:[#allocation2 + $0x172] sm:$0xff]  ;;  %v600_v42 = vld [vmem:[#allocation2 + $0x188] sm:$0xff] }
  0xf1   : > { %3923 = vrot.lane.b32.xlu1 %v4823_v7, %s4237_s17  ;;  %v1893_v44 = vsel %vm1884_vm7, %v1860_v46, %v3610_v40  ;;  %v1960_v60 = vsel %vm1950_vm9, %v1927_v30, %v3631_v48  ;;  %v4939_v34 = vpack.i.bf16 %v600_v42, %v599_v1  ;;  %v663_v48 = vld [vmem:[#allocation2 + $0x182] sm:$0xff]  ;;  %v4947_v15 = vld [vmem:[#allocation2 + $0x198] sm:$0xff]  ;;  %v488_v30 = vld [vmem:[#allocation2 + $0xb0] sm:$0xff] }
  0xf2   : > { %v3639_v9 = vpop.permute.xlu0 %3638  ;;  %v1926_v26 = vsel %vm1917_vm8, %v1893_v44, %v3620_v25  ;;  %v1962_v18 = vsel %vm1950_vm9, %v1929_v20, %v3636_v58 }
  0xf3   : > { %v3644_v41 = vpop.permute.xlu1 %3643  ;;  %v3641_v52 = vunpack.i.h.bf16 %v3639_v9  ;;  %v3640_v43 = vunpack.i.l.bf16 %v3639_v9  ;;  %v632_v9 = vld [vmem:[#allocation2 + $0x189] sm:$0xff] }
  0xf4   : > { %3928 = vrot.lane.b32.xlu0 %v4783_v47, %s4238_s18  ;;  %v1959_v47 = vsel %vm1950_vm9, %v1926_v26, %v3630_v49  ;;  %v3646_v4 = vunpack.i.h.bf16 %v3644_v41  ;;  %v3645_v63 = vunpack.i.l.bf16 %v3644_v41  ;;  %v664_v49 = vld [vmem:[#allocation2 + $0x18a] sm:$0xff] }
  0xf5   : > { %3933 = vrot.lane.b32.xlu1 %v4831_v23, %s4238_s18  ;;  %v1992_v5 = vsel %vm1983_vm10, %v1959_v47, %v3640_v43  ;;  %v1993_v28 = vsel %vm1983_vm10, %v1960_v60, %v3641_v52  ;;  %v487_v26 = vld [vmem:[#allocation2 + $0xa8] sm:$0xff] }
  0xf6   : > { %v3649_v57 = vpop.permute.xlu0 %3648  ;;  %v1995_v45 = vsel %vm1983_vm10, %v1962_v18, %v3646_v4 }
  0xf7   : > { %v4871_v33 = vpop.permute.xlu1 %3653  ;;  %v3651_v39 = vunpack.i.h.bf16 %v3649_v57  ;;  %v3650_v62 = vunpack.i.l.bf16 %v3649_v57 }
  0xf8   : > { %3938 = vrot.lane.b32.xlu0 %v4805_v56, %s4240_s19  ;;  %v1961_v56 = vsel %vm1950_vm9, %v1928_v19, %v3635_v59  ;;  %v3656_v51 = vunpack.i.h.bf16 %v4871_v33  ;;  %v3655_v52 = vunpack.i.l.bf16 %v4871_v33 }
  0xf9   : > { %3943 = vrot.lane.b32.xlu1 %v4833_v16, %s4240_s19  ;;  %v2025_v17 = vsel %vm2016_vm11, %v1992_v5, %v3650_v62  ;;  %v2026_v55 = vsel %vm2016_vm11, %v1993_v28, %v3651_v39  ;;  %v1994_v32 = vsel %vm1983_vm10, %v1961_v56, %v3645_v63  ;;  %v4960_v62 = vpack.i.bf16 %v664_v49, %v663_v48 }
  0xfa   : > { %v3659_v53 = vpop.permute.xlu0 %3658  ;;  %v2053_v21 = vpack.c.bf16 %v2026_v55, %v2025_v17  ;;  %v1799_v5 = vsel %vm334_vm0, %v486_v31, %v3656_v51  ;;  %v1798_v28 = vsel %vm334_vm0, %v485_v50, %v3655_v52  ;;  %v728_v50 = vld [vmem:[#allocation2 + $0x199] sm:$0xff]  ;;  %v729_v51 = vld [vmem:[#allocation2 + $0x1a1] sm:$0xff] }
  0xfb   : > { %v4889_v10 = vpop.permute.xlu1 %3663  ;;  %v3661_v27 = vunpack.i.h.bf16 %v3659_v53  ;;  %v3660_v14 = vunpack.i.l.bf16 %v3659_v53 }
  0xfc   : > { %3948 = vrot.lane.b32.xlu0 %v4823_v7, %s4241_s22  ;;  %3348 = vmatprep.mubr.msk.bf16.mxu0 %vm2087_vm12, %v2053_v21  ;;  %v756_v7 = vld [vmem:[#allocation2 + $0x16a] sm:$0xff]  ;;  %v3666_v43 = vunpack.i.h.bf16 %v4889_v10  ;;  %v3665_v44 = vunpack.i.l.bf16 %v4889_v10 }
  0xfd   : > { %3953 = vrot.lane.b32.xlu1 %v4835_v29, %s4241_s22  ;;  %v2028_v6 = vsel %vm2016_vm11, %v1995_v45, %v3661_v27  ;;  %v2027_v35 = vsel %vm2016_vm11, %v1994_v32, %v3660_v14  ;;  %v4925_v40 = vpack.i.bf16 %v757_v13, %v756_v7 }
  0xfe   : > { %v4906_v22 = vpop.permute.xlu0 %3668  ;;  %v2054_v37 = vpack.c.bf16 %v2028_v6, %v2027_v35  ;;  %v1801_v8 = vsel %vm334_vm0, %v488_v30, %v3666_v43  ;;  %v1800_v11 = vsel %vm334_vm0, %v487_v26, %v3665_v44 }
  0xff   : > { %v3674_v36 = vpop.permute.xlu1 %3673  ;;  %v3671_v57 = vunpack.i.h.bf16 %v4906_v22  ;;  %v3670_v47 = vunpack.i.l.bf16 %v4906_v22 }
 0x100   : > { %3958 = vrot.lane.b32.xlu0 %v4831_v23, %s4242_s25  ;;  %3349 = vmatmul.mubr.msk.bf16.gmra.mxu0 %vm2087_vm12, %v2054_v37  ;;  %v3676_v58 = vunpack.i.h.bf16 %v3674_v36  ;;  %v3675_v59 = vunpack.i.l.bf16 %v3674_v36 }
 0x101   : > { %3963 = vrot.lane.b32.xlu1 %v4893_v24, %s4242_s25  ;;  %v1832_v20 = vsel %vm1818_vm5, %v1799_v5, %v3671_v57  ;;  %v1831_v53 = vsel %vm1818_vm5, %v1798_v28, %v3670_v47 }
 0x102   : > { %v4915_v38 = vpop.permute.xlu0 %3678  ;;  %v1833_v17 = vsel %vm1818_vm5, %v1800_v11, %v3675_v59  ;;  %v1834_v55 = vsel %vm1818_vm5, %v1801_v8, %v3676_v58  ;;  %v760_v11 = vld [vmem:[#allocation2 + $0x19a] sm:$0xff] }
 0x103   : > { %v4913_v12 = vpop.permute.xlu1 %3683  ;;  %v3681_v3 = vunpack.i.h.bf16 %v4915_v38  ;;  %v3680_v4 = vunpack.i.l.bf16 %v4915_v38 }
 0x104   : > { %3968 = vrot.lane.b32.xlu0 %v4833_v16, %s4243_s26  ;;  %v3685_v60 = vunpack.i.l.bf16 %v4913_v12  ;;  %v3686_v61 = vunpack.i.h.bf16 %v4913_v12 }
 0x105   : > { %3973 = vrot.lane.b32.xlu1 %v4831_v23, %s4235_s15  ;;  %v631_v23 = vld [vmem:[#allocation2 + $0x181] sm:$0xff]  ;;  %v1864_v14 = vsel %vm1851_vm6, %v1831_v53, %v3680_v4  ;;  %v1865_v32 = vsel %vm1851_vm6, %v1832_v20, %v3681_v3  ;;  %v4042_v3 = vpack.i.bf16 %v729_v51, %v728_v50 }
 0x106   : > { %v4929_v2 = vpop.permute.xlu0 %3688  ;;  %v4953_v33 = vpack.i.bf16 %v632_v9, %v631_v23  ;;  %v4982_v21 = vsel %vm1851_vm6, %v1833_v17, %v3685_v60  ;;  %v1867_v27 = vsel %vm1851_vm6, %v1834_v55, %v3686_v61  ;;  %v761_v17 = vld [vmem:[#allocation2 + $0x1a2] sm:$0xff] }
 0x107   : > { %v4927_v41 = vpop.permute.xlu1 %3693  ;;  %v3691_v10 = vunpack.i.h.bf16 %v4929_v2  ;;  %v3690_v19 = vunpack.i.l.bf16 %v4929_v2 }
 0x108   : > { %3978 = vrot.lane.b32.xlu0 %v4925_v40, %s4243_s26  ;;  %v3696_v6 = vunpack.i.h.bf16 %v4927_v41  ;;  %v3695_v35 = vunpack.i.l.bf16 %v4927_v41 }
 0x109   : > { %3983 = vrot.lane.b32.xlu1 %v4893_v24, %s4235_s15  ;;  %v1897_v37 = vsel %vm1884_vm7, %v1864_v14, %v3690_v19  ;;  %v1898_v12 = vsel %vm1884_vm7, %v1865_v32, %v3691_v10  ;;  %s3310_s15 = sshll.u32 %s5581_s10, 4 }
 0x10a   : > { %v4937_v46 = vpop.permute.xlu0 %3698  ;;  %v1899_v26 = vsel %vm1884_vm7, %v4982_v21, %v3695_v35  ;;  %v1900_v30 = vsel %vm1884_vm7, %v1867_v27, %v3696_v6 }
 0x10b   : > { %v4935_v25 = vpop.permute.xlu1 %3703  ;;  %v3700_v56 = vunpack.i.l.bf16 %v4937_v46  ;;  %v3701_v45 = vunpack.i.h.bf16 %v4937_v46 }
 0x10c   : > { %3988 = vrot.lane.b32.xlu0 %v4833_v16, %s4236_s16  ;;  %v4032_v16 = vpack.i.bf16 %v4949_v54, %v4947_v15  ;;  %v3706_v38 = vunpack.i.h.bf16 %v4935_v25  ;;  %v3705_v2 = vunpack.i.l.bf16 %v4935_v25  ;;  %v4052_v15 = vpack.i.bf16 %v761_v17, %v760_v11 }
 0x10d   : > { %3993 = vrot.lane.b32.xlu1 %v4925_v40, %s4236_s16  ;;  %v1930_v41 = vsel %vm1917_vm8, %v1897_v37, %v3700_v56  ;;  %v1931_v42 = vsel %vm1917_vm8, %v1898_v12, %v3701_v45  ;;  %v491_v45 = vld [vmem:[#allocation2 + $0xd8] sm:$0xff]  ;;  %s4250_s16 = smov 96  }
 0x10e   : > { %v3709_v63 = vpop.permute.xlu0 %3708  ;;  %v1932_v47 = vsel %vm1917_vm8, %v1899_v26, %v3705_v2  ;;  %v1933_v60 = vsel %vm1917_vm8, %v1900_v30, %v3706_v38 }
 0x10f   : > { %v4958_v39 = vpop.permute.xlu1 %3713  ;;  %v3711_v36 = vunpack.i.h.bf16 %v3709_v63  ;;  %v3710_v22 = vunpack.i.l.bf16 %v3709_v63 }
 0x110   : > { %3998 = vrot.lane.b32.xlu0 %v4835_v29, %s4237_s17  ;;  %v3716_v23 = vunpack.i.h.bf16 %v4958_v39  ;;  %v3715_v9 = vunpack.i.l.bf16 %v4958_v39 }
 0x111   : > { %4003 = vrot.lane.b32.xlu1 %v4939_v34, %s4237_s17  ;;  %v1964_v25 = vsel %vm1950_vm9, %v1931_v42, %v3711_v36  ;;  %v489_v36 = vld [vmem:[#allocation2 + $0xc0] sm:$0xff]  ;;  %s4251_s17 = smov 112  }
 0x112   : > { %v3719_v29 = vpop.permute.xlu0 %3718  ;;  %v1965_v4 = vsel %vm1950_vm9, %v1932_v47, %v3715_v9 }
 0x113   : > { %v4985_v18 = vpop.permute.xlu1 %3723  ;;  %v3721_v7 = vunpack.i.h.bf16 %v3719_v29  ;;  %v3720_v13 = vunpack.i.l.bf16 %v3719_v29  ;;  %v492_v29 = vld [vmem:[#allocation2 + $0xe0] sm:$0xff] }
 0x114   : > { %4008 = vrot.lane.b32.xlu0 %v4893_v24, %s4238_s18  ;;  %v1963_v24 = vsel %vm1950_vm9, %v1930_v41, %v3710_v22  ;;  %v3726_v52 = vunpack.i.h.bf16 %v4985_v18  ;;  %v3725_v43 = vunpack.i.l.bf16 %v4985_v18  ;;  %v490_v22 = vld [vmem:[#allocation2 + $0xc8] sm:$0xff] }
 0x115   : > { %4013 = vrot.lane.b32.xlu1 %v4953_v33, %s4238_s18  ;;  %v1996_v44 = vsel %vm1983_vm10, %v1963_v24, %v3720_v13  ;;  %v1997_v31 = vsel %vm1983_vm10, %v1964_v25, %v3721_v7  ;;  %s4247_s18 = smov 64  }
 0x116   : > { %v3729_v46 = vpop.permute.xlu0 %3728  ;;  %v1998_v28 = vsel %vm1983_vm10, %v1965_v4, %v3725_v43 }
 0x117   : > { %v5002_v1 = vpop.permute.xlu1 %3733  ;;  %v3731_v48 = vunpack.i.h.bf16 %v3729_v46  ;;  %v3730_v49 = vunpack.i.l.bf16 %v3729_v46 }
 0x118   : > { %4018 = vrot.lane.b32.xlu0 %v4925_v40, %s4240_s19  ;;  %v1966_v40 = vsel %vm1950_vm9, %v1933_v60, %v3716_v23  ;;  %v3736_v32 = vunpack.i.h.bf16 %v5002_v1 }
 0x119   : > { %4023 = vrot.lane.b32.xlu1 %v4960_v62, %s4240_s19  ;;  %v2029_v58 = vsel %vm2016_vm11, %v1996_v44, %v3730_v49  ;;  %v2030_v59 = vsel %vm2016_vm11, %v1997_v31, %v3731_v48  ;;  %v1999_v8 = vsel %vm1983_vm10, %v1966_v40, %v3726_v52  ;;  %s4248_s19 = smov 48  }
 0x11a   : > { %v2055_v39 = vpack.c.bf16 %v2030_v59, %v2029_v58  ;;  %v3739_v61 = vpop.permute.xlu0 %3738 }
 0x11b   : > { %v3744_v57 = vpop.permute.xlu1 %3743  ;;  %v3741_v63 = vunpack.i.h.bf16 %v3739_v61  ;;  %v3740_v5 = vunpack.i.l.bf16 %v3739_v61 }
 0x11c   : > { %4028 = vrot.lane.b32.xlu0 %v4939_v34, %s4241_s22  ;;  %3352 = vmatprep.mubr.msk.bf16.mxu0 %vm2087_vm12, %v2055_v39  ;;  %v3746_v27 = vunpack.i.h.bf16 %v3744_v57  ;;  %v3745_v14 = vunpack.i.l.bf16 %v3744_v57 }
 0x11d   : > { %4033 = vrot.lane.b32.xlu1 %v4032_v16, %s4241_s22  ;;  %v2032_v55 = vsel %vm2016_vm11, %v1999_v8, %v3741_v63  ;;  %v2031_v10 = vsel %vm2016_vm11, %v1998_v28, %v3740_v5  ;;  %s4249_s22 = smov 80  }
 0x11e   : > { %v2056_v20 = vpack.c.bf16 %v2032_v55, %v2031_v10  ;;  %v3749_v53 = vpop.permute.xlu0 %3748  ;;  %v1805_v2 = vsel %vm334_vm0, %v492_v29, %v3746_v27  ;;  %v1804_v41 = vsel %vm334_vm0, %v491_v45, %v3745_v14 }
 0x11f   : > { %v3754_v19 = vpop.permute.xlu1 %3753  ;;  %v3751_v37 = vunpack.i.h.bf16 %v3749_v53 }
 0x120   : > { %4038 = vrot.lane.b32.xlu0 %v4953_v33, %s4242_s25  ;;  %3353 = vmatmul.mubr.msk.bf16.gmra.mxu0 %vm2087_vm12, %v2056_v20  ;;  %v3735_v33 = vunpack.i.l.bf16 %v5002_v1  ;;  %v3756_v6 = vunpack.i.h.bf16 %v3754_v19  ;;  %v3755_v35 = vunpack.i.l.bf16 %v3754_v19  ;;  %v1803_v1 = vsel %vm334_vm0, %v490_v22, %v3736_v32 }
 0x121   : > { %4043 = vrot.lane.b32.xlu1 %v4042_v3, %s4242_s25  ;;  %v1836_v25 = vsel %vm1818_vm5, %v1803_v1, %v3751_v37 }
 0x122   : > { %v3759_v54 = vpop.permute.xlu0 %3758  ;;  %v1802_v9 = vsel %vm334_vm0, %v489_v36, %v3735_v33  ;;  %v1837_v46 = vsel %vm1818_vm5, %v1804_v41, %v3755_v35  ;;  %v1838_v24 = vsel %vm1818_vm5, %v1805_v2, %v3756_v6 }
 0x123   : > { %v3764_v34 = vpop.permute.xlu1 %3763  ;;  %v3761_v42 = vunpack.i.h.bf16 %v3759_v54  ;;  %v3760_v23 = vunpack.i.l.bf16 %v3759_v54 }
 0x124   : > { %4048 = vrot.lane.b32.xlu0 %v4960_v62, %s4243_s26  ;;  %v3750_v62 = vunpack.i.l.bf16 %v3749_v53  ;;  %v3766_v7 = vunpack.i.h.bf16 %v3764_v34  ;;  %v3765_v13 = vunpack.i.l.bf16 %v3764_v34 }
 0x125   : > { %4053 = vrot.lane.b32.xlu1 %v4052_v15, %s4243_s26  ;;  %v1869_v58 = vsel %vm1851_vm6, %v1836_v25, %v3761_v42 }
 0x126   : > { %v3769_v21 = vpop.permute.xlu0 %3768  ;;  %v1835_v48 = vsel %vm1818_vm5, %v1802_v9, %v3750_v62  ;;  %v1870_v52 = vsel %vm1851_vm6, %v1837_v46, %v3765_v13  ;;  %v1871_v43 = vsel %vm1851_vm6, %v1838_v24, %v3766_v7 }
 0x127   : > { %v5086_v16 = vpop.permute.xlu1 %3773  ;;  %v3771_v49 = vunpack.i.h.bf16 %v3769_v21  ;;  %v3770_v50 = vunpack.i.l.bf16 %v3769_v21  ;;  %v1868_v30 = vsel %vm1851_vm6, %v1835_v48, %v3760_v23 }
 0x128   : > { %v3776_v47 = vunpack.i.h.bf16 %v5086_v16  ;;  %v3775_v60 = vunpack.i.l.bf16 %v5086_v16 }
 0x129   : > { %v1901_v3 = vsel %vm1884_vm7, %v1868_v30, %v3770_v50  ;;  %v1902_v4 = vsel %vm1884_vm7, %v1869_v58, %v3771_v49  ;;  %v495_v50 = vld [vmem:[#allocation2 + $0x108] sm:$0xff] }
 0x12a   : > { %v3779_v18 = vpop.permute.xlu0 %3778  ;;  %v1903_v21 = vsel %vm1884_vm7, %v1870_v52, %v3775_v60 }
 0x12b   : > { %v5088_v56 = vpop.permute.xlu1 %3783  ;;  %v3781_v44 = vunpack.i.h.bf16 %v3779_v18  ;;  %v3780_v31 = vunpack.i.l.bf16 %v3779_v18 }
 0x12c   : > { %v3786_v40 = vunpack.i.h.bf16 %v5088_v56  ;;  %v3785_v63 = vunpack.i.l.bf16 %v5088_v56  ;;  %v1904_v56 = vsel %vm1884_vm7, %v1871_v43, %v3776_v47 }
 0x12d   : > { %v1934_v28 = vsel %vm1917_vm8, %v1901_v3, %v3780_v31  ;;  %v1935_v8 = vsel %vm1917_vm8, %v1902_v4, %v3781_v44  ;;  %v493_v44 = vld [vmem:[#allocation2 + $0xf0] sm:$0xff]  ;;  %v494_v31 = vld [vmem:[#allocation2 + $0xf8] sm:$0xff] }
 0x12e   : > { %v3789_v38 = vpop.permute.xlu0 %3788  ;;  %v1936_v32 = vsel %vm1917_vm8, %v1903_v21, %v3785_v63  ;;  %v1937_v33 = vsel %vm1917_vm8, %v1904_v56, %v3786_v40 }
 0x12f   : > { %v3794_v12 = vpop.permute.xlu1 %3793  ;;  %v3791_v59 = vunpack.i.h.bf16 %v3789_v38  ;;  %v3790_v57 = vunpack.i.l.bf16 %v3789_v38 }
 0x130   : > { %v3796_v11 = vunpack.i.h.bf16 %v3794_v12  ;;  %v3795_v17 = vunpack.i.l.bf16 %v3794_v12 }
 0x131   : > { %v1967_v10 = vsel %vm1950_vm9, %v1934_v28, %v3790_v57  ;;  %v1968_v19 = vsel %vm1950_vm9, %v1935_v8, %v3791_v59 }
 0x132   : > { %v3799_v26 = vpop.permute.xlu0 %3798  ;;  %v1969_v6 = vsel %vm1950_vm9, %v1936_v32, %v3795_v17  ;;  %v1970_v35 = vsel %vm1950_vm9, %v1937_v33, %v3796_v11 }
 0x133   : > { %v3804_v51 = vpop.permute.xlu1 %3803  ;;  %v3801_v39 = vunpack.i.h.bf16 %v3799_v26  ;;  %v3800_v61 = vunpack.i.l.bf16 %v3799_v26 }
 0x134   : > { %v3806_v15 = vunpack.i.h.bf16 %v3804_v51  ;;  %v3805_v34 = vunpack.i.l.bf16 %v3804_v51  ;;  %v496_v51 = vld [vmem:[#allocation2 + $0x110] sm:$0xff] }
 0x135   : > { %v2000_v54 = vsel %vm1983_vm10, %v1967_v10, %v3800_v61  ;;  %v2001_v16 = vsel %vm1983_vm10, %v1968_v19, %v3801_v39 }
 0x136   : > { %v3809_v55 = vpop.permute.xlu0 %3808  ;;  %v2002_v37 = vsel %vm1983_vm10, %v1969_v6, %v3805_v34  ;;  %v2003_v62 = vsel %vm1983_vm10, %v1970_v35, %v3806_v15 }
 0x137   : > { %v5110_v5 = vpop.permute.xlu1 %3813  ;;  %v3811_v20 = vunpack.i.h.bf16 %v3809_v55  ;;  %v3810_v53 = vunpack.i.l.bf16 %v3809_v55 }
 0x138   : > { %v3816_v48 = vunpack.i.h.bf16 %v5110_v5  ;;  %v3815_v49 = vunpack.i.l.bf16 %v5110_v5 }
 0x139   : > { %v2033_v18 = vsel %vm2016_vm11, %v2000_v54, %v3810_v53  ;;  %v2034_v27 = vsel %vm2016_vm11, %v2001_v16, %v3811_v20 }
 0x13a   : > { %v2057_v45 = vpack.c.bf16 %v2034_v27, %v2033_v18  ;;  %v3819_v29 = vpop.permute.xlu0 %3818  ;;  %v1807_v4 = vsel %vm334_vm0, %v494_v31, %v3816_v48  ;;  %v1806_v40 = vsel %vm334_vm0, %v493_v44, %v3815_v49 }
 0x13b   : > { %v3824_v14 = vpop.permute.xlu1 %3823  ;;  %v3821_v36 = vunpack.i.h.bf16 %v3819_v29  ;;  %v3820_v22 = vunpack.i.l.bf16 %v3819_v29 }
 0x13c   : > { %3356 = vmatprep.mubr.msk.bf16.mxu0 %vm2087_vm12, %v2057_v45  ;;  %v3826_v24 = vunpack.i.h.bf16 %v3824_v14  ;;  %v3825_v25 = vunpack.i.l.bf16 %v3824_v14 }
 0x13d   : > { %v2036_v12 = vsel %vm2016_vm11, %v2003_v62, %v3821_v36  ;;  %v2035_v7 = vsel %vm2016_vm11, %v2002_v37, %v3820_v22 }
 0x13e   : > { %v2058_v38 = vpack.c.bf16 %v2036_v12, %v2035_v7  ;;  %v3829_v2 = vpop.permute.xlu0 %3828  ;;  %v1809_v60 = vsel %vm334_vm0, %v496_v51, %v3826_v24  ;;  %v1808_v39 = vsel %vm334_vm0, %v495_v50, %v3825_v25 }
 0x13f   : > { %v3834_v13 = vpop.permute.xlu1 %3833  ;;  %v3831_v26 = vunpack.i.h.bf16 %v3829_v2  ;;  %v3830_v30 = vunpack.i.l.bf16 %v3829_v2 }
 0x140   : > { %3357 = vmatmul.mubr.msk.bf16.gmra.mxu0 %vm2087_vm12, %v2058_v38  ;;  %v3836_v52 = vunpack.i.h.bf16 %v3834_v13  ;;  %v3835_v43 = vunpack.i.l.bf16 %v3834_v13 }
 0x141   : > { %v1840_v28 = vsel %vm1818_vm5, %v1807_v4, %v3831_v26  ;;  %v1839_v8 = vsel %vm1818_vm5, %v1806_v40, %v3830_v30 }
 0x142   : > { %v3839_v42 = vpop.permute.xlu0 %3838  ;;  %v1841_v63 = vsel %vm1818_vm5, %v1808_v39, %v3835_v43  ;;  %v1842_v5 = vsel %vm1818_vm5, %v1809_v60, %v3836_v52 }
 0x143   : > { %v3844_v41 = vpop.permute.xlu1 %3843  ;;  %v3841_v61 = vunpack.i.h.bf16 %v3839_v42  ;;  %v3840_v3 = vunpack.i.l.bf16 %v3839_v42 }
 0x144   : > { %v3846_v59 = vunpack.i.h.bf16 %v3844_v41  ;;  %v3845_v57 = vunpack.i.l.bf16 %v3844_v41 }
 0x145   : > { %v1872_v34 = vsel %vm1851_vm6, %v1839_v8, %v3840_v3  ;;  %v1873_v54 = vsel %vm1851_vm6, %v1840_v28, %v3841_v61 }
 0x146   : > { %v3849_v1 = vpop.permute.xlu0 %3848  ;;  %v1874_v10 = vsel %vm1851_vm6, %v1841_v63, %v3845_v57  ;;  %v1875_v19 = vsel %vm1851_vm6, %v1842_v5, %v3846_v59 }
 0x147   : > { %v5132_v23 = vpop.permute.xlu1 %3853  ;;  %v3851_v11 = vunpack.i.h.bf16 %v3849_v1  ;;  %v3850_v17 = vunpack.i.l.bf16 %v3849_v1 }
 0x148   : > { %v3856_v56 = vunpack.i.h.bf16 %v5132_v23  ;;  %v3855_v18 = vunpack.i.l.bf16 %v5132_v23 }
 0x149   : > { %v1905_v32 = vsel %vm1884_vm7, %v1872_v34, %v3850_v17  ;;  %v1906_v33 = vsel %vm1884_vm7, %v1873_v54, %v3851_v11 }
 0x14a   : > { %v3859_v46 = vpop.permute.xlu0 %3858  ;;  %v1907_v1 = vsel %vm1884_vm7, %v1874_v10, %v3855_v18  ;;  %v497_v10 = vld [vmem:[#allocation2 + $0x120] sm:$0xff]  ;;  %v4221_v18 = vld [vmem:[#allocation2 + $0x138] sm:$0xff] }
 0x14b   : > { %v5134_v9 = vpop.permute.xlu1 %3863  ;;  %v3861_v20 = vunpack.i.h.bf16 %v3859_v46  ;;  %v3860_v53 = vunpack.i.l.bf16 %v3859_v46 }
 0x14c   : > { %v3866_v45 = vunpack.i.h.bf16 %v5134_v9  ;;  %v3865_v29 = vunpack.i.l.bf16 %v5134_v9  ;;  %v1908_v9 = vsel %vm1884_vm7, %v1875_v19, %v3856_v56  ;;  %v498_v19 = vld [vmem:[#allocation2 + $0x128] sm:$0xff] }
 0x14d   : > { %v1938_v35 = vsel %vm1917_vm8, %v1905_v32, %v3860_v53  ;;  %v1939_v36 = vsel %vm1917_vm8, %v1906_v33, %v3861_v20 }
 0x14e   : > { %v3869_v47 = vpop.permute.xlu0 %3868  ;;  %v1940_v48 = vsel %vm1917_vm8, %v1907_v1, %v3865_v29  ;;  %v1941_v49 = vsel %vm1917_vm8, %v1908_v9, %v3866_v45 }
 0x14f   : > { %v3874_v58 = vpop.permute.xlu1 %3873  ;;  %v3871_v16 = vunpack.i.h.bf16 %v3869_v47  ;;  %v3870_v21 = vunpack.i.l.bf16 %v3869_v47 }
 0x150   : > { %v3876_v22 = vunpack.i.h.bf16 %v3874_v58  ;;  %v3875_v37 = vunpack.i.l.bf16 %v3874_v58 }
 0x151   : > { %v1971_v12 = vsel %vm1950_vm9, %v1938_v35, %v3870_v21  ;;  %v1972_v7 = vsel %vm1950_vm9, %v1939_v36, %v3871_v16  ;;  %v4220_v21 = vld [vmem:[#allocation2 + $0x140] sm:$0xff] }
 0x152   : > { %v3879_v15 = vpop.permute.xlu0 %3878  ;;  %v1973_v52 = vsel %vm1950_vm9, %v1940_v48, %v3875_v37  ;;  %v1974_v43 = vsel %vm1950_vm9, %v1941_v49, %v3876_v22 }
 0x153   : > { %v3884_v55 = vpop.permute.xlu1 %3883  ;;  %v3881_v27 = vunpack.i.h.bf16 %v3879_v15  ;;  %v3880_v14 = vunpack.i.l.bf16 %v3879_v15 }
 0x154   : > { %v3886_v2 = vunpack.i.h.bf16 %v3884_v55  ;;  %v3885_v41 = vunpack.i.l.bf16 %v3884_v55 }
 0x155   : > { %v2004_v42 = vsel %vm1983_vm10, %v1971_v12, %v3880_v14  ;;  %v2005_v23 = vsel %vm1983_vm10, %v1972_v7, %v3881_v27 }
 0x156   : > { %v3889_v62 = vpop.permute.xlu0 %3888  ;;  %v2006_v26 = vsel %vm1983_vm10, %v1973_v52, %v3885_v41  ;;  %v2007_v30 = vsel %vm1983_vm10, %v1974_v43, %v3886_v2 }
 0x157   : > { %v5156_v6 = vpop.permute.xlu1 %3893  ;;  %v3891_v13 = vunpack.i.h.bf16 %v3889_v62  ;;  %v3890_v38 = vunpack.i.l.bf16 %v3889_v62 }
 0x158   : > { %v3896_v8 = vunpack.i.h.bf16 %v5156_v6  ;;  %v3895_v11 = vunpack.i.l.bf16 %v5156_v6 }
 0x159   : > { %v2037_v46 = vsel %vm2016_vm11, %v2004_v42, %v3890_v38  ;;  %v2038_v24 = vsel %vm2016_vm11, %v2005_v23, %v3891_v13 }
 0x15a   : > { %v2059_v50 = vpack.c.bf16 %v2038_v24, %v2037_v46  ;;  %v3899_v51 = vpop.permute.xlu0 %3898  ;;  %v1811_v33 = vsel %vm334_vm0, %v498_v19, %v3896_v8  ;;  %v1810_v45 = vsel %vm334_vm0, %v497_v10, %v3895_v11 }
 0x15b   : > { %v3904_v25 = vpop.permute.xlu1 %3903  ;;  %v3901_v44 = vunpack.i.h.bf16 %v3899_v51  ;;  %v3900_v31 = vunpack.i.l.bf16 %v3899_v51 }
 0x15c   : > { %3360 = vmatprep.mubr.msk.bf16.mxu0 %vm2087_vm12, %v2059_v50  ;;  %v3906_v5 = vunpack.i.h.bf16 %v3904_v25  ;;  %v3905_v28 = vunpack.i.l.bf16 %v3904_v25 }
 0x15d   : > { %v2040_v58 = vsel %vm2016_vm11, %v2007_v30, %v3901_v44  ;;  %v2039_v59 = vsel %vm2016_vm11, %v2006_v26, %v3900_v31 }
 0x15e   : > { %v2060_v47 = vpack.c.bf16 %v2040_v58, %v2039_v59  ;;  %v3909_v60 = vpop.permute.xlu0 %3908  ;;  %v1813_v56 = vsel %vm334_vm0, %v4220_v21, %v3906_v5  ;;  %v1812_v27 = vsel %vm334_vm0, %v4221_v18, %v3905_v28 }
 0x15f   : > { %v3914_v57 = vpop.permute.xlu1 %3913  ;;  %v3911_v20 = vunpack.i.h.bf16 %v3909_v60  ;;  %v3910_v53 = vunpack.i.l.bf16 %v3909_v60 }
 0x160   : > { %3361 = vmatmul.mubr.msk.bf16.gmra.mxu0 %vm2087_vm12, %v2060_v47  ;;  %v3916_v17 = vunpack.i.h.bf16 %v3914_v57  ;;  %v3915_v55 = vunpack.i.l.bf16 %v3914_v57 }
 0x161   : > { %v1844_v35 = vsel %vm1818_vm5, %v1811_v33, %v3911_v20  ;;  %v1843_v36 = vsel %vm1818_vm5, %v1810_v45, %v3910_v53 }
 0x162   : > { %v3919_v61 = vpop.permute.xlu0 %3918  ;;  %v1845_v29 = vsel %vm1818_vm5, %v1812_v27, %v3915_v55  ;;  %v1846_v6 = vsel %vm1818_vm5, %v1813_v56, %v3916_v17  ;;  %v5226_v27 = vld [vmem:[%s5572_s2] ss:$0 sm:$0xff] }
 0x163   : > { %v3924_v39 = vpop.permute.xlu1 %3923  ;;  %v3921_v14 = vunpack.i.h.bf16 %v3919_v61  ;;  %v3920_v32 = vunpack.i.l.bf16 %v3919_v61 }
 0x164   : > { %v3926_v34 = vunpack.i.h.bf16 %v3924_v39  ;;  %v3925_v54 = vunpack.i.l.bf16 %v3924_v39 }
 0x165   : > { %v1876_v41 = vsel %vm1851_vm6, %v1843_v36, %v3920_v32  ;;  %v1877_v42 = vsel %vm1851_vm6, %v1844_v35, %v3921_v14 }
 0x166   : > { %v3929_v4 = vpop.permute.xlu0 %3928  ;;  %v1878_v12 = vsel %vm1851_vm6, %v1845_v29, %v3925_v54  ;;  %v1879_v7 = vsel %vm1851_vm6, %v1846_v6, %v3926_v34 }
 0x167   : > { %v5178_v3 = vpop.permute.xlu1 %3933  ;;  %v3931_v22 = vunpack.i.h.bf16 %v3929_v4  ;;  %v3930_v37 = vunpack.i.l.bf16 %v3929_v4 }
 0x168   : > { %v3936_v9 = vunpack.i.h.bf16 %v5178_v3  ;;  %v3935_v46 = vunpack.i.l.bf16 %v5178_v3 }
 0x169   : > { %v1909_v48 = vsel %vm1884_vm7, %v1876_v41, %v3930_v37  ;;  %v1910_v49 = vsel %vm1884_vm7, %v1877_v42, %v3931_v22 }
 0x16a   : > { %v3939_v63 = vpop.permute.xlu0 %3938  ;;  %v1911_v4 = vsel %vm1884_vm7, %v1878_v12, %v3935_v46 }
 0x16b   : > { %v5180_v40 = vpop.permute.xlu1 %3943  ;;  %v3941_v13 = vunpack.i.h.bf16 %v3939_v63  ;;  %v3940_v38 = vunpack.i.l.bf16 %v3939_v63 }
 0x16c   : > { %v3946_v50 = vunpack.i.h.bf16 %v5180_v40  ;;  %v3945_v51 = vunpack.i.l.bf16 %v5180_v40  ;;  %v1912_v40 = vsel %vm1884_vm7, %v1879_v7, %v3936_v9 }
 0x16d   : > { %v1942_v43 = vsel %vm1917_vm8, %v1909_v48, %v3940_v38  ;;  %v1943_v44 = vsel %vm1917_vm8, %v1910_v49, %v3941_v13 }
 0x16e   : > { %v3949_v16 = vpop.permute.xlu0 %3948  ;;  %v1944_v8 = vsel %vm1917_vm8, %v1911_v4, %v3945_v51  ;;  %v1945_v11 = vsel %vm1917_vm8, %v1912_v40, %v3946_v50 }
 0x16f   : > { %v3954_v15 = vpop.permute.xlu1 %3953  ;;  %v3951_v23 = vunpack.i.h.bf16 %v3949_v16  ;;  %v3950_v1 = vunpack.i.l.bf16 %v3949_v16 }
 0x170   : > { %v3956_v31 = vunpack.i.h.bf16 %v3954_v15  ;;  %v3955_v26 = vunpack.i.l.bf16 %v3954_v15 }
 0x171   : > { %v1975_v58 = vsel %vm1950_vm9, %v1942_v43, %v3950_v1  ;;  %v1976_v59 = vsel %vm1950_vm9, %v1943_v44, %v3951_v23 }
 0x172   : > { %v3959_v2 = vpop.permute.xlu0 %3958  ;;  %v1977_v10 = vsel %vm1950_vm9, %v1944_v8, %v3955_v26  ;;  %v1978_v19 = vsel %vm1950_vm9, %v1945_v11, %v3956_v31 }
 0x173   : > { %v3964_v62 = vpop.permute.xlu1 %3963  ;;  %v3961_v24 = vunpack.i.h.bf16 %v3959_v2  ;;  %v3960_v25 = vunpack.i.l.bf16 %v3959_v2 }
 0x174   : > { %v3966_v60 = vunpack.i.h.bf16 %v3964_v62  ;;  %v3965_v39 = vunpack.i.l.bf16 %v3964_v62 }
 0x175   : > { %v2008_v61 = vsel %vm1983_vm10, %v1975_v58, %v3960_v25  ;;  %v2009_v3 = vsel %vm1983_vm10, %v1976_v59, %v3961_v24  ;;  %v4222_v25 = vld [vmem:[#allocation2 + $0x158] sm:$0xff]  ;;  %v4224_v58 = vld [vmem:[#allocation2 + $0x168] sm:$0xff] }
 0x176   : > { %v3969_v30 = vpop.permute.xlu0 %3968  ;;  %v2010_v15 = vsel %vm1983_vm10, %v1977_v10, %v3965_v39  ;;  %v2011_v34 = vsel %vm1983_vm10, %v1978_v19, %v3966_v60  ;;  %v4225_v60 = vld [vmem:[#allocation2 + $0x150] sm:$0xff] }
 0x177   : > { %v5202_v52 = vpop.permute.xlu1 %3973  ;;  %v3971_v57 = vunpack.i.h.bf16 %v3969_v30  ;;  %v3970_v47 = vunpack.i.l.bf16 %v3969_v30  ;;  %v4223_v30 = vld [vmem:[#allocation2 + $0x170] sm:$0xff] }
 0x178   : > { %v3976_v12 = vunpack.i.h.bf16 %v5202_v52  ;;  %v3975_v23 = vunpack.i.l.bf16 %v5202_v52 }
 0x179   : > { %v2041_v63 = vsel %vm2016_vm11, %v2008_v61, %v3970_v47  ;;  %v2042_v5 = vsel %vm2016_vm11, %v2009_v3, %v3971_v57 }
 0x17a   : > { %v2061_v17 = vpack.c.bf16 %v2042_v5, %v2041_v63  ;;  %v3979_v55 = vpop.permute.xlu0 %3978  ;;  %v1815_v48 = vsel %vm334_vm0, %v4222_v25, %v3976_v12  ;;  %v1814_v39 = vsel %vm334_vm0, %v4225_v60, %v3975_v23 }
 0x17b   : > { %v3984_v28 = vpop.permute.xlu1 %3983  ;;  %v3981_v20 = vunpack.i.h.bf16 %v3979_v55  ;;  %v3980_v53 = vunpack.i.l.bf16 %v3979_v55 }
 0x17c   : > { %3364 = vmatprep.mubr.msk.bf16.mxu0 %vm2087_vm12, %v2061_v17  ;;  %v3986_v41 = vunpack.i.h.bf16 %v3984_v28  ;;  %v3985_v42 = vunpack.i.l.bf16 %v3984_v28 }
 0x17d   : > { %v2044_v54 = vsel %vm2016_vm11, %v2011_v34, %v3981_v20  ;;  %v2043_v16 = vsel %vm2016_vm11, %v2010_v15, %v3980_v53 }
 0x17e   : > { %v2062_v56 = vpack.c.bf16 %v2044_v54, %v2043_v16  ;;  %v3989_v18 = vpop.permute.xlu0 %3988  ;;  %v1817_v52 = vsel %vm334_vm0, %v4223_v30, %v3986_v41  ;;  %v1816_v59 = vsel %vm334_vm0, %v4224_v58, %v3985_v42  ;;  %vm2769_vm0 = vcmask 261120  }
 0x17f   : > { %v3994_v21 = vpop.permute.xlu1 %3993  ;;  %v3991_v49 = vunpack.i.h.bf16 %v3989_v18  ;;  %v3990_v50 = vunpack.i.l.bf16 %v3989_v18 }
 0x180   : > { %v3342_v14 = vpop.f32.mrf.mxu0  ;;  %3365 = vmatmul.mubr.msk.bf16.gmra.mxu0 %vm2087_vm12, %v2062_v56  ;;  %v3996_v1 = vunpack.i.h.bf16 %v3994_v21  ;;  %v3995_v9 = vunpack.i.l.bf16 %v3994_v21 }
 0x181   : > { %v2186_v32 = vadd.f32 %v3342_v14, %v5226_v27  ;;  %v1848_v63 = vsel %vm1818_vm5, %v1815_v48, %v3991_v49  ;;  %v1847_v5 = vsel %vm1818_vm5, %v1814_v39, %v3990_v50  ;;  %v2480_v39 = vld [vmem:[#allocation4 + $0x2] sm:$0xff] }
 0x182   : > { %v3999_v45 = vpop.permute.xlu0 %3998  ;;  %v2177_v29 = vpop.f32.mrf.mxu0  ;;  %v1849_v61 = vsel %vm1818_vm5, %v1816_v59, %v3995_v9  ;;  %v1850_v3 = vsel %vm1818_vm5, %v1817_v52, %v3996_v1  ;;  %vm2814_vm5 = vcmask 916480  }
 0x183   : > { %v4004_v33 = vpop.permute.xlu1 %4003  ;;  %v2306_v6 = vmax.f32 %v2186_v32, 0.0  ;;  %v2178_v35 = vadd.f32 %v5226_v27, %v2177_v29  ;;  %v4001_v31 = vunpack.i.h.bf16 %v3999_v45  ;;  %v4000_v26 = vunpack.i.l.bf16 %v3999_v45 }
 0x184   : > { %v3343_v36 = vpop.f32.mrf.mxu0  ;;  %v4006_v43 = vunpack.i.h.bf16 %v4004_v33  ;;  %v4005_v44 = vunpack.i.l.bf16 %v4004_v33 }
 0x185   : > { %2338 = vst.msk [vmem:[#allocation3 + $0x10] sm:$0xff] %vm380_vm13, %v2306_v6  ;;  %v2304_v22 = vmax.f32 %v2178_v35, 0.0  ;;  %v2189_v37 = vadd.f32 %v3343_v36, %v5226_v27  ;;  %v1880_v10 = vsel %vm1851_vm6, %v1847_v5, %v4000_v26  ;;  %v1881_v19 = vsel %vm1851_vm6, %v1848_v63, %v4001_v31 }
 0x186   : > { %v4009_v7 = vpop.permute.xlu0 %4008  ;;  %v2180_v13 = vpop.f32.mrf.mxu0  ;;  %v1882_v17 = vsel %vm1851_vm6, %v1849_v61, %v4005_v44  ;;  %v1883_v55 = vsel %vm1851_vm6, %v1850_v3, %v4006_v43  ;;  %v2472_v61 = vld [vmem:[#allocation4 + $0x1] sm:$0xff]  ;;  %vm2995_vm6 = vcmask 64512  }
 0x187   : > { %v4014_v62 = vpop.permute.xlu1 %4013  ;;  %2336 = vst.msk [vmem:[#allocation3] sm:$0xff] %vm380_vm13, %v2304_v22  ;;  %v2307_v38 = vmax.f32 %v2189_v37, 0.0  ;;  %v2181_v2 = vadd.f32 %v5226_v27, %v2180_v13  ;;  %v4010_v4 = vunpack.i.l.bf16 %v4009_v7  ;;  %v4011_v28 = vunpack.i.h.bf16 %v4009_v7 }
 0x188   : > { %v4016_v57 = vunpack.i.h.bf16 %v4014_v62  ;;  %v4015_v47 = vunpack.i.l.bf16 %v4014_v62 }
 0x189   : > { %2339 = vst.msk [vmem:[#allocation3 + $0x18] sm:$0xff] %vm380_vm13, %v2307_v38  ;;  %v2305_v46 = vmax.f32 %v2181_v2, 0.0  ;;  %v1913_v21 = vsel %vm1884_vm7, %v1880_v10, %v4010_v4  ;;  %v1914_v33 = vsel %vm1884_vm7, %v1881_v19, %v4011_v28 }
 0x18a   : > { %v4019_v51 = vpop.permute.xlu0 %4018  ;;  %v1915_v15 = vsel %vm1884_vm7, %v1882_v17, %v4015_v47  ;;  %v1916_v34 = vsel %vm1884_vm7, %v1883_v55, %v4016_v57  ;;  %vm3059_vm7 = vcmask 1043456  }
 0x18b   : > { %v4024_v24 = vpop.permute.xlu1 %4023  ;;  %2337 = vst.msk [vmem:[#allocation3 + $0x8] sm:$0xff] %vm380_vm13, %v2305_v46  ;;  %v4020_v16 = vunpack.i.l.bf16 %v4019_v51  ;;  %v4021_v56 = vunpack.i.h.bf16 %v4019_v51 }
 0x18c   : > { %v4025_v8 = vunpack.i.l.bf16 %v4024_v24  ;;  %v4026_v54 = vunpack.i.h.bf16 %v4024_v24 }
 0x18d   : > { %v1946_v38 = vsel %vm1917_vm8, %v1913_v21, %v4020_v16  ;;  %v1947_v23 = vsel %vm1917_vm8, %v1914_v33, %v4021_v56  ;;  %v4199_v33 = vld [vmem:[%s5573_s3 + $0x38] sm:$0xff]  }
 0x18e   : > { %v4029_v11 = vpop.permute.xlu0 %4028  ;;  %v1948_v6 = vsel %vm1917_vm8, %v1915_v15, %v4025_v8  ;;  %v1949_v13 = vsel %vm1917_vm8, %v1916_v34, %v4026_v54  ;;  %vm4252_vm8 = vmmov 0  }
 0x18f   : > { %v4034_v40 = vpop.permute.xlu1 %4033  ;;  %v4031_v35 = vunpack.i.h.bf16 %v4029_v11  ;;  %v4030_v36 = vunpack.i.l.bf16 %v4029_v11 }
 0x190   : > { %v2370_v20 = vld [vmem:[#allocation3 + $0x10] ss:$2 sm:$0xff]  ;;  %v2402_v53 = vld [vmem:[#allocation3 + $0x11] ss:$2 sm:$0xff]  ;;  %v4036_v18 = vunpack.i.h.bf16 %v4034_v40  ;;  %v4035_v14 = vunpack.i.l.bf16 %v4034_v40 }
 0x191   : > { %v2432_v37 = vmax.f32 %v2370_v20, %v2402_v53  ;;  %v1979_v24 = vsel %vm1950_vm9, %v1946_v38, %v4030_v36  ;;  %v1980_v25 = vsel %vm1950_vm9, %v1947_v23, %v4031_v35 }
 0x192   : > { %v2368_v45 = vld [vmem:[#allocation3] ss:$2 sm:$0xff]  ;;  %v2400_v29 = vld [vmem:[#allocation3 + $0x1] ss:$2 sm:$0xff]  ;;  %v4039_v22 = vpop.permute.xlu0 %4038  ;;  %v1981_v1 = vsel %vm1950_vm9, %v1948_v6, %v4035_v14  ;;  %v1982_v9 = vsel %vm1950_vm9, %v1949_v13, %v4036_v18  ;;  %v4201_v6 = vld [vmem:[%s5573_s3 + $0x28] sm:$0xff]  }
 0x193   : > { %v4044_v32 = vpop.permute.xlu1 %4043  ;;  %v2431_v62 = vmax.f32 %v2368_v45, %v2400_v29  ;;  %v4041_v2 = vunpack.i.h.bf16 %v4039_v22  ;;  %v4040_v41 = vunpack.i.l.bf16 %v4039_v22  ;;  %v4246_v45 = vmov 0   ;;  %v4200_v29 = vld [vmem:[%s5573_s3 + $0x30] sm:$0xff]  }
 0x194   : > { %v4046_v12 = vunpack.i.h.bf16 %v4044_v32  ;;  %v4045_v7 = vunpack.i.l.bf16 %v4044_v32  ;;  %2922 = vmatprep.subr.bf16.mxu1 %v4246_v45 }
 0x195   : > { %v2447_v42 = vmax.f32 %v2431_v62, %v2432_v37  ;;  %v2012_v26 = vsel %vm1983_vm10, %v1979_v24, %v4040_v41  ;;  %v2013_v30 = vsel %vm1983_vm10, %v1980_v25, %v4041_v2  ;;  %2923 = vmatpush1.bf16.msra.mxu1 %v4199_v33  ;;  %v4202_v2 = vld [vmem:[%s5573_s3 + $0x20] sm:$0xff]   ;;  %v4203_v25 = vld [vmem:[%s5573_s3 + $0x18] sm:$0xff]  }
 0x196   : > { %v4049_v50 = vpop.permute.xlu0 %4048  ;;  %v2014_v51 = vsel %vm1983_vm10, %v1981_v1, %v4045_v7  ;;  %v2015_v43 = vsel %vm1983_vm10, %v1982_v9, %v4046_v12  ;;  %2924 = vmatprep.subr.bf16.mxu1 %v4246_v45 }
 0x197   : > { %v4054_v46 = vpop.permute.xlu1 %4053  ;;  %2456 = vst.msk [vmem:[#allocation4 + $0x11] sm:$0xff] %vm380_vm13, %v2447_v42  ;;  %v4051_v44 = vunpack.i.h.bf16 %v4049_v50  ;;  %v4050_v31 = vunpack.i.l.bf16 %v4049_v50 }
 0x198   : > { %v4056_v48 = vunpack.i.h.bf16 %v4054_v46  ;;  %v4055_v49 = vunpack.i.l.bf16 %v4054_v46 }
 0x199   : > { %v2045_v57 = vsel %vm2016_vm11, %v2012_v26, %v4050_v31  ;;  %v2046_v47 = vsel %vm2016_vm11, %v2013_v30, %v4051_v44  ;;  %2925 = vmatpush1.bf16.msra.mxu1 %v4200_v29 }
 0x19a   : > { %v2047_v52 = vsel %vm2016_vm11, %v2014_v51, %v4055_v49  ;;  %v2048_v58 = vsel %vm2016_vm11, %v2015_v43, %v4056_v48  ;;  %v2063_v60 = vpack.c.bf16 %v2046_v47, %v2045_v57  ;;  %2926 = vmatprep.subr.bf16.mxu1 %v4246_v45  ;;  %v4204_v51 = vld [vmem:[%s5573_s3 + $0x10] sm:$0xff]   ;;  %v4205_v43 = vld [vmem:[%s5573_s3 + $0x8] sm:$0xff]   ;;  %v4207_v47 = vld [vmem:[%s5573_s3 + $0x40] sm:$0xff]  }
 0x19b   : > { %v2064_v59 = vpack.c.bf16 %v2048_v58, %v2047_v52  ;;  %v4206_v52 = vld [vmem:[%s5573_s3] sm:$0xff]  }
 0x19c   : > { %3368 = vmatprep.mubr.msk.bf16.mxu0 %vm2087_vm12, %v2063_v60 }
 0x19d   : > { %3369 = vmatmul.mubr.msk.bf16.gmra.mxu0 %vm2087_vm12, %v2064_v59  ;;  %2927 = vmatpush1.bf16.msra.mxu1 %v4201_v6 }
 0x19e   : > { %v5274_v3 = vld [vmem:[#allocation4 + $0x12] sm:$0xff]  ;;  %2928 = vmatprep.subr.bf16.mxu1 %v4246_v45  ;;  %3386 = vmatprep.mubr.msk.bf16.mxu0 %vm4252_vm8, %v4234_v0 }
 0x19f   : > { %v2473_v4 = vld [vmem:[#allocation4 + $0x11] sm:$0xff]  ;;  %v4062_v40 = vpack.i.bf16 %v5274_v3, %v2480_v39 }
 0x1a0   : > { %v4057_v63 = vpack.i.bf16 %v2473_v4, %v2472_v61  ;;  %v3346_v5 = vpop.f32.mrf.mxu0  ;;  %v5297_v36 = vld [vmem:[#allocation4 + $0x10] sm:$0xff] }
 0x1a1   : > { %v2202_v28 = vadd.f32 %v3346_v5, %v5226_v27  ;;  %4063 = vrot.lane.b32.xlu1 %v4062_v40, %s4244_s29  ;;  %2929 = vmatpush1.bf16.msra.mxu1 %v4202_v2 }
 0x1a2   : > { %4058 = vrot.lane.b32.xlu0 %v4057_v63, %s4245_s11  ;;  %v2193_v8 = vpop.f32.mrf.mxu0  ;;  %2930 = vmatprep.subr.bf16.mxu1 %v4246_v45 }
 0x1a3   : > { %v2310_v11 = vmax.f32 %v2202_v28, 0.0  ;;  %v2194_v17 = vadd.f32 %v5226_v27, %v2193_v8 }
 0x1a4   : > { %v3347_v55 = vpop.f32.mrf.mxu0 }
 0x1a5   : > { %2342 = vst.msk [vmem:[#allocation3 + $0x30] sm:$0xff] %vm380_vm13, %v2310_v11  ;;  %v2308_v10 = vmax.f32 %v2194_v17, 0.0  ;;  %v2205_v19 = vadd.f32 %v3347_v55, %v5226_v27  ;;  %2931 = vmatpush1.bf16.msra.mxu1 %v4203_v25 }
 0x1a6   : > { %v2196_v20 = vpop.f32.mrf.mxu0  ;;  %2932 = vmatprep.subr.bf16.mxu1 %v4246_v45 }
 0x1a7   : > { %2340 = vst.msk [vmem:[#allocation3 + $0x20] sm:$0xff] %vm380_vm13, %v2308_v10  ;;  %v2311_v53 = vmax.f32 %v2205_v19, 0.0  ;;  %v2197_v15 = vadd.f32 %v5226_v27, %v2196_v20 }
 0x1a9   : > { %2343 = vst.msk [vmem:[#allocation3 + $0x38] sm:$0xff] %vm380_vm13, %v2311_v53  ;;  %v2309_v34 = vmax.f32 %v2197_v15, 0.0  ;;  %2933 = vmatpush1.bf16.msra.mxu1 %v4204_v51 }
 0x1aa   : > { %2934 = vmatprep.subr.bf16.mxu1 %v4246_v45 }
 0x1ab   : > { %2341 = vst.msk [vmem:[#allocation3 + $0x28] sm:$0xff] %vm380_vm13, %v2309_v34 }
 0x1ad   : > { %2935 = vmatpush1.bf16.msra.mxu1 %v4205_v43 }
 0x1ae   : > { %2936 = vmatprep.subr.bf16.mxu1 %v4246_v45 }
 0x1b0   : > { %v2374_v54 = vld [vmem:[#allocation3 + $0x30] ss:$2 sm:$0xff]  ;;  %v2406_v16 = vld [vmem:[#allocation3 + $0x31] ss:$2 sm:$0xff] }
 0x1b1   : > { %v2434_v18 = vmax.f32 %v2374_v54, %v2406_v16  ;;  %2937 = vmatpush1.bf16.msra.mxu1 %v4206_v52 }
 0x1b2   : > { %v2372_v21 = vld [vmem:[#allocation3 + $0x20] ss:$2 sm:$0xff]  ;;  %v2404_v56 = vld [vmem:[#allocation3 + $0x21] ss:$2 sm:$0xff]  ;;  %2952 = vmatprep.subr.bf16.mxu1 %v4246_v45 }
 0x1b3   : > { %v2433_v14 = vmax.f32 %v2372_v21, %v2404_v56 }
 0x1b5   : > { %v2448_v32 = vmax.f32 %v2433_v14, %v2434_v18  ;;  %2953 = vmatpush2.bf16.msra.mxu1 %v4207_v47 }
 0x1b6   : > { %3372 = vmatprep.subr.bf16.mxu1 %v4234_v0 }
 0x1b7   : > { %2457 = vst.msk [vmem:[#allocation4 + $0x21] sm:$0xff] %vm380_vm13, %v2448_v32 }
 0x1be   : > { %v2497_v35 = vld [vmem:[#allocation4 + $0x21] sm:$0xff] }
 0x1bf   : > { %v5299_v22 = vld [vmem:[#allocation4 + $0x20] sm:$0xff]  ;;  %v4072_v37 = vpack.i.bf16 %v2497_v35, %v2473_v4 }
 0x1c0   : > { %v4067_v62 = vpack.i.bf16 %v5299_v22, %v5297_v36  ;;  %v3350_v12 = vpop.f32.mrf.mxu0  ;;  %v5303_v7 = vld [vmem:[#allocation4 + $0x22] sm:$0xff] }
 0x1c1   : > { %v2218_v13 = vadd.f32 %v3350_v12, %v5226_v27  ;;  %4073 = vrot.lane.b32.xlu1 %v4072_v37, %s4247_s18  ;;  %v4077_v23 = vpack.i.bf16 %v5303_v7, %v5274_v3 }
 0x1c2   : > { %4068 = vrot.lane.b32.xlu0 %v4067_v62, %s4248_s19  ;;  %v2209_v38 = vpop.f32.mrf.mxu0 }
 0x1c3   : > { %v2314_v41 = vmax.f32 %v2218_v13, 0.0  ;;  %v2210_v42 = vadd.f32 %v5226_v27, %v2209_v38 }
 0x1c4   : > { %v3351_v1 = vpop.f32.mrf.mxu0 }
 0x1c5   : > { %2346 = vst.msk [vmem:[#allocation3 + $0x50] sm:$0xff] %vm380_vm13, %v2314_v41  ;;  %v2312_v9 = vmax.f32 %v2210_v42, 0.0  ;;  %v2221_v46 = vadd.f32 %v3351_v1, %v5226_v27 }
 0x1c6   : > { %4078 = vrot.lane.b32.xlu0 %v4077_v23, %s4249_s22  ;;  %v2212_v24 = vpop.f32.mrf.mxu0 }
 0x1c7   : > { %2344 = vst.msk [vmem:[#allocation3 + $0x40] sm:$0xff] %vm380_vm13, %v2312_v9  ;;  %v2315_v48 = vmax.f32 %v2221_v46, 0.0  ;;  %v2213_v49 = vadd.f32 %v5226_v27, %v2212_v24 }
 0x1c9   : > { %2347 = vst.msk [vmem:[#allocation3 + $0x58] sm:$0xff] %vm380_vm13, %v2315_v48  ;;  %v2313_v50 = vmax.f32 %v2213_v49, 0.0 }
 0x1cb   : > { %2345 = vst.msk [vmem:[#allocation3 + $0x48] sm:$0xff] %vm380_vm13, %v2313_v50 }
 0x1d0   : > { %v2378_v44 = vld [vmem:[#allocation3 + $0x50] ss:$2 sm:$0xff]  ;;  %v2410_v31 = vld [vmem:[#allocation3 + $0x51] ss:$2 sm:$0xff] }
 0x1d1   : > { %v2436_v58 = vmax.f32 %v2378_v44, %v2410_v31 }
 0x1d2   : > { %v2376_v26 = vld [vmem:[#allocation3 + $0x40] ss:$2 sm:$0xff]  ;;  %v2408_v30 = vld [vmem:[#allocation3 + $0x41] ss:$2 sm:$0xff] }
 0x1d3   : > { %v2435_v59 = vmax.f32 %v2376_v26, %v2408_v30 }
 0x1d5   : > { %v2449_v57 = vmax.f32 %v2435_v59, %v2436_v58 }
 0x1d7   : > { %2458 = vst.msk [vmem:[#allocation4 + $0x31] sm:$0xff] %vm380_vm13, %v2449_v57 }
 0x1de   : > { %v2530_v60 = vld [vmem:[#allocation4 + $0x32] sm:$0xff] }
 0x1df   : > { %v5338_v39 = vld [vmem:[#allocation4 + $0x30] sm:$0xff]  ;;  %v2824_v3 = vpack.c.bf16 %v2530_v60, %v5303_v7  ;;  %v4097_v55 = vpack.i.bf16 %v2530_v60, %v5303_v7 }
 0x1e0   : > { %v2522_v61 = vld [vmem:[#allocation4 + $0x31] sm:$0xff]  ;;  %v4082_v4 = vpack.i.bf16 %v5338_v39, %v5299_v22  ;;  %v3354_v63 = vpop.f32.mrf.mxu0 }
 0x1e1   : > { %v4087_v40 = vpack.i.bf16 %v2522_v61, %v2497_v35  ;;  %v2234_v5 = vadd.f32 %v3354_v63, %v5226_v27  ;;  %3295 = vmatprep.mubr.msk.bf16.mxu1 %vm380_vm13, %v2824_v3 }
 0x1e2   : > { %4083 = vrot.lane.b32.xlu1 %v4082_v4, %s4250_s16  ;;  %v2225_v28 = vpop.f32.mrf.mxu0 }
 0x1e3   : > { %4088 = vrot.lane.b32.xlu0 %v4087_v40, %s4251_s17  ;;  %v2318_v8 = vmax.f32 %v2234_v5, 0.0  ;;  %v2226_v11 = vadd.f32 %v5226_v27, %v2225_v28 }
 0x1e4   : > { %v3355_v17 = vpop.f32.mrf.mxu0 }
 0x1e5   : > { %2350 = vst.msk [vmem:[#allocation3 + $0x70] sm:$0xff] %vm380_vm13, %v2318_v8  ;;  %v2316_v10 = vmax.f32 %v2226_v11, 0.0  ;;  %v2237_v19 = vadd.f32 %v3355_v17, %v5226_v27 }
 0x1e6   : > { %4093 = vrot.lane.b32.xlu1 %v4087_v40, %s4245_s11  ;;  %v2228_v20 = vpop.f32.mrf.mxu0 }
 0x1e7   : > { %4098 = vrot.lane.b32.xlu0 %v4097_v55, %s4244_s29  ;;  %2348 = vst.msk [vmem:[#allocation3 + $0x60] sm:$0xff] %vm380_vm13, %v2316_v10  ;;  %v2319_v53 = vmax.f32 %v2237_v19, 0.0  ;;  %v2229_v15 = vadd.f32 %v5226_v27, %v2228_v20 }
 0x1e9   : > { %2351 = vst.msk [vmem:[#allocation3 + $0x78] sm:$0xff] %vm380_vm13, %v2319_v53  ;;  %v2317_v34 = vmax.f32 %v2229_v15, 0.0 }
 0x1eb   : > { %2349 = vst.msk [vmem:[#allocation3 + $0x68] sm:$0xff] %vm380_vm13, %v2317_v34 }
 0x1f0   : > { %v2382_v54 = vld [vmem:[#allocation3 + $0x70] ss:$2 sm:$0xff]  ;;  %v2414_v16 = vld [vmem:[#allocation3 + $0x71] ss:$2 sm:$0xff] }
 0x1f1   : > { %v2438_v18 = vmax.f32 %v2382_v54, %v2414_v16 }
 0x1f2   : > { %v2380_v21 = vld [vmem:[#allocation3 + $0x60] ss:$2 sm:$0xff]  ;;  %v2412_v56 = vld [vmem:[#allocation3 + $0x61] ss:$2 sm:$0xff] }
 0x1f3   : > { %v2437_v14 = vmax.f32 %v2380_v21, %v2412_v56 }
 0x1f5   : > { %v2450_v32 = vmax.f32 %v2437_v14, %v2438_v18 }
 0x1f7   : > { %2459 = vst.msk [vmem:[#allocation4 + $0x41] sm:$0xff] %vm380_vm13, %v2450_v32 }
 0x1fe   : > { %v5358_v33 = vld [vmem:[#allocation4 + $0x40] sm:$0xff] }
 0x1ff   : > { %v2499_v45 = vld [vmem:[#allocation4 + $0x41] sm:$0xff]  ;;  %v4102_v29 = vpack.i.bf16 %v5358_v33, %v5338_v39 }
 0x200   : > { %v4107_v6 = vpack.i.bf16 %v2499_v45, %v2522_v61  ;;  %v3358_v35 = vpop.f32.mrf.mxu0  ;;  %v5362_v37 = vld [vmem:[#allocation4 + $0x42] sm:$0xff] }
 0x201   : > { %v2250_v62 = vadd.f32 %v3358_v35, %v5226_v27  ;;  %4103 = vrot.lane.b32.xlu1 %v4102_v29, %s4248_s19  ;;  %v4112_v38 = vpack.i.bf16 %v5362_v37, %v2530_v60 }
 0x202   : > { %4108 = vrot.lane.b32.xlu0 %v4107_v6, %s4247_s18  ;;  %v2241_v12 = vpop.f32.mrf.mxu0 }
 0x203   : > { %v2322_v7 = vmax.f32 %v2250_v62, 0.0  ;;  %v2242_v13 = vadd.f32 %v5226_v27, %v2241_v12 }
 0x204   : > { %v3359_v2 = vpop.f32.mrf.mxu0 }
 0x205   : > { %2354 = vst.msk [vmem:[#allocation3 + $0x90] sm:$0xff] %vm380_vm13, %v2322_v7  ;;  %v2320_v41 = vmax.f32 %v2242_v13, 0.0  ;;  %v2253_v42 = vadd.f32 %v3359_v2, %v5226_v27  ;;  %4113 = vrot.lane.b32.xlu1 %v4112_v38, %s4249_s22 }
 0x206   : > { %v2244_v23 = vpop.f32.mrf.mxu0 }
 0x207   : > { %2352 = vst.msk [vmem:[#allocation3 + $0x80] sm:$0xff] %vm380_vm13, %v2320_v41  ;;  %v2323_v1 = vmax.f32 %v2253_v42, 0.0  ;;  %v2245_v9 = vadd.f32 %v5226_v27, %v2244_v23  ;;  %v2464_v23 = vld [vmem:[#allocation4] sm:$0xff] }
 0x209   : > { %2355 = vst.msk [vmem:[#allocation3 + $0x98] sm:$0xff] %vm380_vm13, %v2323_v1  ;;  %v2321_v46 = vmax.f32 %v2245_v9, 0.0 }
 0x20b   : > { %2353 = vst.msk [vmem:[#allocation3 + $0x88] sm:$0xff] %vm380_vm13, %v2321_v46 }
 0x210   : > { %v2386_v24 = vld [vmem:[#allocation3 + $0x90] ss:$2 sm:$0xff]  ;;  %v2418_v25 = vld [vmem:[#allocation3 + $0x91] ss:$2 sm:$0xff] }
 0x211   : > { %v2440_v50 = vmax.f32 %v2386_v24, %v2418_v25 }
 0x212   : > { %v2384_v48 = vld [vmem:[#allocation3 + $0x80] ss:$2 sm:$0xff]  ;;  %v2416_v49 = vld [vmem:[#allocation3 + $0x81] ss:$2 sm:$0xff] }
 0x213   : > { %v2439_v51 = vmax.f32 %v2384_v48, %v2416_v49  ;;  %v4064_v41 = vpop.permute.xlu1 %4063 }
 0x214   : > { %v4059_v32 = vpop.permute.xlu0 %4058  ;;  %v4065_v46 = vunpack.i.l.bf16 %v4064_v41  ;;  %v4066_v24 = vunpack.i.h.bf16 %v4064_v41 }
 0x215   : > { %v2451_v43 = vmax.f32 %v2439_v51, %v2440_v50  ;;  %v4060_v42 = vunpack.i.l.bf16 %v4059_v32  ;;  %v4061_v1 = vunpack.i.h.bf16 %v4059_v32 }
 0x217   : > { %2460 = vst.msk [vmem:[#allocation4 + $0x51] sm:$0xff] %vm380_vm13, %v2451_v43  ;;  %v2761_v25 = vsel %vm380_vm13, %v2464_v23, %v4060_v42  ;;  %v2762_v50 = vsel %vm380_vm13, %v5297_v36, %v4061_v1 }
 0x21e   : > { %v2524_v44 = vld [vmem:[#allocation4 + $0x51] sm:$0xff] }
 0x21f   : > { %v5377_v31 = vld [vmem:[#allocation4 + $0x50] sm:$0xff]  ;;  %v4122_v26 = vpack.i.bf16 %v2524_v44, %v2499_v45 }
 0x220   : > { %v4117_v30 = vpack.i.bf16 %v5377_v31, %v5358_v33  ;;  %v3362_v52 = vpop.f32.mrf.mxu0  ;;  %v5381_v58 = vld [vmem:[#allocation4 + $0x52] sm:$0xff] }
 0x221   : > { %v2266_v59 = vadd.f32 %v3362_v52, %v5226_v27  ;;  %4123 = vrot.lane.b32.xlu1 %v4122_v26, %s4251_s17  ;;  %v4132_v61 = vpack.i.bf16 %v5381_v58, %v5362_v37  ;;  %v2771_v52 = vsel %vm2769_vm0, %v2762_v50, %v4066_v24 }
 0x222   : > { %4118 = vrot.lane.b32.xlu0 %v4117_v30, %s4250_s16  ;;  %v2257_v57 = vpop.f32.mrf.mxu0 }
 0x223   : > { %v2326_v47 = vmax.f32 %v2266_v59, 0.0  ;;  %v2258_v60 = vadd.f32 %v5226_v27, %v2257_v57 }
 0x224   : > { %v3363_v3 = vpop.f32.mrf.mxu0 }
 0x225   : > { %2358 = vst.msk [vmem:[#allocation3 + $0xb0] sm:$0xff] %vm380_vm13, %v2326_v47  ;;  %v2324_v4 = vmax.f32 %v2258_v60, 0.0  ;;  %v2269_v40 = vadd.f32 %v3363_v3, %v5226_v27  ;;  %4133 = vrot.lane.b32.xlu1 %v4132_v61, %s4244_s29 }
 0x226   : > { %4128 = vrot.lane.b32.xlu0 %v4122_v26, %s4245_s11  ;;  %v2260_v63 = vpop.f32.mrf.mxu0  ;;  %v2770_v26 = vsel %vm2769_vm0, %v2761_v25, %v4065_v46 }
 0x227   : > { %2356 = vst.msk [vmem:[#allocation3 + $0xa0] sm:$0xff] %vm380_vm13, %v2324_v4  ;;  %v2327_v5 = vmax.f32 %v2269_v40, 0.0  ;;  %v2261_v28 = vadd.f32 %v5226_v27, %v2260_v63 }
 0x229   : > { %2359 = vst.msk [vmem:[#allocation3 + $0xb8] sm:$0xff] %vm380_vm13, %v2327_v5  ;;  %v2325_v8 = vmax.f32 %v2261_v28, 0.0 }
 0x22b   : > { %2357 = vst.msk [vmem:[#allocation3 + $0xa8] sm:$0xff] %vm380_vm13, %v2325_v8 }
 0x230   : > { %v2390_v11 = vld [vmem:[#allocation3 + $0xb0] ss:$2 sm:$0xff]  ;;  %v2422_v17 = vld [vmem:[#allocation3 + $0xb1] ss:$2 sm:$0xff] }
 0x231   : > { %v2442_v19 = vmax.f32 %v2390_v11, %v2422_v17 }
 0x232   : > { %v2388_v55 = vld [vmem:[#allocation3 + $0xa0] ss:$2 sm:$0xff]  ;;  %v2420_v10 = vld [vmem:[#allocation3 + $0xa1] ss:$2 sm:$0xff] }
 0x233   : > { %v2441_v20 = vmax.f32 %v2388_v55, %v2420_v10  ;;  %v4074_v48 = vpop.permute.xlu1 %4073 }
 0x234   : > { %v4069_v13 = vpop.permute.xlu0 %4068  ;;  %v4076_v30 = vunpack.i.h.bf16 %v4074_v48 }
 0x235   : > { %v2452_v53 = vmax.f32 %v2441_v20, %v2442_v19  ;;  %v4070_v49 = vunpack.i.l.bf16 %v4069_v13  ;;  %v4071_v51 = vunpack.i.h.bf16 %v4069_v13 }
 0x237   : > { %2461 = vst.msk [vmem:[#allocation4 + $0x61] sm:$0xff] %vm380_vm13, %v2452_v53  ;;  %v2779_v59 = vsel %vm2778_vm1, %v2770_v26, %v4070_v49  ;;  %v2780_v61 = vsel %vm2778_vm1, %v2771_v52, %v4071_v51 }
 0x238   : > { %v4079_v43 = vpop.permute.xlu0 %4078  ;;  %v2789_v8 = vsel %vm2787_vm2, %v2780_v61, %v4076_v30 }
 0x239   : > { %v4080_v57 = vunpack.i.l.bf16 %v4079_v43  ;;  %v4081_v3 = vunpack.i.h.bf16 %v4079_v43 }
 0x23b   : > { %v2798_v19 = vsel %vm2796_vm3, %v2789_v8, %v4081_v3 }
 0x23e   : > { %v5398_v15 = vld [vmem:[#allocation4 + $0x61] sm:$0xff] }
 0x23f   : > { %v5400_v34 = vld [vmem:[#allocation4 + $0x60] sm:$0xff]  ;;  %v4142_v54 = vpack.i.bf16 %v5398_v15, %v2524_v44  ;;  %v4075_v44 = vunpack.i.l.bf16 %v4074_v48 }
 0x240   : > { %v4137_v16 = vpack.i.bf16 %v5400_v34, %v5377_v31  ;;  %v3366_v21 = vpop.f32.mrf.mxu0  ;;  %v5405_v56 = vld [vmem:[#allocation4 + $0x62] sm:$0xff] }
 0x241   : > { %v2282_v18 = vadd.f32 %v3366_v21, %v5226_v27  ;;  %4143 = vrot.lane.b32.xlu1 %v4142_v54, %s4247_s18  ;;  %v4147_v6 = vpack.i.bf16 %v5405_v56, %v5381_v58  ;;  %v2788_v40 = vsel %vm2787_vm2, %v2779_v59, %v4075_v44  ;;  %v2520_v59 = vld [vmem:[#allocation4 + $0x90] sm:$0xff] }
 0x242   : > { %4138 = vrot.lane.b32.xlu0 %v4137_v16, %s4248_s19  ;;  %v2273_v14 = vpop.f32.mrf.mxu0  ;;  %v2797_v11 = vsel %vm2796_vm3, %v2788_v40, %v4080_v57 }
 0x243   : > { %v2330_v45 = vmax.f32 %v2282_v18, 0.0  ;;  %v2274_v29 = vadd.f32 %v5226_v27, %v2273_v14 }
 0x244   : > { %v3367_v35 = vpop.f32.mrf.mxu0 }
 0x245   : > { %2362 = vst.msk [vmem:[#allocation3 + $0xd0] sm:$0xff] %vm380_vm13, %v2330_v45  ;;  %v2328_v62 = vmax.f32 %v2274_v29, 0.0  ;;  %v2285_v12 = vadd.f32 %v3367_v35, %v5226_v27  ;;  %v2826_v45 = vpack.c.bf16 %v5381_v58, %v5362_v37 }
 0x246   : > { %4148 = vrot.lane.b32.xlu0 %v4147_v6, %s4249_s22  ;;  %v2276_v7 = vpop.f32.mrf.mxu0 }
 0x247   : > { %2360 = vst.msk [vmem:[#allocation3 + $0xc0] sm:$0xff] %vm380_vm13, %v2328_v62  ;;  %v2331_v38 = vmax.f32 %v2285_v12, 0.0  ;;  %v2277_v2 = vadd.f32 %v5226_v27, %v2276_v7 }
 0x249   : > { %2363 = vst.msk [vmem:[#allocation3 + $0xd8] sm:$0xff] %vm380_vm13, %v2331_v38  ;;  %v2329_v9 = vmax.f32 %v2277_v2, 0.0 }
 0x24b   : > { %2361 = vst.msk [vmem:[#allocation3 + $0xc8] sm:$0xff] %vm380_vm13, %v2329_v9 }
 0x250   : > { %v2394_v47 = vld [vmem:[#allocation3 + $0xd0] ss:$2 sm:$0xff]  ;;  %v2426_v60 = vld [vmem:[#allocation3 + $0xd1] ss:$2 sm:$0xff] }
 0x251   : > { %v2444_v63 = vmax.f32 %v2394_v47, %v2426_v60  ;;  %v2528_v60 = vld [vmem:[#allocation4 + $0x91] sm:$0xff] }
 0x252   : > { %v2392_v36 = vld [vmem:[#allocation3 + $0xc0] ss:$2 sm:$0xff]  ;;  %v2424_v4 = vld [vmem:[#allocation3 + $0xc1] ss:$2 sm:$0xff] }
 0x253   : > { %v2443_v5 = vmax.f32 %v2392_v36, %v2424_v4 }
 0x254   : > { %v4084_v28 = vpop.permute.xlu1 %4083 }
 0x255   : > { %v4086_v17 = vunpack.i.h.bf16 %v4084_v28  ;;  %v4085_v55 = vunpack.i.l.bf16 %v4084_v28  ;;  %v4089_v10 = vpop.permute.xlu0 %4088  ;;  %v2453_v20 = vmax.f32 %v2443_v5, %v2444_v63 }
 0x256   : > { %v4091_v53 = vunpack.i.h.bf16 %v4089_v10  ;;  %v4090_v54 = vunpack.i.l.bf16 %v4089_v10 }
 0x257   : > { %v2806_v16 = vsel %vm2805_vm4, %v2797_v11, %v4085_v55  ;;  %v2807_v21 = vsel %vm2805_vm4, %v2798_v19, %v4086_v17  ;;  %2462 = vst.msk [vmem:[#allocation4 + $0x71] sm:$0xff] %vm380_vm13, %v2453_v20 }
 0x258   : > { %v2815_v18 = vsel %vm2814_vm5, %v2806_v16, %v4090_v54  ;;  %v2816_v14 = vsel %vm2814_vm5, %v2807_v21, %v4091_v53  ;;  %v4094_v61 = vpop.permute.xlu1 %4093 }
 0x259   : > { %v2823_v32 = vpack.c.bf16 %v2816_v14, %v2815_v18  ;;  %v4096_v36 = vunpack.i.h.bf16 %v4094_v61  ;;  %v4095_v4 = vunpack.i.l.bf16 %v4094_v61  ;;  %v4099_v40 = vpop.permute.xlu0 %4098 }
 0x25a   : > { %v4101_v5 = vunpack.i.h.bf16 %v4099_v40  ;;  %v4100_v28 = vunpack.i.l.bf16 %v4099_v40 }
 0x25b   : > { %2955 = vmatmul.mubr.bf16.vlgmr.msra.gmra.mxu1 %v2823_v32  ;;  %v2764_v8 = vsel %vm380_vm13, %v5338_v39, %v4096_v36  ;;  %v2763_v11 = vsel %vm380_vm13, %v5299_v22, %v4095_v4 }
 0x25c   : > { %3296 = vmatprep.mubr.msk.bf16.mxu1 %vm380_vm13, %v2826_v45  ;;  %v2773_v20 = vsel %vm2769_vm0, %v2764_v8, %v4101_v5  ;;  %v2772_v53 = vsel %vm2769_vm0, %v2763_v11, %v4100_v28 }
 0x25d   : > { %v3370_v29 = vpop.f32.mrf.mxu0 }
 0x25e   : > { %v2298_v6 = vadd.f32 %v3370_v29, %v5226_v27  ;;  %v5440_v35 = vld [vmem:[#allocation4 + $0x70] sm:$0xff] }
 0x25f   : > { %v2526_v62 = vld [vmem:[#allocation4 + $0x71] sm:$0xff]  ;;  %v2289_v12 = vpop.f32.mrf.mxu0  ;;  %v4152_v7 = vpack.i.bf16 %v5440_v35, %v5400_v34 }
 0x260   : > { %v4157_v13 = vpack.i.bf16 %v2526_v62, %v5398_v15  ;;  %v2334_v38 = vmax.f32 %v2298_v6, 0.0  ;;  %v2290_v2 = vadd.f32 %v5226_v27, %v2289_v12  ;;  %v5446_v41 = vld [vmem:[#allocation4 + $0x72] sm:$0xff] }
 0x261   : > { %v3371_v37 = vpop.f32.mrf.mxu0  ;;  %4153 = vrot.lane.b32.xlu1 %v4152_v7, %s4250_s16  ;;  %v4167_v1 = vpack.i.bf16 %v5446_v41, %v5405_v56 }
 0x262   : > { %4158 = vrot.lane.b32.xlu0 %v4157_v13, %s4251_s17  ;;  %2366 = vst.msk [vmem:[#allocation3 + $0xf0] sm:$0xff] %vm380_vm13, %v2334_v38  ;;  %v2332_v58 = vmax.f32 %v2290_v2, 0.0  ;;  %v2301_v42 = vadd.f32 %v3371_v37, %v5226_v27 }
 0x263   : > { %v2292_v23 = vpop.f32.mrf.mxu0 }
 0x264   : > { %2364 = vst.msk [vmem:[#allocation3 + $0xe0] sm:$0xff] %vm380_vm13, %v2332_v58  ;;  %v2335_v15 = vmax.f32 %v2301_v42, 0.0  ;;  %v2293_v9 = vadd.f32 %v5226_v27, %v2292_v23 }
 0x265   : > { %4163 = vrot.lane.b32.xlu1 %v4157_v13, %s4245_s11 }
 0x266   : > { %4168 = vrot.lane.b32.xlu0 %v4167_v1, %s4244_s29  ;;  %2367 = vst.msk [vmem:[#allocation3 + $0xf8] sm:$0xff] %vm380_vm13, %v2335_v15  ;;  %v2333_v46 = vmax.f32 %v2293_v9, 0.0  ;;  %v2828_v1 = vpack.c.bf16 %v5446_v41, %v5405_v56  ;;  %s332_s29 = scalar_lea.vmem %s5579_s9, %s3310_s15 }
 0x268   : > { %2365 = vst.msk [vmem:[#allocation3 + $0xe8] sm:$0xff] %vm380_vm13, %v2333_v46 }
 0x26d   : > { %v2398_v24 = vld [vmem:[#allocation3 + $0xf0] ss:$2 sm:$0xff]  ;;  %v2430_v25 = vld [vmem:[#allocation3 + $0xf1] ss:$2 sm:$0xff] }
 0x26e   : > { %v2446_v50 = vmax.f32 %v2398_v24, %v2430_v25 }
 0x26f   : > { %v2396_v48 = vld [vmem:[#allocation3 + $0xe0] ss:$2 sm:$0xff]  ;;  %v2428_v49 = vld [vmem:[#allocation3 + $0xe1] ss:$2 sm:$0xff] }
 0x270   : > { %v2445_v51 = vmax.f32 %v2396_v48, %v2428_v49 }
 0x272   : > { %v2454_v43 = vmax.f32 %v2445_v51, %v2446_v50 }
 0x273   : > { %v4104_v63 = vpop.permute.xlu1 %4103 }
 0x274   : > { %2463 = vst.msk [vmem:[#allocation4 + $0x81] sm:$0xff] %vm380_vm13, %v2454_v43  ;;  %v4106_v17 = vunpack.i.h.bf16 %v4104_v63  ;;  %v4105_v55 = vunpack.i.l.bf16 %v4104_v63  ;;  %v4109_v10 = vpop.permute.xlu0 %4108 }
 0x275   : > { %v4111_v54 = vunpack.i.h.bf16 %v4109_v10  ;;  %v4110_v16 = vunpack.i.l.bf16 %v4109_v10 }
 0x276   : > { %v2781_v21 = vsel %vm2778_vm1, %v2772_v53, %v4105_v55  ;;  %v2782_v18 = vsel %vm2778_vm1, %v2773_v20, %v4106_v17 }
 0x277   : > { %v4114_v19 = vpop.permute.xlu1 %4113  ;;  %v2790_v39 = vsel %vm2787_vm2, %v2781_v21, %v4110_v16  ;;  %v2791_v22 = vsel %vm2787_vm2, %v2782_v18, %v4111_v54 }
 0x278   : > { %v4116_v14 = vunpack.i.h.bf16 %v4114_v19  ;;  %v4115_v32 = vunpack.i.l.bf16 %v4114_v19  ;;  %v2536_v19 = vld [vmem:[#allocation4 + $0x92] sm:$0xff] }
 0x27a   : > { %v2799_v13 = vsel %vm2796_vm3, %v2790_v39, %v4115_v32  ;;  %v2800_v38 = vsel %vm2796_vm3, %v2791_v22, %v4116_v14 }
 0x27b   : > { %v2495_v44 = vld [vmem:[#allocation4 + $0x80] sm:$0xff] }
 0x27c   : > { %v2503_v27 = vld [vmem:[#allocation4 + $0x81] sm:$0xff]  ;;  %v4172_v26 = vpack.i.bf16 %v2495_v44, %v5440_v35  ;;  %v4187_v47 = vpack.i.bf16 %v2520_v59, %v2495_v44 }
 0x27d   : > { %v4177_v30 = vpack.i.bf16 %v2503_v27, %v2526_v62  ;;  %v5462_v52 = vld [vmem:[#allocation4 + $0x82] sm:$0xff]  ;;  %v4192_v3 = vpack.i.bf16 %v2528_v60, %v2503_v27 }
 0x27e   : > { %4173 = vrot.lane.b32.xlu1 %v4172_v26, %s4248_s19  ;;  %v4182_v57 = vpack.i.bf16 %v5462_v52, %v5446_v41  ;;  %v2830_v53 = vpack.c.bf16 %v2536_v19, %v5462_v52 }
 0x27f   : > { %4178 = vrot.lane.b32.xlu0 %v4177_v30, %s4247_s18 }
 0x282   : > { %4183 = vrot.lane.b32.xlu1 %v4182_v57, %s4249_s22 }
 0x283   : > { %4188 = vrot.lane.b32.xlu0 %v4187_v47, %s4250_s16 }
 0x286   : > { %4193 = vrot.lane.b32.xlu1 %v4192_v3, %s4251_s17 }
 0x293   : > { %v4124_v45 = vpop.permute.xlu1 %4123 }
 0x294   : > { %v4119_v29 = vpop.permute.xlu0 %4118  ;;  %v4126_v6 = vunpack.i.h.bf16 %v4124_v45  ;;  %v4125_v62 = vunpack.i.l.bf16 %v4124_v45 }
 0x295   : > { %v4121_v12 = vunpack.i.h.bf16 %v4119_v29  ;;  %v4120_v7 = vunpack.i.l.bf16 %v4119_v29 }
 0x297   : > { %v2808_v2 = vsel %vm2805_vm4, %v2799_v13, %v4120_v7  ;;  %v2809_v37 = vsel %vm2805_vm4, %v2800_v38, %v4121_v12  ;;  %v4134_v9 = vpop.permute.xlu1 %4133 }
 0x298   : > { %v2817_v58 = vsel %vm2814_vm5, %v2808_v2, %v4125_v62  ;;  %v2818_v42 = vsel %vm2814_vm5, %v2809_v37, %v4126_v6  ;;  %v4129_v15 = vpop.permute.xlu0 %4128  ;;  %v4136_v48 = vunpack.i.h.bf16 %v4134_v9  ;;  %v4135_v49 = vunpack.i.l.bf16 %v4134_v9 }
 0x299   : > { %v2825_v23 = vpack.c.bf16 %v2818_v42, %v2817_v58  ;;  %v4131_v46 = vunpack.i.h.bf16 %v4129_v15  ;;  %v4130_v24 = vunpack.i.l.bf16 %v4129_v15 }
 0x29b   : > { %2963 = vmatmul.mubr.bf16.gmra.mxu1 %v2825_v23  ;;  %v2766_v50 = vsel %vm380_vm13, %v5377_v31, %v4131_v46  ;;  %v2765_v51 = vsel %vm380_vm13, %v5358_v33, %v4130_v24 }
 0x29c   : > { %3297 = vmatprep.mubr.msk.bf16.mxu1 %vm380_vm13, %v2828_v1  ;;  %v2774_v30 = vsel %vm2769_vm0, %v2765_v51, %v4135_v49  ;;  %v2775_v59 = vsel %vm2769_vm0, %v2766_v50, %v4136_v48 }
 0x2b3   : > { %v4144_v43 = vpop.permute.xlu1 %4143 }
 0x2b4   : > { %v4139_v25 = vpop.permute.xlu0 %4138  ;;  %v4146_v41 = vunpack.i.h.bf16 %v4144_v43  ;;  %v4145_v26 = vunpack.i.l.bf16 %v4144_v43 }
 0x2b5   : > { %v4141_v44 = vunpack.i.h.bf16 %v4139_v25  ;;  %v4140_v27 = vunpack.i.l.bf16 %v4139_v25 }
 0x2b7   : > { %v2783_v57 = vsel %vm2778_vm1, %v2774_v30, %v4140_v27  ;;  %v2784_v47 = vsel %vm2778_vm1, %v2775_v59, %v4141_v44  ;;  %v3285_v27 = vld [vmem:[%s5574_s4] ss:$0 sm:$0xff] }
 0x2b8   : > { %v4149_v56 = vpop.permute.xlu0 %4148  ;;  %v2792_v31 = vsel %vm2787_vm2, %v2783_v57, %v4145_v26  ;;  %v2793_v33 = vsel %vm2787_vm2, %v2784_v47, %v4146_v41 }
 0x2b9   : > { %v4151_v60 = vunpack.i.h.bf16 %v4149_v56  ;;  %v4150_v61 = vunpack.i.l.bf16 %v4149_v56 }
 0x2bb   : > { %v2801_v28 = vsel %vm2796_vm3, %v2792_v31, %v4150_v61  ;;  %v2802_v8 = vsel %vm2796_vm3, %v2793_v33, %v4151_v60  ;;  %v3048_v61 = vld [vmem:[%s5575_s5] sm:$0xf]  ;;  %v4208_v33 = vld [vmem:[%s5577_s7 + $0x18] sm:$0xff]  }
 0x2bc   : > { %v3061_v31 = vsel %vm3059_vm7, %v3048_v61, 0  ;;  %3379 = vmatpush3.bf16.msra.mxu0 %v4208_v33 }
 0x2bd   : > { %3373 = vmatpush3.bf16.msra.mxu1 %v3061_v31  ;;  %3380 = vmatprep.subr.bf16.mxu0 %v4234_v0 }
 0x2d3   : > { %v4154_v3 = vpop.permute.xlu1 %4153 }
 0x2d4   : > { %v4159_v36 = vpop.permute.xlu0 %4158  ;;  %v4156_v4 = vunpack.i.h.bf16 %v4154_v3  ;;  %v4155_v40 = vunpack.i.l.bf16 %v4154_v3 }
 0x2d5   : > { %v4161_v63 = vunpack.i.h.bf16 %v4159_v36  ;;  %v4160_v5 = vunpack.i.l.bf16 %v4159_v36  ;;  %v4209_v36 = vld [vmem:[%s5577_s7 + $0x10] sm:$0xff]  }
 0x2d6   : > { %v2810_v11 = vsel %vm2805_vm4, %v2801_v28, %v4155_v40  ;;  %v2811_v17 = vsel %vm2805_vm4, %v2802_v8, %v4156_v4  ;;  %3381 = vmatpush3.bf16.msra.mxu0 %v4209_v36  ;;  %v4210_v28 = vld [vmem:[%s5577_s7 + $0x8] sm:$0xff]  }
 0x2d7   : > { %v2819_v55 = vsel %vm2814_vm5, %v2810_v11, %v4160_v5  ;;  %v2820_v10 = vsel %vm2814_vm5, %v2811_v17, %v4161_v63  ;;  %v4164_v54 = vpop.permute.xlu1 %4163  ;;  %3382 = vmatprep.subr.bf16.mxu0 %v4234_v0 }
 0x2d8   : > { %v2827_v20 = vpack.c.bf16 %v2820_v10, %v2819_v55  ;;  %v4166_v16 = vunpack.i.h.bf16 %v4164_v54  ;;  %v4165_v21 = vunpack.i.l.bf16 %v4164_v54  ;;  %v4169_v18 = vpop.permute.xlu0 %4168  ;;  %v4211_v55 = vld [vmem:[%s5577_s7] sm:$0xff]  }
 0x2d9   : > { %v4171_v14 = vunpack.i.h.bf16 %v4169_v18  ;;  %v4170_v32 = vunpack.i.l.bf16 %v4169_v18 }
 0x2da   : > { %2971 = vmatmul.mubr.bf16.gmra.mxu1 %v2827_v20  ;;  %v2768_v39 = vsel %vm380_vm13, %v5440_v35, %v4166_v16  ;;  %v2767_v22 = vsel %vm380_vm13, %v5400_v34, %v4165_v21  ;;  %3383 = vmatpush3.bf16.msra.mxu0 %v4210_v28 }
 0x2db   : > { %3298 = vmatprep.mubr.msk.bf16.mxu1 %vm380_vm13, %v2830_v53  ;;  %v2777_v52 = vsel %vm2769_vm0, %v2768_v39, %v4171_v14  ;;  %v2776_v12 = vsel %vm2769_vm0, %v2767_v22, %v4170_v32  ;;  %3384 = vmatprep.subr.bf16.mxu0 %v4234_v0 }
 0x2de   : > { %3385 = vmatpush3.bf16.msra.mxu0 %v4211_v55 }
 0x2f0   : > { %v4174_v45 = vpop.permute.xlu1 %4173 }
 0x2f1   : > { %v4179_v29 = vpop.permute.xlu0 %4178  ;;  %v4176_v6 = vunpack.i.h.bf16 %v4174_v45  ;;  %v4175_v62 = vunpack.i.l.bf16 %v4174_v45 }
 0x2f2   : > { %v4181_v7 = vunpack.i.h.bf16 %v4179_v29  ;;  %v4180_v13 = vunpack.i.l.bf16 %v4179_v29 }
 0x2f3   : > { %v2785_v38 = vsel %vm2778_vm1, %v2776_v12, %v4175_v62  ;;  %v2786_v2 = vsel %vm2778_vm1, %v2777_v52, %v4176_v6 }
 0x2f4   : > { %v4184_v37 = vpop.permute.xlu1 %4183  ;;  %v2794_v34 = vsel %vm2787_vm2, %v2785_v38, %v4180_v13  ;;  %v2795_v23 = vsel %vm2787_vm2, %v2786_v2, %v4181_v7 }
 0x2f5   : > { %v4189_v58 = vpop.permute.xlu0 %4188  ;;  %v4186_v35 = vunpack.i.h.bf16 %v4184_v37  ;;  %v4185_v42 = vunpack.i.l.bf16 %v4184_v37 }
 0x2f6   : > { %v4191_v1 = vunpack.i.h.bf16 %v4189_v58  ;;  %v4190_v15 = vunpack.i.l.bf16 %v4189_v58 }
 0x2f7   : > { %v2803_v9 = vsel %vm2796_vm3, %v2794_v34, %v4185_v42  ;;  %v2804_v46 = vsel %vm2796_vm3, %v2795_v23, %v4186_v35 }
 0x2f8   : > { %v4194_v24 = vpop.permute.xlu1 %4193  ;;  %v2812_v49 = vsel %vm2805_vm4, %v2803_v9, %v4190_v15  ;;  %v2813_v50 = vsel %vm2805_vm4, %v2804_v46, %v4191_v1 }
 0x2f9   : > { %v4196_v25 = vunpack.i.h.bf16 %v4194_v24  ;;  %v4195_v48 = vunpack.i.l.bf16 %v4194_v24 }
 0x2fb   : > { %v2821_v51 = vsel %vm2814_vm5, %v2812_v49, %v4195_v48  ;;  %v2822_v43 = vsel %vm2814_vm5, %v2813_v50, %v4196_v25 }
 0x2fc   : > { %v2829_v44 = vpack.c.bf16 %v2822_v43, %v2821_v51  ;;  %v3299_v43 = vld [vmem:[%s5576_s6] ss:$0 sm:$0xff] }
 0x2fe   : > { %2979 = vmatmul.mubr.bf16.gmra.mxu1 %v2829_v44 }
 0x2ff   : > { %3374 = vmatprep.mubr.msk.bf16.mxu1 %vm4252_vm8, %v4234_v0 }
 0x31b   : > { %v2956_v56 = vpop.f32.mrf.mxu1 }
 0x31c   : > { %v2957_v41 = vadd.f32 %v3285_v27, %v2956_v56 }
 0x31d   : > { %v2958_v26 = vpop.f32.mrf.mxu1 }
 0x31e   : > { %v2987_v30 = vmax.f32 %v2957_v41, 0.0 }
 0x31f   : > { %v2959_v59 = vpop.f32.mrf.mxu1 }
 0x320   : > { %2996 = vst.msk [vmem:[#allocation5] sm:$0xff] %vm2995_vm6, %v2987_v30  ;;  %v2960_v57 = vadd.f32 %v3285_v27, %v2959_v59 }
 0x321   : > { %v2961_v47 = vpop.f32.mrf.mxu1 }
 0x322   : > { %v2988_v60 = vmax.f32 %v2960_v57, 0.0 }
 0x324   : > { %2997 = vst.msk [vmem:[#allocation5 + $0x8] sm:$0xff] %vm2995_vm6, %v2988_v60  ;;  %v3301_v60 = vld [vmem:[%s5578_s8] ss:$0 sm:$0xff] }
 0x32b   : > { %v3004_v12 = vld [vmem:[#allocation5] ss:$2 sm:$0xff]  ;;  %v3012_v13 = vld [vmem:[#allocation5 + $0x1] ss:$2 sm:$0xff] }
 0x32c   : > { %v3019_v37 = vmax.f32 %v3004_v12, %v3012_v13 }
 0x32e   : > { %v3027_v1 = vcombine.high %v3019_v37, %v3019_v37 }
 0x330   : > { %v3035_v24 = vmax.f32 %v3019_v37, %v3027_v1 }
 0x35b   : > { %v2964_v3 = vpop.f32.mrf.mxu1 }
 0x35c   : > { %v2965_v4 = vadd.f32 %v3285_v27, %v2964_v3 }
 0x35d   : > { %v2966_v40 = vpop.f32.mrf.mxu1 }
 0x35e   : > { %v2989_v63 = vmax.f32 %v2965_v4, 0.0 }
 0x35f   : > { %v2967_v5 = vpop.f32.mrf.mxu1 }
 0x360   : > { %2998 = vst.msk [vmem:[#allocation5 + $0x10] sm:$0xff] %vm2995_vm6, %v2989_v63  ;;  %v2968_v8 = vadd.f32 %v3285_v27, %v2967_v5 }
 0x361   : > { %v2969_v11 = vpop.f32.mrf.mxu1 }
 0x362   : > { %v2990_v17 = vmax.f32 %v2968_v8, 0.0 }
 0x364   : > { %2999 = vst.msk [vmem:[#allocation5 + $0x18] sm:$0xff] %vm2995_vm6, %v2990_v17 }
 0x36b   : > { %v3006_v62 = vld [vmem:[#allocation5 + $0x10] ss:$2 sm:$0xff]  ;;  %v3014_v52 = vld [vmem:[#allocation5 + $0x11] ss:$2 sm:$0xff] }
 0x36c   : > { %v3020_v2 = vmax.f32 %v3006_v62, %v3014_v52 }
 0x36e   : > { %v3028_v35 = vcombine.high %v3020_v2, %v3020_v2 }
 0x370   : > { %v3036_v46 = vmax.f32 %v3020_v2, %v3028_v35 }
 0x372   : > { %v3043_v49 = vcombine.low %v3035_v24, %v3036_v46 }
 0x39a   : > { %v2972_v10 = vpop.f32.mrf.mxu1 }
 0x39b   : > { %v2973_v19 = vadd.f32 %v3285_v27, %v2972_v10 }
 0x39c   : > { %v2974_v20 = vpop.f32.mrf.mxu1 }
 0x39d   : > { %v2991_v53 = vmax.f32 %v2973_v19, 0.0 }
 0x39e   : > { %v2975_v54 = vpop.f32.mrf.mxu1 }
 0x39f   : > { %3000 = vst.msk [vmem:[#allocation5 + $0x20] sm:$0xff] %vm2995_vm6, %v2991_v53  ;;  %v2976_v16 = vadd.f32 %v3285_v27, %v2975_v54 }
 0x3a0   : > { %v2977_v21 = vpop.f32.mrf.mxu1 }
 0x3a1   : > { %v2992_v18 = vmax.f32 %v2976_v16, 0.0 }
 0x3a3   : > { %3001 = vst.msk [vmem:[#allocation5 + $0x28] sm:$0xff] %vm2995_vm6, %v2992_v18 }
 0x3aa   : > { %v3008_v7 = vld [vmem:[#allocation5 + $0x20] ss:$2 sm:$0xff]  ;;  %v3016_v38 = vld [vmem:[#allocation5 + $0x21] ss:$2 sm:$0xff] }
 0x3ab   : > { %v3021_v58 = vmax.f32 %v3008_v7, %v3016_v38 }
 0x3ad   : > { %v3029_v15 = vcombine.high %v3021_v58, %v3021_v58 }
 0x3af   : > { %v3037_v25 = vmax.f32 %v3021_v58, %v3029_v15 }
 0x3be   : > { %v2980_v14 = vpop.f32.mrf.mxu1 }
 0x3bf   : > { %v2981_v32 = vadd.f32 %v3285_v27, %v2980_v14 }
 0x3c0   : > { %v2982_v39 = vpop.f32.mrf.mxu1 }
 0x3c1   : > { %v2993_v22 = vmax.f32 %v2981_v32, 0.0 }
 0x3c2   : > { %v2983_v45 = vpop.f32.mrf.mxu1 }
 0x3c3   : > { %3002 = vst.msk [vmem:[#allocation5 + $0x30] sm:$0xff] %vm2995_vm6, %v2993_v22  ;;  %v2984_v0 = vadd.f32 %v3285_v27, %v2983_v45 }
 0x3c4   : > { %v2985_v29 = vpop.f32.mrf.mxu1 }
 0x3c5   : > { %v2994_v6 = vmax.f32 %v2984_v0, 0.0 }
 0x3c7   : > { %3003 = vst.msk [vmem:[#allocation5 + $0x38] sm:$0xff] %vm2995_vm6, %v2994_v6 }
 0x3ce   : > { %v3010_v42 = vld [vmem:[#allocation5 + $0x30] ss:$2 sm:$0xff]  ;;  %v3018_v34 = vld [vmem:[#allocation5 + $0x31] ss:$2 sm:$0xff] }
 0x3cf   : > { %v3022_v23 = vmax.f32 %v3010_v42, %v3018_v34 }
 0x3d1   : > { %v3030_v9 = vcombine.high %v3022_v23, %v3022_v23 }
 0x3d3   : > { %v3038_v48 = vmax.f32 %v3022_v23, %v3030_v9 }
 0x3d5   : > { %v3044_v50 = vcombine.low %v3037_v25, %v3038_v48 }
 0x3d7   : > { %v3047_v51 = vpack.c.bf16 %v3044_v50, %v3043_v49 }
 0x3d9   : > { %3375 = vmatmul.mubr.msk.bf16.vlgmr.msra.gmra.mxu1 %vm2995_vm6, %v3047_v51 }
 0x499   : > { %v3097_v44 = vpop.f32.mrf.mxu1 }
 0x49a   : > { %v3098_v56 = vadd.f32 %v3299_v43, %v3097_v44 }
 0x49b   : > { %v3376_v27 = vpop.f32.mrf.mxu1 }
 0x49c   : > { %v3104_v59 = vmax.f32 %v3098_v56, 0.0 }
 0x49d   : > { %v3100_v41 = vpop.f32.mrf.mxu1 }
 0x49e   : > { %v3101_v26 = vadd.f32 %v3299_v43, %v3100_v41 }
 0x49f   : > { %v3377_v30 = vpop.f32.mrf.mxu1 }
 0x4a0   : > { %v3105_v57 = vmax.f32 %v3101_v26, 0.0 }
 0x4a2   : > { %v3106_v47 = vpack.c.bf16 %v3105_v57, %v3104_v59 }
 0x4a4   : > { %3387 = vmatmul.mubr.msk.bf16.vlgmr.msra.gmra.mxu0 %vm2787_vm2, %v3106_v47 }
 0x564   : > { %v3183_v61 = vpop.f32.mrf.mxu0 }
 0x565   : > { %v3184_v31 = vadd.f32 %v3301_v60, %v3183_v61 }
 0x566   : > { %v3388_v33 = vpop.f32.mrf.mxu0 }
 0x567   : > { %v3190_v3 = vsub.f32 0.0, %v3184_v31 }
 0x568   : > { %v3186_v36 = vpop.f32.mrf.mxu0 }
 0x569   : > { %v3192_v4 = vmul.f32 1.442695, %v3190_v3  ;;  %v3187_v40 = vadd.f32 %v3301_v60, %v3186_v36 }
 0x56a   : > { %v3389_v63 = vpop.f32.mrf.mxu0 }
 0x56b   : > { %4212 = vpow2.f32 %v3192_v4  ;;  %v3191_v5 = vsub.f32 0.0, %v3187_v40 }
 0x56d   : > { %v3194_v28 = vmul.f32 1.442695, %v3191_v5 }
 0x56f   : > { %4214 = vpow2.f32 %v3194_v28 }
 0x578   : > { %v4213_v8 = vpop.eup %4212 }
 0x579   : > { %v3196_v11 = vadd.f32 1.0, %v4213_v8 }
 0x57b   : > { %4216 = vrcp.f32 %v3196_v11 }
 0x57c   : > { %v4215_v17 = vpop.eup %4214 }
 0x57d   : > { %v3197_v55 = vadd.f32 1.0, %v4215_v17 }
 0x57f   : > { %4218 = vrcp.f32 %v3197_v55 }
 0x588   : > { %v4217_v10 = vpop.eup %4216 }
 0x589   : > { %3200 = vst [vmem:[%s332_s29] sm:$0xff] %v4217_v10 }
 0x58c   : > { %v4219_v19 = vpop.eup %4218 }
 0x58d   : > { %3201 = vst [vmem:[%s332_s29 + $0x8] sm:$0xff] %v4219_v19 }
 0x58e PF: > { %s19_s30 = sadd.s32 1, %s4232_s30  }
 0x58f   : > { %p16_p4 = scmp.ge.s32.totalorder %s19_s30, 4  }
 0x591   :  { %18 = sbr.rel (!%p16_p4) target bundleno = 1 (0x1), region = 130 }

</bundles_post_ra>
